<compile_context>
chip_gen: v5e
topology: v5e:2x2
jax: 0.10.0
libtpu: 0.0.40
codegen_flags: <defaults>
</compile_context>

<pallas_src>
import functools

import jax
import jax.numpy as jnp
from jax import lax
from jax.experimental import pallas as pl
from jax.experimental.pallas import tpu as pltpu

_BN_EPS = 1e-5
_LANE = 128

_VMEM = pl.BlockSpec(memory_space=pltpu.MemorySpace.VMEM)
_PARAMS = pltpu.CompilerParams(vmem_limit_bytes=32 * 1024 * 1024)


def _round_up(v, m):
    return (v + m - 1) // m * m


# ----------------------------- Pallas kernels ------------------------------

def _mm_bn_relu_kernel(x_ref, w_ref, g_ref, b_ref, o_ref, *, n_phase, c_pad):
    """y = x @ w (bf16 operands, f32 accum) -> BatchNorm(train) -> ReLU.

    Output columns are `n_phase` groups of `c_pad` channels; the groups are the
    sub-pixel phases of a stride-2 ConvTranspose and share BatchNorm channels,
    so per-channel sums fold over the (lane-aligned, 128-wide) phase slices.
    """
    y = jnp.dot(x_ref[...], w_ref[...], preferred_element_type=jnp.float32)
    inv_cnt = 1.0 / (y.shape[0] * n_phase)
    s = jnp.zeros((1, c_pad), jnp.float32)
    ss = jnp.zeros((1, c_pad), jnp.float32)
    for p in range(n_phase):                       # static unroll
        yp = y[:, p * c_pad:(p + 1) * c_pad]
        s = s + jnp.sum(yp, axis=0, keepdims=True)
        ss = ss + jnp.sum(yp * yp, axis=0, keepdims=True)
    mean = s * inv_cnt
    var = jnp.maximum(ss * inv_cnt - mean * mean, 0.0)   # clamp cancellation
    scale = g_ref[...] * lax.rsqrt(var + _BN_EPS)        # transcendental -> EUP
    shift = b_ref[...] - mean * scale
    for p in range(n_phase):
        yp = y[:, p * c_pad:(p + 1) * c_pad]
        o_ref[:, p * c_pad:(p + 1) * c_pad] = jnp.maximum(yp * scale + shift, 0.0)


def _mm_relu_kernel(x_ref, w_ref, o_ref):
    o_ref[...] = jnp.maximum(
        jnp.dot(x_ref[...], w_ref[...], preferred_element_type=jnp.float32), 0.0)


def fused_matmul_bn_relu(x, w, gamma, beta, n_phase, c_pad):
    m = x.shape[0]
    kern = functools.partial(_mm_bn_relu_kernel, n_phase=n_phase, c_pad=c_pad)
    return pl.pallas_call(
        kern,
        out_shape=jax.ShapeDtypeStruct((m, n_phase * c_pad), jnp.float32),
        in_specs=[_VMEM, _VMEM, _VMEM, _VMEM],
        out_specs=_VMEM,
        compiler_params=_PARAMS,
    )(x, w, gamma, beta)


def matmul_relu(x, w):
    m, cols = x.shape[0], w.shape[1]
    return pl.pallas_call(
        _mm_relu_kernel,
        out_shape=jax.ShapeDtypeStruct((m, cols), jnp.float32),
        in_specs=[_VMEM, _VMEM],
        out_specs=_VMEM,
        compiler_params=_PARAMS,
    )(x, w)


# ------------------------------- JAX glue ----------------------------------

def _im2col(x_pad, k, h_out, w_out):
    # x_pad: (N, Hp, Wp, C) -> (N*h_out*w_out, k*k*C); column order (kh, kw, ci)
    n, _, _, c = x_pad.shape
    cols = []
    for kh in range(k):
        for kw in range(k):
            cols.append(x_pad[:, kh:kh + h_out, kw:kw + w_out, :])
    patches = jnp.stack(cols, axis=3)  # (N, h_out, w_out, k*k, C)
    return patches.reshape(n * h_out * w_out, k * k * c)


def _pad_gamma_beta(gamma, beta, c_pad):
    cout = gamma.shape[0]
    g = jnp.pad(gamma, (0, c_pad - cout))[None, :]
    b = jnp.pad(beta, (0, c_pad - cout))[None, :]
    return g, b


def _conv_stride1_block(x, wmat, gamma, beta, k, pad_amt, h_out, w_out, cout):
    """Stride-1 convolution (+BN+ReLU) via im2col + one fused Pallas matmul."""
    n = x.shape[0]
    x_pad = jnp.pad(x, ((0, 0), (pad_amt, pad_amt), (pad_amt, pad_amt), (0, 0)))
    patches = _im2col(x_pad, k, h_out, w_out)            # (M, k*k*cin)
    kdim = patches.shape[1]
    k_pad = _round_up(kdim, _LANE)
    c_pad = _round_up(cout, _LANE)
    xb = jnp.pad(patches, ((0, 0), (0, k_pad - kdim))).astype(jnp.bfloat16)
    wb = jnp.pad(wmat, ((0, k_pad - kdim), (0, c_pad - cout))).astype(jnp.bfloat16)
    g, b = _pad_gamma_beta(gamma, beta, c_pad)
    y = fused_matmul_bn_relu(xb, wb, g, b, n_phase=1, c_pad=c_pad)
    return y[:, :cout].reshape(n, h_out, w_out, cout)


def _subpixel_weights(w_t, c_pad):
    """Sub-pixel weights for ConvTranspose2d(k=4, s=2, p=1).

    Output phase (a,b) of the deconv is a stride-1 conv of the 1-padded input
    with a 3x3 kernel whose taps are drawn from the 4x4 deconv kernel:
      a=0: window row r=0 -> kh=3, r=1 -> kh=1 ; a=1: r=1 -> kh=2, r=2 -> kh=0
    (same mapping for columns / kw).  Returns (9*cin, 4*c_pad), phases ordered
    p = 2*a + b, each phase zero-padded to c_pad channels.
    """
    cin, cout = w_t.shape[0], w_t.shape[1]
    tapmap = ({0: 3, 1: 1}, {1: 2, 2: 0})
    phases = []
    for a in range(2):
        for b in range(2):
            wk = jnp.zeros((3, 3, cin, cout), jnp.float32)
            for r, kh in tapmap[a].items():
                for c, kw in tapmap[b].items():
                    wk = wk.at[r, c].set(w_t[:, :, kh, kw])
            wk = wk.reshape(9 * cin, cout)
            phases.append(jnp.pad(wk, ((0, 0), (0, c_pad - cout))))
    return jnp.concatenate(phases, axis=1)               # (9*cin, 4*c_pad)


def _convt_stride2_block(x, w_t, gamma, beta, bn=True):
    """ConvTranspose2d(k=4, s=2, p=1) (+optional BN) + ReLU via sub-pixel matmul."""
    n, h, w, cin = x.shape
    cout = w_t.shape[1]
    c_pad = _round_up(cout, _LANE)
    x_pad = jnp.pad(x, ((0, 0), (1, 1), (1, 1), (0, 0)))
    patches = _im2col(x_pad, 3, h, w)                    # (N*h*w, 9*cin)
    kdim = patches.shape[1]
    k_pad = _round_up(kdim, _LANE)
    wmat = _subpixel_weights(w_t, c_pad)                 # (9*cin, 4*c_pad)
    xb = jnp.pad(patches, ((0, 0), (0, k_pad - kdim))).astype(jnp.bfloat16)
    wb = jnp.pad(wmat, ((0, k_pad - kdim), (0, 0))).astype(jnp.bfloat16)
    if bn:
        g, b = _pad_gamma_beta(gamma, beta, c_pad)
        y = fused_matmul_bn_relu(xb, wb, g, b, n_phase=4, c_pad=c_pad)
    else:
        y = matmul_relu(xb, wb)
    # pixel shuffle: columns are (phase p=2a+b, channel); out[n, 2m+a, 2q+b, c]
    y4 = y.reshape(n, h, w, 4, c_pad)[..., :cout].reshape(n, h, w, 2, 2, cout)
    return jnp.transpose(y4, (0, 1, 3, 2, 4, 5)).reshape(n, 2 * h, 2 * w, cout)


# --------------------------- parameter construction -------------------------

def init_mario_generator(key, isize, nz, nc, ngf, n_extra_layers):
    assert isize % 16 == 0, "isize has to be a multiple of 16"
    cngf, tisize = ngf // 2, 4
    while tisize != isize:
        cngf *= 2
        tisize *= 2

    keys = iter(jax.random.split(key, 64))

    def _w(shape):
        return 0.05 * jax.random.normal(next(keys), shape, jnp.float32)

    def _bn(c):
        g = 1.0 + 0.1 * jax.random.normal(next(keys), (c,), jnp.float32)
        b = 0.1 * jax.random.normal(next(keys), (c,), jnp.float32)
        return g, b

    layers = []
    # initial: ConvTranspose2d(nz, cngf, 4, 1, 0) + BN + ReLU
    g, b = _bn(cngf)
    layers.append(("convt_initial", dict(w=_w((nz, cngf, 4, 4)), gamma=g, beta=b)))
    csize, c = 4, cngf
    # pyramid: ConvTranspose2d(c, c//2, 4, 2, 1) + BN + ReLU
    while csize < isize // 2:
        g, b = _bn(c // 2)
        layers.append(("convt2", dict(w=_w((c, c // 2, 4, 4)), gamma=g, beta=b)))
        c //= 2
        csize *= 2
    # extra layers: Conv2d(c, c, 3, 1, 1) + BN + ReLU
    for _ in range(n_extra_layers):
        g, b = _bn(c)
        layers.append(("conv", dict(w=_w((c, c, 3, 3)), gamma=g, beta=b)))
    # final: ConvTranspose2d(c, nc, 4, 2, 1) + ReLU (module names the ReLU 'tanh')
    layers.append(("convt2_final", dict(w=_w((c, nc, 4, 4)))))
    # TODO(synk): model_file / load_from_saved_weights (checkpoint I/O) and the
    # ngpu>1 data_parallel branch have no kernel equivalent; weights are synthetic.
    return layers


def mario_generator_forward(layers, x_nchw):
    x = jnp.transpose(x_nchw, (0, 2, 3, 1))  # NCHW -> NHWC
    for kind, p in layers:
        if kind == "convt_initial":
            # stride-1, pad-0 deconv == stride-1 conv of flipped kernel over
            # (k-1)-padded input.
            w_t = p["w"]                                  # (cin, cout, 4, 4)
            cin, cout, k, _ = w_t.shape
            w_flip = w_t[:, :, ::-1, ::-1]
            wmat = jnp.transpose(w_flip, (2, 3, 0, 1)).reshape(k * k * cin, cout)
            h_out = x.shape[1] - 1 + k
            x = _conv_stride1_block(x, wmat, p["gamma"], p["beta"],
                                    k, k - 1, h_out, h_out, cout)
        elif kind == "convt2":
            x = _convt_stride2_block(x, p["w"], p["gamma"], p["beta"], bn=True)
        elif kind == "conv":
            w = p["w"]                                    # (cout, cin, 3, 3)
            cout, cin, k, _ = w.shape
            wmat = jnp.transpose(w, (2, 3, 1, 0)).reshape(k * k * cin, cout)
            x = _conv_stride1_block(x, wmat, p["gamma"], p["beta"],
                                    k, 1, x.shape[1], x.shape[2], cout)
        else:  # convt2_final: no BN, ReLU only
            x = _convt_stride2_block(x, p["w"], None, None, bn=False)
    return jnp.transpose(x, (0, 3, 1, 2))    # NHWC -> NCHW


# --------------------------- pure-JAX reference ------------------------------

def _ref_convt(x_nchw, w_t, stride, pad):
    k = w_t.shape[2]
    kern = jnp.transpose(w_t[:, :, ::-1, ::-1], (1, 0, 2, 3))   # OIHW
    return lax.conv_general_dilated(
        x_nchw, kern, window_strides=(1, 1),
        padding=[(k - 1 - pad, k - 1 - pad)] * 2,
        lhs_dilation=(stride, stride),
        dimension_numbers=("NCHW", "OIHW", "NCHW"))


def _ref_conv(x_nchw, w):
    return lax.conv_general_dilated(
        x_nchw, w, window_strides=(1, 1), padding=[(1, 1), (1, 1)],
        dimension_numbers=("NCHW", "OIHW", "NCHW"))


def _ref_bn_relu(y, gamma, beta):
    mean = jnp.mean(y, axis=(0, 2, 3), keepdims=True)
    var = jnp.mean((y - mean) ** 2, axis=(0, 2, 3), keepdims=True)
    yn = (y - mean) * lax.rsqrt(var + _BN_EPS)
    return jnp.maximum(yn * gamma[None, :, None, None] + beta[None, :, None, None], 0.0)


def reference_forward(layers, x_nchw):
    x = x_nchw
    for kind, p in layers:
        if kind == "convt_initial":
            x = _ref_bn_relu(_ref_convt(x, p["w"], 1, 0), p["gamma"], p["beta"])
        elif kind == "convt2":
            x = _ref_bn_relu(_ref_convt(x, p["w"], 2, 1), p["gamma"], p["beta"])
        elif kind == "conv":
            x = _ref_bn_relu(_ref_conv(x, p["w"]), p["gamma"], p["beta"])
        else:
            x = jnp.maximum(_ref_convt(x, p["w"], 2, 1), 0.0)
    return x


# ----------------------------------- main -----------------------------------

if __name__ == "__main__":
    # Small but architecture-consistent config: isize=16 -> cngf=64,
    # one pyramid stage (64->32), one extra layer, final 32->nc.
    isize, nz, nc, ngf, n_extra_layers = 16, 8, 4, 32, 1
    batch = 2

    key = jax.random.PRNGKey(0)
    k_params, k_input = jax.random.split(key)

    layers = init_mario_generator(k_params, isize, nz, nc, ngf, n_extra_layers)
    # Latent input, as in levels_from_latent: (n, nz, 1, 1)
    x = jax.random.normal(k_input, (batch, nz, 1, 1), jnp.float32)

    fwd = jax.jit(lambda xin: mario_generator_forward(layers, xin))
    out = jax.block_until_ready(fwd(x))

    assert out.shape == (batch, nc, isize, isize), out.shape
    assert bool(jnp.all(jnp.isfinite(out)))
    assert bool(jnp.all(out >= 0.0))  # final layer is ReLU

    # Validate against a pure-JAX f32 reference (bf16 MXU operands => loose tol).
    ref = jax.block_until_ready(reference_forward(layers, x))
    err = float(jnp.max(jnp.abs(out - ref)) / (jnp.max(jnp.abs(ref)) + 1e-6))
    assert err < 5e-2, f"mismatch vs reference: rel-err={err}"

    print("KERNEL_OK")
</pallas_src>

<mosaic_0001>
module attributes {stable_mosaic.version = 11 : i64} {
  func.func @_mm_bn_relu_kernel(%arg0: memref<32x128xbf16, #tpu.memory_space<vmem>>, %arg1: memref<128x128xbf16, #tpu.memory_space<vmem>>, %arg2: memref<1x128xf32, #tpu.memory_space<vmem>>, %arg3: memref<1x128xf32, #tpu.memory_space<vmem>>, %arg4: memref<32x128xf32, #tpu.memory_space<vmem>>) attributes {dimension_semantics = [], scalar_prefetch = 0 : i64, scratch_operands = 0 : i64, tpu.core_type = #tpu.core_type<tc>} {
    %c0 = arith.constant 0 : index
    %c0_0 = arith.constant 0 : index
    %0 = vector.load %arg0[%c0, %c0_0] : memref<32x128xbf16, #tpu.memory_space<vmem>>, vector<32x128xbf16>
    %c0_1 = arith.constant 0 : index
    %c0_2 = arith.constant 0 : index
    %1 = vector.load %arg1[%c0_1, %c0_2] : memref<128x128xbf16, #tpu.memory_space<vmem>>, vector<128x128xbf16>
    %cst = arith.constant dense<0.000000e+00> : vector<32x128xf32>
    %2 = tpu.matmul %0, %1, %cst {dimension_numbers = #tpu.dot_dimension_numbers<[1], [0], [0], [1], [0, 0, 1, 1], [], []>} : vector<32x128xbf16>, vector<128x128xbf16>, vector<32x128xf32> -> vector<32x128xf32>
    %cst_3 = arith.constant 0.000000e+00 : f32
    %3 = vector.broadcast %cst_3 : f32 to vector<1x128xf32>
    %cst_4 = arith.constant 0.000000e+00 : f32
    %4 = vector.broadcast %cst_4 : f32 to vector<1x128xf32>
    %cst_5 = arith.constant dense<0.000000e+00> : vector<128xf32>
    %5 = vector.multi_reduction <add>, %2, %cst_5 [0] : vector<32x128xf32> to vector<128xf32>
    %6 = vector.shape_cast %5 : vector<128xf32> to vector<1x128xf32>
    %7 = arith.addf %3, %6 : vector<1x128xf32>
    %8 = arith.mulf %2, %2 : vector<32x128xf32>
    %cst_6 = arith.constant dense<0.000000e+00> : vector<128xf32>
    %9 = vector.multi_reduction <add>, %8, %cst_6 [0] : vector<32x128xf32> to vector<128xf32>
    %10 = vector.shape_cast %9 : vector<128xf32> to vector<1x128xf32>
    %11 = arith.addf %4, %10 : vector<1x128xf32>
    %cst_7 = arith.constant 3.125000e-02 : f32
    %12 = vector.broadcast %cst_7 : f32 to vector<1x128xf32>
    %13 = arith.mulf %7, %12 : vector<1x128xf32>
    %cst_8 = arith.constant 3.125000e-02 : f32
    %14 = vector.broadcast %cst_8 : f32 to vector<1x128xf32>
    %15 = arith.mulf %11, %14 : vector<1x128xf32>
    %16 = arith.mulf %13, %13 : vector<1x128xf32>
    %17 = arith.subf %15, %16 : vector<1x128xf32>
    %cst_9 = arith.constant 0.000000e+00 : f32
    %18 = vector.broadcast %cst_9 : f32 to vector<1x128xf32>
    %19 = arith.maximumf %17, %18 : vector<1x128xf32>
    %c0_10 = arith.constant 0 : index
    %c0_11 = arith.constant 0 : index
    %20 = vector.load %arg2[%c0_10, %c0_11] : memref<1x128xf32, #tpu.memory_space<vmem>>, vector<1x128xf32>
    %cst_12 = arith.constant 9.99999974E-6 : f32
    %21 = vector.broadcast %cst_12 : f32 to vector<1x128xf32>
    %22 = arith.addf %19, %21 : vector<1x128xf32>
    %23 = math.rsqrt %22 : vector<1x128xf32>
    %24 = arith.mulf %20, %23 : vector<1x128xf32>
    %c0_13 = arith.constant 0 : index
    %c0_14 = arith.constant 0 : index
    %25 = vector.load %arg3[%c0_13, %c0_14] : memref<1x128xf32, #tpu.memory_space<vmem>>, vector<1x128xf32>
    %26 = arith.mulf %13, %24 : vector<1x128xf32>
    %27 = arith.subf %25, %26 : vector<1x128xf32>
    %28 = vector.broadcast %24 : vector<1x128xf32> to vector<32x128xf32>
    %29 = arith.mulf %2, %28 : vector<32x128xf32>
    %30 = vector.broadcast %27 : vector<1x128xf32> to vector<32x128xf32>
    %31 = arith.addf %29, %30 : vector<32x128xf32>
    %cst_15 = arith.constant 0.000000e+00 : f32
    %32 = vector.broadcast %cst_15 : f32 to vector<32x128xf32>
    %33 = arith.maximumf %31, %32 : vector<32x128xf32>
    %c0_16 = arith.constant 0 : index
    %c0_17 = arith.constant 0 : index
    %34 = vector.load %arg4[%c0_16, %c0_17] : memref<32x128xf32, #tpu.memory_space<vmem>>, vector<32x128xf32>
    tpu.vector_store %arg4[%c0_16, %c0_17], %33 {strides = array<i32>} : memref<32x128xf32, #tpu.memory_space<vmem>>, vector<32x128xf32>,
    return
  }
}

module attributes {stable_mosaic.version = 11 : i64} {
  func.func @_mm_bn_relu_kernel(%arg0: memref<32x640xbf16, #tpu.memory_space<vmem>>, %arg1: memref<640x512xbf16, #tpu.memory_space<vmem>>, %arg2: memref<1x128xf32, #tpu.memory_space<vmem>>, %arg3: memref<1x128xf32, #tpu.memory_space<vmem>>, %arg4: memref<32x512xf32, #tpu.memory_space<vmem>>) attributes {dimension_semantics = [], scalar_prefetch = 0 : i64, scratch_operands = 0 : i64, tpu.core_type = #tpu.core_type<tc>} {
    %c0 = arith.constant 0 : index
    %c0_0 = arith.constant 0 : index
    %0 = vector.load %arg0[%c0, %c0_0] : memref<32x640xbf16, #tpu.memory_space<vmem>>, vector<32x640xbf16>
    %c0_1 = arith.constant 0 : index
    %c0_2 = arith.constant 0 : index
    %1 = vector.load %arg1[%c0_1, %c0_2] : memref<640x512xbf16, #tpu.memory_space<vmem>>, vector<640x512xbf16>
    %cst = arith.constant dense<0.000000e+00> : vector<32x512xf32>
    %2 = tpu.matmul %0, %1, %cst {dimension_numbers = #tpu.dot_dimension_numbers<[1], [0], [0], [1], [0, 0, 1, 1], [], []>} : vector<32x640xbf16>, vector<640x512xbf16>, vector<32x512xf32> -> vector<32x512xf32>
    %cst_3 = arith.constant 0.000000e+00 : f32
    %3 = vector.broadcast %cst_3 : f32 to vector<1x128xf32>
    %cst_4 = arith.constant 0.000000e+00 : f32
    %4 = vector.broadcast %cst_4 : f32 to vector<1x128xf32>
    %5 = vector.extract_strided_slice %2 {offsets = [0, 0], sizes = [32, 128], strides = [1, 1]} : vector<32x512xf32> to vector<32x128xf32>
    %cst_5 = arith.constant dense<0.000000e+00> : vector<128xf32>
    %6 = vector.multi_reduction <add>, %5, %cst_5 [0] : vector<32x128xf32> to vector<128xf32>
    %7 = vector.shape_cast %6 : vector<128xf32> to vector<1x128xf32>
    %8 = arith.addf %3, %7 : vector<1x128xf32>
    %9 = arith.mulf %5, %5 : vector<32x128xf32>
    %cst_6 = arith.constant dense<0.000000e+00> : vector<128xf32>
    %10 = vector.multi_reduction <add>, %9, %cst_6 [0] : vector<32x128xf32> to vector<128xf32>
    %11 = vector.shape_cast %10 : vector<128xf32> to vector<1x128xf32>
    %12 = arith.addf %4, %11 : vector<1x128xf32>
    %13 = vector.extract_strided_slice %2 {offsets = [0, 128], sizes = [32, 128], strides = [1, 1]} : vector<32x512xf32> to vector<32x128xf32>
    %cst_7 = arith.constant dense<0.000000e+00> : vector<128xf32>
    %14 = vector.multi_reduction <add>, %13, %cst_7 [0] : vector<32x128xf32> to vector<128xf32>
    %15 = vector.shape_cast %14 : vector<128xf32> to vector<1x128xf32>
    %16 = arith.addf %8, %15 : vector<1x128xf32>
    %17 = arith.mulf %13, %13 : vector<32x128xf32>
    %cst_8 = arith.constant dense<0.000000e+00> : vector<128xf32>
    %18 = vector.multi_reduction <add>, %17, %cst_8 [0] : vector<32x128xf32> to vector<128xf32>
    %19 = vector.shape_cast %18 : vector<128xf32> to vector<1x128xf32>
    %20 = arith.addf %12, %19 : vector<1x128xf32>
    %21 = vector.extract_strided_slice %2 {offsets = [0, 256], sizes = [32, 128], strides = [1, 1]} : vector<32x512xf32> to vector<32x128xf32>
    %cst_9 = arith.constant dense<0.000000e+00> : vector<128xf32>
    %22 = vector.multi_reduction <add>, %21, %cst_9 [0] : vector<32x128xf32> to vector<128xf32>
    %23 = vector.shape_cast %22 : vector<128xf32> to vector<1x128xf32>
    %24 = arith.addf %16, %23 : vector<1x128xf32>
    %25 = arith.mulf %21, %21 : vector<32x128xf32>
    %cst_10 = arith.constant dense<0.000000e+00> : vector<128xf32>
    %26 = vector.multi_reduction <add>, %25, %cst_10 [0] : vector<32x128xf32> to vector<128xf32>
    %27 = vector.shape_cast %26 : vector<128xf32> to vector<1x128xf32>
    %28 = arith.addf %20, %27 : vector<1x128xf32>
    %29 = vector.extract_strided_slice %2 {offsets = [0, 384], sizes = [32, 128], strides = [1, 1]} : vector<32x512xf32> to vector<32x128xf32>
    %cst_11 = arith.constant dense<0.000000e+00> : vector<128xf32>
    %30 = vector.multi_reduction <add>, %29, %cst_11 [0] : vector<32x128xf32> to vector<128xf32>
    %31 = vector.shape_cast %30 : vector<128xf32> to vector<1x128xf32>
    %32 = arith.addf %24, %31 : vector<1x128xf32>
    %33 = arith.mulf %29, %29 : vector<32x128xf32>
    %cst_12 = arith.constant dense<0.000000e+00> : vector<128xf32>
    %34 = vector.multi_reduction <add>, %33, %cst_12 [0] : vector<32x128xf32> to vector<128xf32>
    %35 = vector.shape_cast %34 : vector<128xf32> to vector<1x128xf32>
    %36 = arith.addf %28, %35 : vector<1x128xf32>
    %cst_13 = arith.constant 7.812500e-03 : f32
    %37 = vector.broadcast %cst_13 : f32 to vector<1x128xf32>
    %38 = arith.mulf %32, %37 : vector<1x128xf32>
    %cst_14 = arith.constant 7.812500e-03 : f32
    %39 = vector.broadcast %cst_14 : f32 to vector<1x128xf32>
    %40 = arith.mulf %36, %39 : vector<1x128xf32>
    %41 = arith.mulf %38, %38 : vector<1x128xf32>
    %42 = arith.subf %40, %41 : vector<1x128xf32>
    %cst_15 = arith.constant 0.000000e+00 : f32
    %43 = vector.broadcast %cst_15 : f32 to vector<1x128xf32>
    %44 = arith.maximumf %42, %43 : vector<1x128xf32>
    %c0_16 = arith.constant 0 : index
    %c0_17 = arith.constant 0 : index
    %45 = vector.load %arg2[%c0_16, %c0_17] : memref<1x128xf32, #tpu.memory_space<vmem>>, vector<1x128xf32>
    %cst_18 = arith.constant 9.99999974E-6 : f32
    %46 = vector.broadcast %cst_18 : f32 to vector<1x128xf32>
    %47 = arith.addf %44, %46 : vector<1x128xf32>
    %48 = math.rsqrt %47 : vector<1x128xf32>
    %49 = arith.mulf %45, %48 : vector<1x128xf32>
    %c0_19 = arith.constant 0 : index
    %c0_20 = arith.constant 0 : index
    %50 = vector.load %arg3[%c0_19, %c0_20] : memref<1x128xf32, #tpu.memory_space<vmem>>, vector<1x128xf32>
    %51 = arith.mulf %38, %49 : vector<1x128xf32>
    %52 = arith.subf %50, %51 : vector<1x128xf32>
    %53 = vector.extract_strided_slice %2 {offsets = [0, 0], sizes = [32, 128], strides = [1, 1]} : vector<32x512xf32> to vector<32x128xf32>
    %54 = vector.broadcast %49 : vector<1x128xf32> to vector<32x128xf32>
    %55 = arith.mulf %53, %54 : vector<32x128xf32>
    %56 = vector.broadcast %52 : vector<1x128xf32> to vector<32x128xf32>
    %57 = arith.addf %55, %56 : vector<32x128xf32>
    %cst_21 = arith.constant 0.000000e+00 : f32
    %58 = vector.broadcast %cst_21 : f32 to vector<32x128xf32>
    %59 = arith.maximumf %57, %58 : vector<32x128xf32>
    %c0_22 = arith.constant 0 : index
    %c0_23 = arith.constant 0 : index
    %60 = vector.load %arg4[%c0_22, %c0_23] : memref<32x512xf32, #tpu.memory_space<vmem>>, vector<32x128xf32>
    tpu.vector_store %arg4[%c0_22, %c0_23], %59 {strides = array<i32>} : memref<32x512xf32, #tpu.memory_space<vmem>>, vector<32x128xf32>,
    %61 = vector.extract_strided_slice %2 {offsets = [0, 128], sizes = [32, 128], strides = [1, 1]} : vector<32x512xf32> to vector<32x128xf32>
    %62 = vector.broadcast %49 : vector<1x128xf32> to vector<32x128xf32>
    %63 = arith.mulf %61, %62 : vector<32x128xf32>
    %64 = vector.broadcast %52 : vector<1x128xf32> to vector<32x128xf32>
    %65 = arith.addf %63, %64 : vector<32x128xf32>
    %cst_24 = arith.constant 0.000000e+00 : f32
    %66 = vector.broadcast %cst_24 : f32 to vector<32x128xf32>
    %67 = arith.maximumf %65, %66 : vector<32x128xf32>
    %c0_25 = arith.constant 0 : index
    %c128 = arith.constant 128 : index
    %68 = vector.load %arg4[%c0_25, %c128] : memref<32x512xf32, #tpu.memory_space<vmem>>, vector<32x128xf32>
    tpu.vector_store %arg4[%c0_25, %c128], %67 {strides = array<i32>} : memref<32x512xf32, #tpu.memory_space<vmem>>, vector<32x128xf32>,
    %69 = vector.extract_strided_slice %2 {offsets = [0, 256], sizes = [32, 128], strides = [1, 1]} : vector<32x512xf32> to vector<32x128xf32>
    %70 = vector.broadcast %49 : vector<1x128xf32> to vector<32x128xf32>
    %71 = arith.mulf %69, %70 : vector<32x128xf32>
    %72 = vector.broadcast %52 : vector<1x128xf32> to vector<32x128xf32>
    %73 = arith.addf %71, %72 : vector<32x128xf32>
    %cst_26 = arith.constant 0.000000e+00 : f32
    %74 = vector.broadcast %cst_26 : f32 to vector<32x128xf32>
    %75 = arith.maximumf %73, %74 : vector<32x128xf32>
    %c0_27 = arith.constant 0 : index
    %c256 = arith.constant 256 : index
    %76 = vector.load %arg4[%c0_27, %c256] : memref<32x512xf32, #tpu.memory_space<vmem>>, vector<32x128xf32>
    tpu.vector_store %arg4[%c0_27, %c256], %75 {strides = array<i32>} : memref<32x512xf32, #tpu.memory_space<vmem>>, vector<32x128xf32>,
    %77 = vector.extract_strided_slice %2 {offsets = [0, 384], sizes = [32, 128], strides = [1, 1]} : vector<32x512xf32> to vector<32x128xf32>
    %78 = vector.broadcast %49 : vector<1x128xf32> to vector<32x128xf32>
    %79 = arith.mulf %77, %78 : vector<32x128xf32>
    %80 = vector.broadcast %52 : vector<1x128xf32> to vector<32x128xf32>
    %81 = arith.addf %79, %80 : vector<32x128xf32>
    %cst_28 = arith.constant 0.000000e+00 : f32
    %82 = vector.broadcast %cst_28 : f32 to vector<32x128xf32>
    %83 = arith.maximumf %81, %82 : vector<32x128xf32>
    %c0_29 = arith.constant 0 : index
    %c384 = arith.constant 384 : index
    %84 = vector.load %arg4[%c0_29, %c384] : memref<32x512xf32, #tpu.memory_space<vmem>>, vector<32x128xf32>
    tpu.vector_store %arg4[%c0_29, %c384], %83 {strides = array<i32>} : memref<32x512xf32, #tpu.memory_space<vmem>>, vector<32x128xf32>,
    return
  }
}

module attributes {stable_mosaic.version = 11 : i64} {
  func.func @_mm_bn_relu_kernel(%arg0: memref<128x384xbf16, #tpu.memory_space<vmem>>, %arg1: memref<384x128xbf16, #tpu.memory_space<vmem>>, %arg2: memref<1x128xf32, #tpu.memory_space<vmem>>, %arg3: memref<1x128xf32, #tpu.memory_space<vmem>>, %arg4: memref<128x128xf32, #tpu.memory_space<vmem>>) attributes {dimension_semantics = [], scalar_prefetch = 0 : i64, scratch_operands = 0 : i64, tpu.core_type = #tpu.core_type<tc>} {
    %c0 = arith.constant 0 : index
    %c0_0 = arith.constant 0 : index
    %0 = vector.load %arg0[%c0, %c0_0] : memref<128x384xbf16, #tpu.memory_space<vmem>>, vector<128x384xbf16>
    %c0_1 = arith.constant 0 : index
    %c0_2 = arith.constant 0 : index
    %1 = vector.load %arg1[%c0_1, %c0_2] : memref<384x128xbf16, #tpu.memory_space<vmem>>, vector<384x128xbf16>
    %cst = arith.constant dense<0.000000e+00> : vector<128x128xf32>
    %2 = tpu.matmul %0, %1, %cst {dimension_numbers = #tpu.dot_dimension_numbers<[1], [0], [0], [1], [0, 0, 1, 1], [], []>} : vector<128x384xbf16>, vector<384x128xbf16>, vector<128x128xf32> -> vector<128x128xf32>
    %cst_3 = arith.constant 0.000000e+00 : f32
    %3 = vector.broadcast %cst_3 : f32 to vector<1x128xf32>
    %cst_4 = arith.constant 0.000000e+00 : f32
    %4 = vector.broadcast %cst_4 : f32 to vector<1x128xf32>
    %cst_5 = arith.constant dense<0.000000e+00> : vector<128xf32>
    %5 = vector.multi_reduction <add>, %2, %cst_5 [0] : vector<128x128xf32> to vector<128xf32>
    %6 = vector.shape_cast %5 : vector<128xf32> to vector<1x128xf32>
    %7 = arith.addf %3, %6 : vector<1x128xf32>
    %8 = arith.mulf %2, %2 : vector<128x128xf32>
    %cst_6 = arith.constant dense<0.000000e+00> : vector<128xf32>
    %9 = vector.multi_reduction <add>, %8, %cst_6 [0] : vector<128x128xf32> to vector<128xf32>
    %10 = vector.shape_cast %9 : vector<128xf32> to vector<1x128xf32>
    %11 = arith.addf %4, %10 : vector<1x128xf32>
    %cst_7 = arith.constant 7.812500e-03 : f32
    %12 = vector.broadcast %cst_7 : f32 to vector<1x128xf32>
    %13 = arith.mulf %7, %12 : vector<1x128xf32>
    %cst_8 = arith.constant 7.812500e-03 : f32
    %14 = vector.broadcast %cst_8 : f32 to vector<1x128xf32>
    %15 = arith.mulf %11, %14 : vector<1x128xf32>
    %16 = arith.mulf %13, %13 : vector<1x128xf32>
    %17 = arith.subf %15, %16 : vector<1x128xf32>
    %cst_9 = arith.constant 0.000000e+00 : f32
    %18 = vector.broadcast %cst_9 : f32 to vector<1x128xf32>
    %19 = arith.maximumf %17, %18 : vector<1x128xf32>
    %c0_10 = arith.constant 0 : index
    %c0_11 = arith.constant 0 : index
    %20 = vector.load %arg2[%c0_10, %c0_11] : memref<1x128xf32, #tpu.memory_space<vmem>>, vector<1x128xf32>
    %cst_12 = arith.constant 9.99999974E-6 : f32
    %21 = vector.broadcast %cst_12 : f32 to vector<1x128xf32>
    %22 = arith.addf %19, %21 : vector<1x128xf32>
    %23 = math.rsqrt %22 : vector<1x128xf32>
    %24 = arith.mulf %20, %23 : vector<1x128xf32>
    %c0_13 = arith.constant 0 : index
    %c0_14 = arith.constant 0 : index
    %25 = vector.load %arg3[%c0_13, %c0_14] : memref<1x128xf32, #tpu.memory_space<vmem>>, vector<1x128xf32>
    %26 = arith.mulf %13, %24 : vector<1x128xf32>
    %27 = arith.subf %25, %26 : vector<1x128xf32>
    %28 = vector.broadcast %24 : vector<1x128xf32> to vector<128x128xf32>
    %29 = arith.mulf %2, %28 : vector<128x128xf32>
    %30 = vector.broadcast %27 : vector<1x128xf32> to vector<128x128xf32>
    %31 = arith.addf %29, %30 : vector<128x128xf32>
    %cst_15 = arith.constant 0.000000e+00 : f32
    %32 = vector.broadcast %cst_15 : f32 to vector<128x128xf32>
    %33 = arith.maximumf %31, %32 : vector<128x128xf32>
    %c0_16 = arith.constant 0 : index
    %c0_17 = arith.constant 0 : index
    %34 = vector.load %arg4[%c0_16, %c0_17] : memref<128x128xf32, #tpu.memory_space<vmem>>, vector<128x128xf32>
    tpu.vector_store %arg4[%c0_16, %c0_17], %33 {strides = array<i32>} : memref<128x128xf32, #tpu.memory_space<vmem>>, vector<128x128xf32>,
    return
  }
}

module attributes {stable_mosaic.version = 11 : i64} {
  func.func @_mm_relu_kernel(%arg0: memref<128x384xbf16, #tpu.memory_space<vmem>>, %arg1: memref<384x512xbf16, #tpu.memory_space<vmem>>, %arg2: memref<128x512xf32, #tpu.memory_space<vmem>>) attributes {dimension_semantics = [], scalar_prefetch = 0 : i64, scratch_operands = 0 : i64, tpu.core_type = #tpu.core_type<tc>} {
    %c0 = arith.constant 0 : index
    %c0_0 = arith.constant 0 : index
    %0 = vector.load %arg0[%c0, %c0_0] : memref<128x384xbf16, #tpu.memory_space<vmem>>, vector<128x384xbf16>
    %c0_1 = arith.constant 0 : index
    %c0_2 = arith.constant 0 : index
    %1 = vector.load %arg1[%c0_1, %c0_2] : memref<384x512xbf16, #tpu.memory_space<vmem>>, vector<384x512xbf16>
    %cst = arith.constant dense<0.000000e+00> : vector<128x512xf32>
    %2 = tpu.matmul %0, %1, %cst {dimension_numbers = #tpu.dot_dimension_numbers<[1], [0], [0], [1], [0, 0, 1, 1], [], []>} : vector<128x384xbf16>, vector<384x512xbf16>, vector<128x512xf32> -> vector<128x512xf32>
    %cst_3 = arith.constant 0.000000e+00 : f32
    %3 = vector.broadcast %cst_3 : f32 to vector<128x512xf32>
    %4 = arith.maximumf %2, %3 : vector<128x512xf32>
    %c0_4 = arith.constant 0 : index
    %c0_5 = arith.constant 0 : index
    %5 = vector.load %arg2[%c0_4, %c0_5] : memref<128x512xf32, #tpu.memory_space<vmem>>, vector<128x512xf32>
    tpu.vector_store %arg2[%c0_4, %c0_5], %4 {strides = array<i32>} : memref<128x512xf32, #tpu.memory_space<vmem>>, vector<128x512xf32>,
    return
  }
}

</mosaic_0001>

<bundles_post_ra>
// kernel: _lambda_.4
= control target key start
LH: loop header
LB: loop body
LE: loop exit
PB: predicated region body
PF: predicated region fallthrough
CT: control target
= control target key end

     0   :  { %s320_s1 = inlined_call_operand.vmem [shape: bf16[128,128], index: 1, kind: input, shape index: {}]   ;;  %s321_s0 = inlined_call_operand.vmem [shape: bf16[32,128], index: 0, kind: input, shape index: {}]   ;;  %s322_s2 = inlined_call_operand.vmem [shape: f32[1,128], index: 2, kind: input, shape index: {}]   ;;  %s323_s3 = inlined_call_operand.vmem [shape: f32[1,128], index: 3, kind: input, shape index: {}]   ;;  %s324_s4 = inlined_call_operand.vmem [shape: f32[32,128], index: 4, kind: output, shape index: {}]  }
   0x1   :  { %v236_v0 = vld [vmem:[%s320_s1 + $0x38] sm:$0xff]  ;;  %v235_v1 = vld [vmem:[%s320_s1 + $0x30] sm:$0xff]  ;;  %v234_v2 = vld [vmem:[%s320_s1 + $0x28] sm:$0xff] }
   0x2   :  { %97 = vmatpush.bf16.msra.mxu0 %v236_v0  ;;  %237 = vmatpush.bf16.msra.mxu1 %v236_v0  ;;  %v233_v3 = vld [vmem:[%s320_s1 + $0x20] sm:$0xff]  ;;  %v232_v4 = vld [vmem:[%s320_s1 + $0x18] sm:$0xff]  ;;  %v231_v5 = vld [vmem:[%s320_s1 + $0x10] sm:$0xff] }
   0x3   :  { %v230_v6 = vld [vmem:[%s320_s1 + $0x8] sm:$0xff]  ;;  %v229_v7 = vld [vmem:[%s320_s1] sm:$0xff] }
   0x4   :  { %v227_v8 = vld [vmem:[%s321_s0] sm:$0xff]  ;;  %v228_v9 = vld [vmem:[%s321_s0 + $0x8] sm:$0xff] }
   0x5   :  { %v145_v47 = vld [vmem:[%s322_s2] sm:$0x1] }
   0x6   :  { %98 = vmatpush.bf16.msra.mxu0 %v235_v1  ;;  %238 = vmatpush.bf16.msra.mxu1 %v235_v1  ;;  %v158_v51 = vld [vmem:[%s323_s3] sm:$0x1] }
   0xa   :  { %99 = vmatpush.bf16.msra.mxu0 %v234_v2  ;;  %239 = vmatpush.bf16.msra.mxu1 %v234_v2 }
   0xe   :  { %100 = vmatpush.bf16.msra.mxu0 %v233_v3  ;;  %240 = vmatpush.bf16.msra.mxu1 %v233_v3 }
  0x12   :  { %101 = vmatpush.bf16.msra.mxu0 %v232_v4  ;;  %241 = vmatpush.bf16.msra.mxu1 %v232_v4 }
  0x16   :  { %102 = vmatpush.bf16.msra.mxu0 %v231_v5  ;;  %242 = vmatpush.bf16.msra.mxu1 %v231_v5 }
  0x1a   :  { %103 = vmatpush.bf16.msra.mxu0 %v230_v6  ;;  %243 = vmatpush.bf16.msra.mxu1 %v230_v6 }
  0x1e   :  { %104 = vmatpush.bf16.msra.mxu0 %v229_v7  ;;  %244 = vmatpush.bf16.msra.mxu1 %v229_v7 }
  0x21   :  { %105 = vmatmul.bf16.vlgmr.msra.gmra.mxu0 %v227_v8  ;;  %110 = vmatmul.bf16.vlgmr.msra.gmra.mxu1 %v228_v9 }
  0x9e   :  { %v106_v10 = vpop.f32.mrf.mxu0  ;;  %v111_v11 = vpop.f32.mrf.mxu1 }
  0x9f   :  { %v126_v13 = vmul.f32 %v106_v10, %v106_v10  ;;  %v128_v17 = vmul.f32 %v111_v11, %v111_v11 }
  0xa6   :  { %v108_v12 = vpop.f32.mrf.mxu0  ;;  %v113_v16 = vpop.f32.mrf.mxu1 }
  0xa7   :  { %v116_v14 = vadd.f32 %v108_v12, %v106_v10  ;;  %v127_v15 = vmul.f32 %v108_v12, %v108_v12  ;;  %v129_v21 = vmul.f32 %v113_v16, %v113_v16 }
  0xa9   :  { %v130_v18 = vadd.f32 %v127_v15, %v126_v13  ;;  %v117_v19 = vadd.f32 %v116_v14, %v111_v11 }
  0xab   :  { %v118_v20 = vadd.f32 %v117_v19, %v113_v16  ;;  %v131_v22 = vadd.f32 %v130_v18, %v128_v17 }
  0xad   :  { %v119_v23 = vrot.slane %v118_v20, 4  ;;  %v132_v24 = vadd.f32 %v131_v22, %v129_v21 }
  0xaf   :  { %v120_v25 = vadd.f32 %v119_v23, %v118_v20  ;;  %v133_v26 = vrot.slane %v132_v24, 4 }
  0xb1   :  { %v121_v27 = vrot.slane %v120_v25, 2  ;;  %v134_v28 = vadd.f32 %v133_v26, %v132_v24 }
  0xb3   :  { %v122_v29 = vadd.f32 %v121_v27, %v120_v25  ;;  %v135_v30 = vrot.slane %v134_v28, 2 }
  0xb5   :  { %v123_v31 = vrot.slane %v122_v29, 1  ;;  %v136_v32 = vadd.f32 %v135_v30, %v134_v28 }
  0xb7   :  { %v124_v33 = vadd.f32 %v123_v31, %v122_v29  ;;  %v137_v34 = vrot.slane %v136_v32, 1 }
  0xb9   :  { %v138_v35 = vadd.f32 %v137_v34, %v136_v32  ;;  %v140_v36 = vmul.f32 0.03125, %v124_v33 }
  0xbb   :  { %v141_v37 = vmul.f32 0.03125, %v138_v35  ;;  %v142_v38 = vmul.f32 %v140_v36, %v140_v36 }
  0xbd   :  { %v143_v39 = vsub.f32 %v141_v37, %v142_v38 }
  0xbf   :  { %v144_v40 = vmax.f32 %v143_v39, 0.0 }
  0xc1   :  { %v146_v41 = vadd.f32 1e-05, %v144_v40 }
  0xc3   :  { %245 = vrsqrt.f32 %v146_v41  ;;  %vm153_vm1 = vweird.f32 %v146_v41 }
  0xc9   :  { %v246_v42 = vpop.eup %245 }
  0xca   :  { %v148_v43 = vmul.f32 %v246_v42, %v146_v41  ;;  %vm154_vm0 = vweird.f32 %v246_v42 }
  0xcb   :  { %vm155_vm2 = vmor %vm153_vm1, %vm154_vm0 }
  0xcc   :  { %v149_v44 = vmul.f32 %v246_v42, %v148_v43 }
  0xce   :  { %v150_v45 = vmul.f32 0.5, %v149_v44 }
  0xd0   :  { %v151_v46 = vsub.f32 1.5, %v150_v45 }
  0xd2   :  { %v152_v48 = vmul.f32 %v246_v42, %v151_v46 }
  0xd4   :  { %v156_v49 = vsel %vm155_vm2, %v246_v42, %v152_v48 }
  0xd5   :  { %v157_v50 = vmul.f32 %v156_v49, %v145_v47 }
  0xd7   :  { %v159_v52 = vmul.f32 %v157_v50, %v140_v36  ;;  %v162_v53 = vperm.slane %v157_v50, 0 }
  0xd9   :  { %v160_v54 = vsub.f32 %v158_v51, %v159_v52  ;;  %v164_v55 = vmul.f32 %v162_v53, %v106_v10  ;;  %v165_v56 = vmul.f32 %v162_v53, %v108_v12  ;;  %v166_v57 = vmul.f32 %v162_v53, %v111_v11 }
  0xda   :  { %v167_v58 = vmul.f32 %v162_v53, %v113_v16 }
  0xdb   :  { %v169_v59 = vperm.slane %v160_v54, 0 }
  0xdd   :  { %v171_v60 = vadd.f32 %v169_v59, %v164_v55  ;;  %v172_v61 = vadd.f32 %v169_v59, %v165_v56  ;;  %v173_v62 = vadd.f32 %v169_v59, %v166_v57  ;;  %v174_v63 = vadd.f32 %v169_v59, %v167_v58 }
  0xdf   :  { %v175_v0 = vmax.f32 %v171_v60, 0.0  ;;  %v176_v1 = vmax.f32 %v172_v61, 0.0  ;;  %v177_v2 = vmax.f32 %v173_v62, 0.0  ;;  %v178_v3 = vmax.f32 %v174_v63, 0.0 }
  0xe1   :  { %179 = vst [vmem:[%s324_s4] sm:$0xff] %v175_v0 }
  0xe2   :  { %180 = vst [vmem:[%s324_s4 + $0x8] sm:$0xff] %v176_v1 }
  0xe3   :  { %181 = vst [vmem:[%s324_s4 + $0x10] sm:$0xff] %v177_v2 }
  0xe4   :  { %182 = vst [vmem:[%s324_s4 + $0x18] sm:$0xff] %v178_v3 }

// kernel: _lambda_.5
= control target key start
LH: loop header
LB: loop body
LE: loop exit
PB: predicated region body
PF: predicated region fallthrough
CT: control target
= control target key end

     0   :  { %s3725_s1 = inlined_call_operand.vmem [shape: bf16[640,512], index: 1, kind: input, shape index: {}]   ;;  %s3726_s0 = inlined_call_operand.vmem [shape: bf16[32,640], index: 0, kind: input, shape index: {}]   ;;  %s3727_s2 = inlined_call_operand.vmem [shape: f32[1,128], index: 2, kind: input, shape index: {}]   ;;  %s3728_s3 = inlined_call_operand.vmem [shape: f32[1,128], index: 3, kind: input, shape index: {}]   ;;  %s3729_s4 = inlined_call_operand.vmem [shape: f32[32,512], index: 4, kind: output, shape index: {}]  }
   0x1   :  { %v1766_v0 = vld [vmem:[%s3725_s1 + $0xe0] sm:$0xf]  ;;  %v2332_v1 = vld [vmem:[%s3725_s1 + $0xec] sm:$0xf0] }
   0x2   :  { %v1894_v2 = vld [vmem:[%s3725_s1 + $0x1e0] sm:$0xf]  ;;  %v1767_v3 = vor.u32 %v2332_v1, %v1766_v0  ;;  %v2364_v4 = vld [vmem:[%s3725_s1 + $0x1ec] sm:$0xf0] }
   0x3   :  { %v2022_v5 = vld [vmem:[%s3725_s1 + $0x2e0] sm:$0xf]  ;;  %v2396_v6 = vld [vmem:[%s3725_s1 + $0x2ec] sm:$0xf0]  ;;  %v1895_v7 = vor.u32 %v2364_v4, %v1894_v2 }
   0x4   :  { %v2023_v8 = vor.u32 %v2396_v6, %v2022_v5  ;;  %v2150_v9 = vld [vmem:[%s3725_s1 + $0x3e0] sm:$0xf]  ;;  %v2428_v10 = vld [vmem:[%s3725_s1 + $0x3ec] sm:$0xf0]  ;;  %1041 = vmatpush.bf16.msra.mxu0 %v1767_v3 }
   0x5   :  { %v1750_v11 = vld [vmem:[%s3725_s1 + $0xc0] sm:$0xf]  ;;  %v2151_v12 = vor.u32 %v2428_v10, %v2150_v9  ;;  %v2328_v13 = vld [vmem:[%s3725_s1 + $0xcc] sm:$0xf0]  ;;  %1060 = vmatpush.bf16.msra.mxu1 %v1895_v7 }
   0x6   :  { %v1878_v14 = vld [vmem:[%s3725_s1 + $0x1c0] sm:$0xf]  ;;  %v2360_v15 = vld [vmem:[%s3725_s1 + $0x1cc] sm:$0xf0]  ;;  %1079 = vmatpush.bf16.msra.mxu2 %v2023_v8  ;;  %v1751_v16 = vor.u32 %v2328_v13, %v1750_v11 }
   0x7   :  { %v1879_v17 = vor.u32 %v2360_v15, %v1878_v14  ;;  %v2006_v18 = vld [vmem:[%s3725_s1 + $0x2c0] sm:$0xf]  ;;  %v2392_v19 = vld [vmem:[%s3725_s1 + $0x2cc] sm:$0xf0]  ;;  %1098 = vmatpush.bf16.msra.mxu3 %v2151_v12 }
   0x8   :  { %v2134_v20 = vld [vmem:[%s3725_s1 + $0x3c0] sm:$0xf]  ;;  %v2007_v21 = vor.u32 %v2392_v19, %v2006_v18  ;;  %v2424_v22 = vld [vmem:[%s3725_s1 + $0x3cc] sm:$0xf0]  ;;  %1042 = vmatpush.bf16.msra.mxu0 %v1751_v16 }
   0x9   :  { %v1734_v23 = vld [vmem:[%s3725_s1 + $0xa0] sm:$0xf]  ;;  %v2324_v24 = vld [vmem:[%s3725_s1 + $0xac] sm:$0xf0]  ;;  %v2135_v25 = vor.u32 %v2424_v22, %v2134_v20  ;;  %1061 = vmatpush.bf16.msra.mxu1 %v1879_v17 }
   0xa   :  { %v1862_v26 = vld [vmem:[%s3725_s1 + $0x1a0] sm:$0xf]  ;;  %v2356_v27 = vld [vmem:[%s3725_s1 + $0x1ac] sm:$0xf0]  ;;  %v1735_v29 = vor.u32 %v2324_v24, %v1734_v23  ;;  %1080 = vmatpush.bf16.msra.mxu2 %v2007_v21 }
   0xb   :  { %v1990_v28 = vld [vmem:[%s3725_s1 + $0x2a0] sm:$0xf]  ;;  %v2388_v30 = vld [vmem:[%s3725_s1 + $0x2ac] sm:$0xf0]  ;;  %v1863_v33 = vor.u32 %v2356_v27, %v1862_v26  ;;  %1099 = vmatpush.bf16.msra.mxu3 %v2135_v25 }
   0xc   :  { %v2118_v31 = vld [vmem:[%s3725_s1 + $0x3a0] sm:$0xf]  ;;  %v2420_v32 = vld [vmem:[%s3725_s1 + $0x3ac] sm:$0xf0]  ;;  %v1991_v34 = vor.u32 %v2388_v30, %v1990_v28  ;;  %1043 = vmatpush.bf16.msra.mxu0 %v1735_v29  ;;  %v2294_v29 = vld [vmem:[%s3726_s0 + $0x10] sm:$0xf0] }
   0xd   :  { %v1718_v35 = vld [vmem:[%s3725_s1 + $0x80] sm:$0xf]  ;;  %v2320_v36 = vld [vmem:[%s3725_s1 + $0x8c] sm:$0xf0]  ;;  %v2119_v38 = vor.u32 %v2420_v32, %v2118_v31  ;;  %1062 = vmatpush.bf16.msra.mxu1 %v1863_v33  ;;  %v2292_v30 = vld [vmem:[%s3726_s0 + $0x4] sm:$0xf] }
   0xe   :  { %v1846_v37 = vld [vmem:[%s3725_s1 + $0x180] sm:$0xf]  ;;  %v2352_v39 = vld [vmem:[%s3725_s1 + $0x18c] sm:$0xf0]  ;;  %v1719_v44 = vor.u32 %v2320_v36, %v1718_v35  ;;  %1081 = vmatpush.bf16.msra.mxu2 %v1991_v34  ;;  %v1616_v31 = vld [vmem:[%s3726_s0 + $0x14] sm:$0xf0] }
   0xf   :  { %v1974_v40 = vld [vmem:[%s3725_s1 + $0x280] sm:$0xf]  ;;  %v2384_v41 = vld [vmem:[%s3725_s1 + $0x28c] sm:$0xf0]  ;;  %v1847_v45 = vor.u32 %v2352_v39, %v1846_v37  ;;  %1100 = vmatpush.bf16.msra.mxu3 %v2119_v38  ;;  %v2362_v32 = vld [vmem:[%s3725_s1 + $0x1e4] sm:$0xf] }
  0x10   :  { %v2102_v42 = vld [vmem:[%s3725_s1 + $0x380] sm:$0xf]  ;;  %v2416_v43 = vld [vmem:[%s3725_s1 + $0x38c] sm:$0xf0]  ;;  %v1975_v46 = vor.u32 %v2384_v41, %v1974_v40  ;;  %1044 = vmatpush.bf16.msra.mxu0 %v1719_v44  ;;  %v1896_v33 = vld [vmem:[%s3725_s1 + $0x1f0] sm:$0xf0] }
  0x11   :  { %v1702_v47 = vld [vmem:[%s3725_s1 + $0x60] sm:$0xf]  ;;  %v2316_v48 = vld [vmem:[%s3725_s1 + $0x6c] sm:$0xf0]  ;;  %v2103_v50 = vor.u32 %v2416_v43, %v2102_v42  ;;  %1063 = vmatpush.bf16.msra.mxu1 %v1847_v45  ;;  %v1622_v35 = vld [vmem:[%s3726_s0 + $0x8] sm:$0xf]  ;;  %v1899_v44 = vor.u32 %v2362_v32, %v1896_v33 }
  0x12   :  { %v1830_v49 = vld [vmem:[%s3725_s1 + $0x160] sm:$0xf]  ;;  %v2348_v51 = vld [vmem:[%s3725_s1 + $0x16c] sm:$0xf0]  ;;  %v1703_v56 = vor.u32 %v2316_v48, %v1702_v47  ;;  %1082 = vmatpush.bf16.msra.mxu2 %v1975_v46  ;;  %v2330_v36 = vld [vmem:[%s3725_s1 + $0xe4] sm:$0xf] }
  0x13   :  { %v1958_v52 = vld [vmem:[%s3725_s1 + $0x260] sm:$0xf]  ;;  %v2380_v53 = vld [vmem:[%s3725_s1 + $0x26c] sm:$0xf0]  ;;  %v1831_v57 = vor.u32 %v2348_v51, %v1830_v49  ;;  %1101 = vmatpush.bf16.msra.mxu3 %v2103_v50  ;;  %v1768_v37 = vld [vmem:[%s3725_s1 + $0xf0] sm:$0xf0] }
  0x14   :  { %v2086_v54 = vld [vmem:[%s3725_s1 + $0x360] sm:$0xf]  ;;  %v2412_v55 = vld [vmem:[%s3725_s1 + $0x36c] sm:$0xf0]  ;;  %v1959_v58 = vor.u32 %v2380_v53, %v1958_v52  ;;  %1045 = vmatpush.bf16.msra.mxu0 %v1703_v56  ;;  %v2295_v40 = vld [vmem:[%s3726_s0 + $0x18] sm:$0xf0]  ;;  %v1771_v49 = vor.u32 %v2330_v36, %v1768_v37  ;;  %v2737_v53 = vor.u32 %v2292_v30, %v1616_v31 }
  0x15   :  { %v1686_v59 = vld [vmem:[%s3725_s1 + $0x40] sm:$0xf]  ;;  %v2312_v60 = vld [vmem:[%s3725_s1 + $0x4c] sm:$0xf0]  ;;  %v2087_v62 = vor.u32 %v2412_v55, %v2086_v54  ;;  %1064 = vmatpush.bf16.msra.mxu1 %v1831_v57  ;;  %v2293_v41 = vld [vmem:[%s3726_s0 + $0xc] sm:$0xf]  ;;  %v2739_v54 = vor.u32 %v2295_v40, %v1622_v35 }
  0x16   :  { %v1814_v61 = vld [vmem:[%s3725_s1 + $0x140] sm:$0xf]  ;;  %v2344_v63 = vld [vmem:[%s3725_s1 + $0x14c] sm:$0xf0]  ;;  %v1687_v4 = vor.u32 %v2312_v60, %v1686_v59  ;;  %1083 = vmatpush.bf16.msra.mxu2 %v1959_v58  ;;  %v2394_v47 = vld [vmem:[%s3725_s1 + $0x2e4] sm:$0xf] }
  0x17   :  { %v1942_v0 = vld [vmem:[%s3725_s1 + $0x240] sm:$0xf]  ;;  %v2376_v1 = vld [vmem:[%s3725_s1 + $0x24c] sm:$0xf0]  ;;  %v1815_v5 = vor.u32 %v2344_v63, %v1814_v61  ;;  %1102 = vmatpush.bf16.msra.mxu3 %v2087_v62  ;;  %v2024_v50 = vld [vmem:[%s3725_s1 + $0x2f0] sm:$0xf0] }
  0x18   :  { %v2070_v2 = vld [vmem:[%s3725_s1 + $0x340] sm:$0xf]  ;;  %v2408_v3 = vld [vmem:[%s3725_s1 + $0x34c] sm:$0xf0]  ;;  %v1943_v6 = vor.u32 %v2376_v1, %v1942_v0  ;;  %1046 = vmatpush.bf16.msra.mxu0 %v1687_v4  ;;  %v2358_v51 = vld [vmem:[%s3725_s1 + $0x1c4] sm:$0xf]  ;;  %v2027_v59 = vor.u32 %v2394_v47, %v2024_v50 }
  0x19   :  { %v1670_v7 = vld [vmem:[%s3725_s1 + $0x20] sm:$0xf]  ;;  %v2308_v8 = vld [vmem:[%s3725_s1 + $0x2c] sm:$0xf0]  ;;  %v2071_v10 = vor.u32 %v2408_v3, %v2070_v2  ;;  %1065 = vmatpush.bf16.msra.mxu1 %v1815_v5  ;;  %v1880_v52 = vld [vmem:[%s3725_s1 + $0x1d0] sm:$0xf0] }
  0x1a   :  { %v1798_v9 = vld [vmem:[%s3725_s1 + $0x120] sm:$0xf]  ;;  %v2340_v11 = vld [vmem:[%s3725_s1 + $0x12c] sm:$0xf0]  ;;  %v1671_v17 = vor.u32 %v2308_v8, %v1670_v7  ;;  %1084 = vmatpush.bf16.msra.mxu2 %v1943_v6  ;;  %v2326_v55 = vld [vmem:[%s3725_s1 + $0xc4] sm:$0xf]  ;;  %v1883_v60 = vor.u32 %v2358_v51, %v1880_v52 }
  0x1b   :  { %v1926_v12 = vld [vmem:[%s3725_s1 + $0x220] sm:$0xf]  ;;  %v2372_v13 = vld [vmem:[%s3725_s1 + $0x22c] sm:$0xf0]  ;;  %v1799_v21 = vor.u32 %v2340_v11, %v1798_v9  ;;  %1103 = vmatpush.bf16.msra.mxu3 %v2071_v10  ;;  %v1752_v56 = vld [vmem:[%s3725_s1 + $0xd0] sm:$0xf0] }
  0x1c   :  { %v2054_v14 = vld [vmem:[%s3725_s1 + $0x320] sm:$0xf]  ;;  %v2404_v15 = vld [vmem:[%s3725_s1 + $0x32c] sm:$0xf0]  ;;  %v1927_v22 = vor.u32 %v2372_v13, %v1926_v12  ;;  %1047 = vmatpush.bf16.msra.mxu0 %v1671_v17  ;;  %v2390_v63 = vld [vmem:[%s3725_s1 + $0x2c4] sm:$0xf]  ;;  %v1755_v0 = vor.u32 %v2326_v55, %v1752_v56 }
  0x1d   :  { %v1654_v16 = vld [vmem:[%s3725_s1] sm:$0xf]  ;;  %v2304_v18 = vld [vmem:[%s3725_s1 + $0xc] sm:$0xf0]  ;;  %v2055_v26 = vor.u32 %v2404_v15, %v2054_v14  ;;  %1066 = vmatpush.bf16.msra.mxu1 %v1799_v21  ;;  %v2008_v1 = vld [vmem:[%s3725_s1 + $0x2d0] sm:$0xf0] }
  0x1e   :  { %v1782_v19 = vld [vmem:[%s3725_s1 + $0x100] sm:$0xf]  ;;  %v2336_v20 = vld [vmem:[%s3725_s1 + $0x10c] sm:$0xf0]  ;;  %v1655_v34 = vor.u32 %v2304_v18, %v1654_v16  ;;  %1085 = vmatpush.bf16.msra.mxu2 %v1927_v22  ;;  %v2354_v2 = vld [vmem:[%s3725_s1 + $0x1a4] sm:$0xf]  ;;  %v2011_v7 = vor.u32 %v2390_v63, %v2008_v1 }
  0x1f   :  { %v1910_v23 = vld [vmem:[%s3725_s1 + $0x200] sm:$0xf]  ;;  %v2368_v24 = vld [vmem:[%s3725_s1 + $0x20c] sm:$0xf0]  ;;  %v1783_v38 = vor.u32 %v2336_v20, %v1782_v19  ;;  %1104 = vmatpush.bf16.msra.mxu3 %v2055_v26  ;;  %v1864_v3 = vld [vmem:[%s3725_s1 + $0x1b0] sm:$0xf0] }
  0x20   :  { %v2038_v25 = vld [vmem:[%s3725_s1 + $0x300] sm:$0xf]  ;;  %v2400_v27 = vld [vmem:[%s3725_s1 + $0x30c] sm:$0xf0]  ;;  %v1911_v39 = vor.u32 %v2368_v24, %v1910_v23  ;;  %1048 = vmatpush.bf16.msra.mxu0 %v1655_v34  ;;  %v2322_v4 = vld [vmem:[%s3725_s1 + $0xa4] sm:$0xf]  ;;  %v1867_v8 = vor.u32 %v2354_v2, %v1864_v3 }
  0x21   :  { %v1614_v28 = vld [vmem:[%s3726_s0] sm:$0xf]  ;;  %v2039_v43 = vor.u32 %v2400_v27, %v2038_v25  ;;  %v2460_v46 = vld [vmem:[%s3725_s1 + $0x4ec] sm:$0xf0]  ;;  %1067 = vmatpush.bf16.msra.mxu1 %v1783_v38  ;;  %v1736_v5 = vld [vmem:[%s3725_s1 + $0xb0] sm:$0xf0] }
  0x22   :  { %v1624_v42 = vld [vmem:[%s3726_s0 + $0x1c] sm:$0xf0]  ;;  %v2726_v48 = vor.u32 %v2294_v29, %v1614_v28  ;;  %1086 = vmatpush.bf16.msra.mxu2 %v1911_v39  ;;  %v2456_v62 = vld [vmem:[%s3725_s1 + $0x4cc] sm:$0xf0]  ;;  %v2386_v11 = vld [vmem:[%s3725_s1 + $0x2a4] sm:$0xf]  ;;  %v1739_v12 = vor.u32 %v2322_v4, %v1736_v5 }
  0x23   :  { %v2278_v45 = vld [vmem:[%s3725_s1 + $0x4e0] sm:$0xf]  ;;  %v2747_v57 = vor.u32 %v2293_v41, %v1624_v42  ;;  %1105 = vmatpush.bf16.msra.mxu3 %v2039_v43  ;;  %v2452_v10 = vld [vmem:[%s3725_s1 + $0x4ac] sm:$0xf0]  ;;  %v1992_v13 = vld [vmem:[%s3725_s1 + $0x2b0] sm:$0xf0] }
  0x24   :  { %v2279_v58 = vor.u32 %v2460_v46, %v2278_v45  ;;  %v2262_v61 = vld [vmem:[%s3725_s1 + $0x4c0] sm:$0xf]  ;;  %1049 = vmatmul.bf16.vlgmr.msra.gmra.mxu0 %v2726_v48  ;;  %1068 = vmatmul.bf16.vlgmr.msra.gmra.mxu1 %v2737_v53  ;;  %v2350_v14 = vld [vmem:[%s3725_s1 + $0x184] sm:$0xf]  ;;  %v1848_v15 = vld [vmem:[%s3725_s1 + $0x190] sm:$0xf0]  ;;  %v1995_v22 = vor.u32 %v2386_v11, %v1992_v13 }
  0x25   :  { %1136 = vmatpush.bf16.msrb.mxu1 %v1771_v49  ;;  %1087 = vmatmul.bf16.vlgmr.msra.gmra.mxu2 %v2739_v54  ;;  %v2263_v6 = vor.u32 %v2456_v62, %v2262_v61  ;;  %v2246_v9 = vld [vmem:[%s3725_s1 + $0x4a0] sm:$0xf]  ;;  %v2318_v16 = vld [vmem:[%s3725_s1 + $0x84] sm:$0xf]  ;;  %v1720_v17 = vld [vmem:[%s3725_s1 + $0x90] sm:$0xf0]  ;;  %v1851_v23 = vor.u32 %v2350_v14, %v1848_v15 }
  0x26   :  { %1155 = vmatpush.bf16.msrb.mxu2 %v1899_v44  ;;  %1106 = vmatmul.bf16.vlgmr.msra.gmra.mxu3 %v2747_v57  ;;  %v2247_v18 = vor.u32 %v2452_v10, %v2246_v9  ;;  %v2230_v19 = vld [vmem:[%s3725_s1 + $0x480] sm:$0xf]  ;;  %v2448_v20 = vld [vmem:[%s3725_s1 + $0x48c] sm:$0xf0]  ;;  %v2382_v21 = vld [vmem:[%s3725_s1 + $0x284] sm:$0xf]  ;;  %v1723_v27 = vor.u32 %v2318_v16, %v1720_v17 }
  0x27   :  { %1117 = vmatpush.bf16.msrb.mxu0 %v2279_v58  ;;  %1174 = vmatpush.bf16.msrb.mxu3 %v2027_v59  ;;  %v1976_v24 = vld [vmem:[%s3725_s1 + $0x290] sm:$0xf0]  ;;  %v1634_v25 = vld [vmem:[%s3726_s0 + $0x28] sm:$0xf]  ;;  %v2299_v26 = vld [vmem:[%s3726_s0 + $0x38] sm:$0xf0]  ;;  %v2231_v35 = vor.u32 %v2448_v20, %v2230_v19 }
  0x28   :  { %v2297_v28 = vld [vmem:[%s3726_s0 + $0x2c] sm:$0xf]  ;;  %v1636_v29 = vld [vmem:[%s3726_s0 + $0x3c] sm:$0xf0]  ;;  %v2346_v30 = vld [vmem:[%s3725_s1 + $0x164] sm:$0xf]  ;;  %v1979_v39 = vor.u32 %v2382_v21, %v1976_v24  ;;  %v2858_v44 = vor.u32 %v2299_v26, %v1634_v25 }
  0x29   :  { %1137 = vmatpush.bf16.msrb.mxu1 %v1755_v0  ;;  %v1832_v31 = vld [vmem:[%s3725_s1 + $0x170] sm:$0xf0]  ;;  %v1642_v32 = vld [vmem:[%s3726_s0 + $0x30] sm:$0xf]  ;;  %v2314_v33 = vld [vmem:[%s3725_s1 + $0x64] sm:$0xf]  ;;  %v2869_v50 = vor.u32 %v2297_v28, %v1636_v29 }
  0x2a   :  { %1156 = vmatpush.bf16.msrb.mxu2 %v1883_v60  ;;  %v1704_v34 = vld [vmem:[%s3725_s1 + $0x70] sm:$0xf0]  ;;  %v2300_v36 = vld [vmem:[%s3726_s0 + $0x40] sm:$0xf0]  ;;  %v1644_v38 = vld [vmem:[%s3726_s0 + $0x44] sm:$0xf0]  ;;  %v1835_v40 = vor.u32 %v2346_v30, %v1832_v31 }
  0x2b   :  { %1118 = vmatpush.bf16.msrb.mxu0 %v2263_v6  ;;  %1175 = vmatpush.bf16.msrb.mxu3 %v2011_v7  ;;  %v2298_v37 = vld [vmem:[%s3726_s0 + $0x34] sm:$0xf]  ;;  %v2214_v41 = vld [vmem:[%s3725_s1 + $0x460] sm:$0xf]  ;;  %v2444_v42 = vld [vmem:[%s3725_s1 + $0x46c] sm:$0xf0]  ;;  %v1707_v45 = vor.u32 %v2314_v33, %v1704_v34  ;;  %v2871_v51 = vor.u32 %v2300_v36, %v1642_v32 }
  0x2c   :  { %v2378_v43 = vld [vmem:[%s3725_s1 + $0x264] sm:$0xf]  ;;  %v1960_v46 = vld [vmem:[%s3725_s1 + $0x270] sm:$0xf0]  ;;  %v2879_v56 = vor.u32 %v2298_v37, %v1644_v38  ;;  %v2215_v58 = vor.u32 %v2444_v42, %v2214_v41  ;;  %v2198_v61 = vld [vmem:[%s3725_s1 + $0x440] sm:$0xf] }
  0x2d   :  { %1138 = vmatpush.bf16.msrb.mxu1 %v1739_v12  ;;  %v2342_v47 = vld [vmem:[%s3725_s1 + $0x144] sm:$0xf]  ;;  %v1816_v49 = vld [vmem:[%s3725_s1 + $0x150] sm:$0xf0]  ;;  %v1963_v59 = vor.u32 %v2378_v43, %v1960_v46  ;;  %v2440_v62 = vld [vmem:[%s3725_s1 + $0x44c] sm:$0xf0] }
  0x2e   :  { %1157 = vmatpush.bf16.msrb.mxu2 %v1867_v8  ;;  %v2310_v52 = vld [vmem:[%s3725_s1 + $0x44] sm:$0xf]  ;;  %v1688_v55 = vld [vmem:[%s3725_s1 + $0x50] sm:$0xf0]  ;;  %v1819_v60 = vor.u32 %v2342_v47, %v1816_v49  ;;  %v2199_v6 = vor.u32 %v2440_v62, %v2198_v61  ;;  %v2182_v7 = vld [vmem:[%s3725_s1 + $0x420] sm:$0xf] }
  0x2f   :  { %1119 = vmatpush.bf16.msrb.mxu0 %v2247_v18  ;;  %1176 = vmatpush.bf16.msrb.mxu3 %v1995_v22  ;;  %v2374_v63 = vld [vmem:[%s3725_s1 + $0x244] sm:$0xf]  ;;  %v1691_v0 = vor.u32 %v2310_v52, %v1688_v55  ;;  %v1944_v1 = vld [vmem:[%s3725_s1 + $0x250] sm:$0xf0]  ;;  %v2436_v10 = vld [vmem:[%s3725_s1 + $0x42c] sm:$0xf0] }
  0x30   :  { %v2338_v2 = vld [vmem:[%s3725_s1 + $0x124] sm:$0xf]  ;;  %v1800_v3 = vld [vmem:[%s3725_s1 + $0x130] sm:$0xf0]  ;;  %v1947_v8 = vor.u32 %v2374_v63, %v1944_v1  ;;  %v1774_v18 = vld [vmem:[%s3725_s1 + $0xe8] sm:$0xf]  ;;  %v2183_v20 = vor.u32 %v2436_v10, %v2182_v7 }
  0x31   :  { %1139 = vmatpush.bf16.msrb.mxu1 %v1723_v27  ;;  %v2306_v4 = vld [vmem:[%s3725_s1 + $0x24] sm:$0xf]  ;;  %v1672_v5 = vld [vmem:[%s3725_s1 + $0x30] sm:$0xf0]  ;;  %v1803_v9 = vor.u32 %v2338_v2, %v1800_v3  ;;  %v2333_v19 = vld [vmem:[%s3725_s1 + $0xf4] sm:$0xf0] }
  0x32   :  { %1158 = vmatpush.bf16.msrb.mxu2 %v1851_v23  ;;  %v2370_v11 = vld [vmem:[%s3725_s1 + $0x224] sm:$0xf]  ;;  %v1928_v12 = vld [vmem:[%s3725_s1 + $0x230] sm:$0xf0]  ;;  %v1675_v13 = vor.u32 %v2306_v4, %v1672_v5  ;;  %v2166_v21 = vld [vmem:[%s3725_s1 + $0x400] sm:$0xf]  ;;  %v1775_v30 = vor.u32 %v2333_v19, %v1774_v18 }
  0x33   :  { %1120 = vmatpush.bf16.msrb.mxu0 %v2231_v35  ;;  %1177 = vmatpush.bf16.msrb.mxu3 %v1979_v39  ;;  %v2334_v14 = vld [vmem:[%s3725_s1 + $0x104] sm:$0xf]  ;;  %v1784_v15 = vld [vmem:[%s3725_s1 + $0x110] sm:$0xf0]  ;;  %v1931_v24 = vor.u32 %v2370_v11, %v1928_v12  ;;  %v2432_v26 = vld [vmem:[%s3725_s1 + $0x40c] sm:$0xf0] }
  0x34   :  { %1054 = vmatmul.bf16.gmra.mxu0 %v2858_v44  ;;  %1073 = vmatmul.bf16.gmra.mxu1 %v2869_v50  ;;  %v2302_v16 = vld [vmem:[%s3725_s1 + $0x4] sm:$0xf]  ;;  %v1656_v17 = vld [vmem:[%s3725_s1 + $0x10] sm:$0xf0]  ;;  %v1787_v25 = vor.u32 %v2334_v14, %v1784_v15  ;;  %v1902_v33 = vld [vmem:[%s3725_s1 + $0x1e8] sm:$0xf]  ;;  %v2167_v38 = vor.u32 %v2432_v26, %v2166_v21 }
  0x35   :  { %1140 = vmatpush.bf16.msrb.mxu1 %v1707_v45  ;;  %1092 = vmatmul.bf16.gmra.mxu2 %v2871_v51  ;;  %v2458_v22 = vld [vmem:[%s3725_s1 + $0x4e4] sm:$0xf]  ;;  %v2280_v23 = vld [vmem:[%s3725_s1 + $0x4f0] sm:$0xf0]  ;;  %v1659_v29 = vor.u32 %v2302_v16, %v1656_v17  ;;  %v2365_v35 = vld [vmem:[%s3725_s1 + $0x1f4] sm:$0xf0] }
  0x36   :  { %1159 = vmatpush.bf16.msrb.mxu2 %v1835_v40  ;;  %1111 = vmatmul.bf16.gmra.mxu3 %v2879_v56  ;;  %v2366_v27 = vld [vmem:[%s3725_s1 + $0x204] sm:$0xf]  ;;  %v1912_v28 = vld [vmem:[%s3725_s1 + $0x210] sm:$0xf0]  ;;  %v2283_v34 = vor.u32 %v2458_v22, %v2280_v23  ;;  %v1758_v36 = vld [vmem:[%s3725_s1 + $0xc8] sm:$0xf]  ;;  %v1903_v46 = vor.u32 %v2365_v35, %v1902_v33 }
  0x37   :  { %1121 = vmatpush.bf16.msrb.mxu0 %v2215_v58  ;;  %1178 = vmatpush.bf16.msrb.mxu3 %v1963_v59  ;;  %v2426_v31 = vld [vmem:[%s3725_s1 + $0x3e4] sm:$0xf]  ;;  %v2152_v32 = vld [vmem:[%s3725_s1 + $0x3f0] sm:$0xf0]  ;;  %v2329_v37 = vld [vmem:[%s3725_s1 + $0xd4] sm:$0xf0]  ;;  %v1915_v41 = vor.u32 %v2366_v27, %v1912_v28 }
  0x38   :  { %v1630_v39 = vld [vmem:[%s3726_s0 + $0x10] sm:$0xf]  ;;  %v2296_v40 = vld [vmem:[%s3726_s0 + $0x20] sm:$0xf0]  ;;  %v2155_v42 = vor.u32 %v2426_v31, %v2152_v32  ;;  %v2136_v45 = vld [vmem:[%s3725_s1 + $0x3d0] sm:$0xf0]  ;;  %v1759_v47 = vor.u32 %v2329_v37, %v1758_v36 }
  0x39   :  { %1141 = vmatpush.bf16.msrb.mxu1 %v1691_v0  ;;  %v2422_v43 = vld [vmem:[%s3725_s1 + $0x3c4] sm:$0xf]  ;;  %v2264_v52 = vld [vmem:[%s3725_s1 + $0x4d0] sm:$0xf0]  ;;  %v1886_v55 = vld [vmem:[%s3725_s1 + $0x1c8] sm:$0xf]  ;;  %v2996_v58 = vor.u32 %v2296_v40, %v1630_v39 }
  0x3a   :  { %1160 = vmatpush.bf16.msrb.mxu2 %v1819_v60  ;;  %v2454_v49 = vld [vmem:[%s3725_s1 + $0x4c4] sm:$0xf]  ;;  %v2361_v59 = vld [vmem:[%s3725_s1 + $0x1d4] sm:$0xf0]  ;;  %v1742_v60 = vld [vmem:[%s3725_s1 + $0xa8] sm:$0xf]  ;;  %v2139_v62 = vor.u32 %v2422_v43, %v2136_v45 }
  0x3b   :  { %1122 = vmatpush.bf16.msrb.mxu0 %v2199_v6  ;;  %1179 = vmatpush.bf16.msrb.mxu3 %v1947_v8  ;;  %v2325_v61 = vld [vmem:[%s3725_s1 + $0xb4] sm:$0xf0]  ;;  %v2267_v63 = vor.u32 %v2454_v49, %v2264_v52  ;;  %v2418_v0 = vld [vmem:[%s3725_s1 + $0x3a4] sm:$0xf]  ;;  %v2120_v1 = vld [vmem:[%s3725_s1 + $0x3b0] sm:$0xf0]  ;;  %v1887_v2 = vor.u32 %v2361_v59, %v1886_v55 }
  0x3c   :  { %v1743_v3 = vor.u32 %v2325_v61, %v1742_v60  ;;  %v2450_v4 = vld [vmem:[%s3725_s1 + $0x4a4] sm:$0xf]  ;;  %v2248_v5 = vld [vmem:[%s3725_s1 + $0x4b0] sm:$0xf0]  ;;  %v1870_v6 = vld [vmem:[%s3725_s1 + $0x1a8] sm:$0xf]  ;;  %v2123_v10 = vor.u32 %v2418_v0, %v2120_v1 }
  0x3d   :  { %1142 = vmatpush.bf16.msrb.mxu1 %v1675_v13  ;;  %v2357_v7 = vld [vmem:[%s3725_s1 + $0x1b4] sm:$0xf0]  ;;  %v1726_v8 = vld [vmem:[%s3725_s1 + $0x88] sm:$0xf]  ;;  %v2251_v11 = vor.u32 %v2450_v4, %v2248_v5  ;;  %v2414_v12 = vld [vmem:[%s3725_s1 + $0x384] sm:$0xf] }
  0x3e   :  { %1161 = vmatpush.bf16.msrb.mxu2 %v1803_v9  ;;  %v2321_v9 = vld [vmem:[%s3725_s1 + $0x94] sm:$0xf0]  ;;  %v2104_v13 = vld [vmem:[%s3725_s1 + $0x390] sm:$0xf0]  ;;  %v1871_v14 = vor.u32 %v2357_v7, %v1870_v6  ;;  %v2446_v16 = vld [vmem:[%s3725_s1 + $0x484] sm:$0xf] }
  0x3f   :  { %1123 = vmatpush.bf16.msrb.mxu0 %v2183_v20  ;;  %1180 = vmatpush.bf16.msrb.mxu3 %v1931_v24  ;;  %v1727_v15 = vor.u32 %v2321_v9, %v1726_v8  ;;  %v2232_v17 = vld [vmem:[%s3725_s1 + $0x490] sm:$0xf0]  ;;  %v1854_v18 = vld [vmem:[%s3725_s1 + $0x188] sm:$0xf]  ;;  %v2353_v19 = vld [vmem:[%s3725_s1 + $0x194] sm:$0xf0]  ;;  %v2107_v22 = vor.u32 %v2414_v12, %v2104_v13 }
  0x40   :  { %v1710_v20 = vld [vmem:[%s3725_s1 + $0x68] sm:$0xf]  ;;  %v2317_v21 = vld [vmem:[%s3725_s1 + $0x74] sm:$0xf0]  ;;  %v2235_v23 = vor.u32 %v2446_v16, %v2232_v17  ;;  %v2410_v24 = vld [vmem:[%s3725_s1 + $0x364] sm:$0xf]  ;;  %v1855_v26 = vor.u32 %v2353_v19, %v1854_v18 }
  0x41   :  { %1143 = vmatpush.bf16.msrb.mxu1 %v1659_v29  ;;  %v1711_v27 = vor.u32 %v2317_v21, %v1710_v20  ;;  %v2442_v28 = vld [vmem:[%s3725_s1 + $0x464] sm:$0xf]  ;;  %v2216_v29 = vld [vmem:[%s3725_s1 + $0x470] sm:$0xf0]  ;;  %v2349_v31 = vld [vmem:[%s3725_s1 + $0x174] sm:$0xf0] }
  0x42   :  { %1162 = vmatpush.bf16.msrb.mxu2 %v1787_v25  ;;  %v2088_v25 = vld [vmem:[%s3725_s1 + $0x370] sm:$0xf0]  ;;  %v1694_v32 = vld [vmem:[%s3725_s1 + $0x48] sm:$0xf]  ;;  %v2313_v33 = vld [vmem:[%s3725_s1 + $0x54] sm:$0xf0]  ;;  %v2219_v37 = vor.u32 %v2442_v28, %v2216_v29 }
  0x43   :  { %1124 = vmatpush.bf16.msrb.mxu0 %v2167_v38  ;;  %1181 = vmatpush.bf16.msrb.mxu3 %v1915_v41  ;;  %v2301_v35 = vld [vmem:[%s3726_s0 + $0x48] sm:$0xf0]  ;;  %v2091_v36 = vor.u32 %v2410_v24, %v2088_v25  ;;  %v2406_v38 = vld [vmem:[%s3725_s1 + $0x344] sm:$0xf]  ;;  %v2072_v39 = vld [vmem:[%s3725_s1 + $0x350] sm:$0xf0]  ;;  %v1695_v41 = vor.u32 %v2313_v33, %v1694_v32 }
  0x44   :  { %1144 = vmatmul.bf16.vlgmr.msrb.gmra.mxu1 %v2726_v48  ;;  %v2200_v43 = vld [vmem:[%s3725_s1 + $0x450] sm:$0xf0]  ;;  %v1822_v45 = vld [vmem:[%s3725_s1 + $0x148] sm:$0xf]  ;;  %v2309_v52 = vld [vmem:[%s3725_s1 + $0x34] sm:$0xf0]  ;;  %v2075_v55 = vor.u32 %v2406_v38, %v2072_v39 }
  0x45   :  { %1212 = vmatpush.bf16.msra.mxu1 %v2283_v34  ;;  %1163 = vmatmul.bf16.vlgmr.msrb.gmra.mxu2 %v2737_v53  ;;  %v1650_v34 = vld [vmem:[%s3726_s0 + $0x38] sm:$0xf]  ;;  %v1678_v49 = vld [vmem:[%s3725_s1 + $0x28] sm:$0xf]  ;;  %v2402_v60 = vld [vmem:[%s3725_s1 + $0x324] sm:$0xf] }
  0x46   :  { %1231 = vmatpush.bf16.msra.mxu2 %v1775_v30  ;;  %1125 = vmatmul.bf16.vlgmr.msrb.gmra.mxu0 %v2996_v58  ;;  %v1838_v30 = vld [vmem:[%s3725_s1 + $0x168] sm:$0xf]  ;;  %v2056_v61 = vld [vmem:[%s3725_s1 + $0x330] sm:$0xf0]  ;;  %v2434_v0 = vld [vmem:[%s3725_s1 + $0x424] sm:$0xf] }
  0x47   :  { %1193 = vmatpush.bf16.msra.mxu0 %v2155_v42  ;;  %1250 = vmatpush.bf16.msra.mxu3 %v1903_v46  ;;  %v1839_v40 = vor.u32 %v2349_v31, %v1838_v30  ;;  %v2438_v42 = vld [vmem:[%s3725_s1 + $0x444] sm:$0xf]  ;;  %v3104_v46 = vor.u32 %v2301_v35, %v1650_v34  ;;  %v2184_v1 = vld [vmem:[%s3725_s1 + $0x430] sm:$0xf0]  ;;  %v1662_v4 = vld [vmem:[%s3725_s1 + $0x8] sm:$0xf]  ;;  %v2059_v8 = vor.u32 %v2402_v60, %v2056_v61 }
  0x48   :  { %1182 = vmatmul.bf16.vlgmr.msrb.gmra.mxu3 %v2739_v54  ;;  %v2203_v59 = vor.u32 %v2438_v42, %v2200_v43  ;;  %v2305_v5 = vld [vmem:[%s3725_s1 + $0x14] sm:$0xf0]  ;;  %v2286_v6 = vld [vmem:[%s3725_s1 + $0x4e8] sm:$0xf]  ;;  %v2187_v9 = vor.u32 %v2434_v0, %v2184_v1  ;;  %v2430_v12 = vld [vmem:[%s3725_s1 + $0x404] sm:$0xf] }
  0x49   :  { %1213 = vmatpush.bf16.msra.mxu1 %v2267_v63  ;;  %v1679_v63 = vor.u32 %v2309_v52, %v1678_v49  ;;  %v2461_v7 = vld [vmem:[%s3725_s1 + $0x4f4] sm:$0xf0]  ;;  %v1790_v16 = vld [vmem:[%s3725_s1 + $0x108] sm:$0xf]  ;;  %v1776_v24 = vld [vmem:[%s3725_s1 + $0xf8] sm:$0xf0] }
  0x4a   :  { %1232 = vmatpush.bf16.msra.mxu2 %v1759_v47  ;;  %v2345_v47 = vld [vmem:[%s3725_s1 + $0x154] sm:$0xf0]  ;;  %v2287_v18 = vor.u32 %v2461_v7, %v2286_v6  ;;  %v2030_v19 = vld [vmem:[%s3725_s1 + $0x2e8] sm:$0xf]  ;;  %v2327_v39 = vld [vmem:[%s3725_s1 + $0xcc] sm:$0xf] }
  0x4b   :  { %1194 = vmatpush.bf16.msra.mxu0 %v2139_v62  ;;  %1251 = vmatpush.bf16.msra.mxu3 %v1887_v2  ;;  %v1823_v62 = vor.u32 %v2345_v47, %v1822_v45  ;;  %v1806_v2 = vld [vmem:[%s3725_s1 + $0x128] sm:$0xf]  ;;  %v2337_v17 = vld [vmem:[%s3725_s1 + $0x114] sm:$0xf0]  ;;  %v2323_v61 = vld [vmem:[%s3725_s1 + $0xac] sm:$0xf] }
  0x4c   :  { %v2397_v20 = vld [vmem:[%s3725_s1 + $0x2f4] sm:$0xf0]  ;;  %v2158_v21 = vld [vmem:[%s3725_s1 + $0x3e8] sm:$0xf]  ;;  %v1791_v29 = vor.u32 %v2337_v17, %v1790_v16 }
  0x4d   :  { %1214 = vmatpush.bf16.msra.mxu1 %v2251_v11  ;;  %v2040_v11 = vld [vmem:[%s3725_s1 + $0x310] sm:$0xf0]  ;;  %v2457_v28 = vld [vmem:[%s3725_s1 + $0x4d4] sm:$0xf0]  ;;  %v2031_v30 = vor.u32 %v2397_v20, %v2030_v19  ;;  %v2014_v33 = vld [vmem:[%s3725_s1 + $0x2c8] sm:$0xf] }
  0x4e   :  { %1233 = vmatpush.bf16.msra.mxu2 %v1743_v3  ;;  %v2341_v3 = vld [vmem:[%s3725_s1 + $0x134] sm:$0xf0]  ;;  %v1998_v43 = vld [vmem:[%s3725_s1 + $0x2a8] sm:$0xf] }
  0x4f   :  { %1195 = vmatpush.bf16.msra.mxu0 %v2123_v10  ;;  %1252 = vmatpush.bf16.msra.mxu3 %v1871_v14  ;;  %v2398_v10 = vld [vmem:[%s3725_s1 + $0x304] sm:$0xf]  ;;  %v1807_v13 = vor.u32 %v2341_v3, %v1806_v2  ;;  %v1663_v14 = vor.u32 %v2305_v5, %v1662_v4  ;;  %v2393_v34 = vld [vmem:[%s3725_s1 + $0x2d4] sm:$0xf0]  ;;  %v2126_v52 = vld [vmem:[%s3725_s1 + $0x3a8] sm:$0xf] }
  0x50   :  { %v2043_v25 = vor.u32 %v2398_v10, %v2040_v11  ;;  %v2015_v38 = vor.u32 %v2393_v34, %v2014_v33  ;;  %v2453_v42 = vld [vmem:[%s3725_s1 + $0x4b4] sm:$0xf0]  ;;  %v1982_v1 = vld [vmem:[%s3725_s1 + $0x288] sm:$0xf]  ;;  %v1728_v10 = vld [vmem:[%s3725_s1 + $0x98] sm:$0xf0] }
  0x51   :  { %1215 = vmatpush.bf16.msra.mxu1 %v2235_v23  ;;  %v2331_v23 = vld [vmem:[%s3725_s1 + $0xec] sm:$0xf]  ;;  %v2389_v45 = vld [vmem:[%s3725_s1 + $0x2b4] sm:$0xf0]  ;;  %v2110_v5 = vld [vmem:[%s3725_s1 + $0x388] sm:$0xf] }
  0x52   :  { %1234 = vmatpush.bf16.msra.mxu2 %v1727_v15  ;;  %v2168_v15 = vld [vmem:[%s3725_s1 + $0x410] sm:$0xf0]  ;;  %v1779_v32 = vor.u32 %v2331_v23, %v1776_v24  ;;  %v1999_v60 = vor.u32 %v2389_v45, %v1998_v43  ;;  %v2449_v0 = vld [vmem:[%s3725_s1 + $0x494] sm:$0xf0]  ;;  %v2222_v11 = vld [vmem:[%s3725_s1 + $0x468] sm:$0xf] }
  0x53   :  { %1196 = vmatpush.bf16.msra.mxu0 %v2107_v22  ;;  %1253 = vmatpush.bf16.msra.mxu3 %v1855_v26  ;;  %v2429_v22 = vld [vmem:[%s3725_s1 + $0x3f4] sm:$0xf0]  ;;  %v2171_v26 = vor.u32 %v2430_v12, %v2168_v15  ;;  %v2094_v17 = vld [vmem:[%s3725_s1 + $0x368] sm:$0xf]  ;;  %v2311_v33 = vld [vmem:[%s3725_s1 + $0x4c] sm:$0xf] }
  0x54   :  { %1149 = vmatmul.bf16.gmra.mxu1 %v2858_v44  ;;  %v2159_v31 = vor.u32 %v2429_v22, %v2158_v21  ;;  %v2385_v2 = vld [vmem:[%s3725_s1 + $0x294] sm:$0xf0]  ;;  %v2315_v21 = vld [vmem:[%s3725_s1 + $0x6c] sm:$0xf]  ;;  %v1712_v22 = vld [vmem:[%s3725_s1 + $0x78] sm:$0xf0] }
  0x55   :  { %1216 = vmatpush.bf16.msra.mxu1 %v2219_v37  ;;  %1168 = vmatmul.bf16.gmra.mxu2 %v2869_v50  ;;  %v2425_v37 = vld [vmem:[%s3725_s1 + $0x3d4] sm:$0xf0]  ;;  %v2206_v23 = vld [vmem:[%s3725_s1 + $0x448] sm:$0xf]  ;;  %v1696_v34 = vld [vmem:[%s3725_s1 + $0x58] sm:$0xf0] }
  0x56   :  { %1235 = vmatpush.bf16.msra.mxu2 %v1711_v27  ;;  %1130 = vmatmul.bf16.gmra.mxu0 %v3104_v46  ;;  %v2270_v27 = vld [vmem:[%s3725_s1 + $0x4c8] sm:$0xf]  ;;  %v2417_v6 = vld [vmem:[%s3725_s1 + $0x394] sm:$0xf0]  ;;  %v2307_v43 = vld [vmem:[%s3725_s1 + $0x2c] sm:$0xf] }
  0x57   :  { %1197 = vmatpush.bf16.msra.mxu0 %v2091_v36  ;;  %1254 = vmatpush.bf16.msra.mxu3 %v1839_v40  ;;  %v2271_v35 = vor.u32 %v2457_v28, %v2270_v27  ;;  %v2142_v36 = vld [vmem:[%s3725_s1 + $0x3c8] sm:$0xf]  ;;  %v1760_v40 = vld [vmem:[%s3725_s1 + $0xd8] sm:$0xf0]  ;;  %v2445_v12 = vld [vmem:[%s3725_s1 + $0x474] sm:$0xf0]  ;;  %v2111_v15 = vor.u32 %v2417_v6, %v2110_v5  ;;  %v1715_v28 = vor.u32 %v2315_v21, %v1712_v22 }
  0x58   :  { %1187 = vmatmul.bf16.gmra.mxu3 %v2871_v51  ;;  %v2143_v47 = vor.u32 %v2425_v37, %v2142_v36  ;;  %v1763_v49 = vor.u32 %v2327_v39, %v1760_v40  ;;  %v2223_v19 = vor.u32 %v2445_v12, %v2222_v11  ;;  %v2441_v24 = vld [vmem:[%s3725_s1 + $0x454] sm:$0xf0]  ;;  %v1934_v37 = vld [vmem:[%s3725_s1 + $0x228] sm:$0xf]  ;;  %v1699_v40 = vor.u32 %v2311_v33, %v1696_v34  ;;  %v2303_v5 = vld [vmem:[%s3725_s1 + $0xc] sm:$0xf] }
  0x59   :  { %1217 = vmatpush.bf16.msra.mxu1 %v2203_v59  ;;  %v2437_v36 = vld [vmem:[%s3725_s1 + $0x434] sm:$0xf0]  ;;  %v2355_v33 = vld [vmem:[%s3725_s1 + $0x1ac] sm:$0xf]  ;;  %v1872_v34 = vld [vmem:[%s3725_s1 + $0x1b8] sm:$0xf0] }
  0x5a   :  { %1236 = vmatpush.bf16.msra.mxu2 %v1695_v41  ;;  %v2254_v41 = vld [vmem:[%s3725_s1 + $0x4a8] sm:$0xf] }
  0x5b   :  { %1198 = vmatpush.bf16.msra.mxu0 %v2075_v55  ;;  %1255 = vmatpush.bf16.msra.mxu3 %v1823_v62  ;;  %v2421_v55 = vld [vmem:[%s3725_s1 + $0x3b4] sm:$0xf0]  ;;  %v2255_v59 = vor.u32 %v2453_v42, %v2254_v41  ;;  %v1744_v62 = vld [vmem:[%s3725_s1 + $0xb8] sm:$0xf0]  ;;  %v2062_v41 = vld [vmem:[%s3725_s1 + $0x328] sm:$0xf] }
  0x5c   :  { %v2127_v3 = vor.u32 %v2421_v55, %v2126_v52  ;;  %v1747_v4 = vor.u32 %v2323_v61, %v1744_v62  ;;  %v2405_v42 = vld [vmem:[%s3725_s1 + $0x334] sm:$0xf0]  ;;  %v2174_v52 = vld [vmem:[%s3725_s1 + $0x408] sm:$0xf]  ;;  %v2427_v61 = vld [vmem:[%s3725_s1 + $0x3ec] sm:$0xf] }
  0x5d   :  { %1218 = vmatpush.bf16.msra.mxu1 %v2187_v9  ;;  %v2319_v9 = vld [vmem:[%s3725_s1 + $0x8c] sm:$0xf]  ;;  %v2433_v55 = vld [vmem:[%s3725_s1 + $0x414] sm:$0xf0]  ;;  %v2160_v62 = vld [vmem:[%s3725_s1 + $0x3f8] sm:$0xf0] }
  0x5e   :  { %1237 = vmatpush.bf16.msra.mxu2 %v1679_v63  ;;  %v2238_v63 = vld [vmem:[%s3725_s1 + $0x488] sm:$0xf]  ;;  %v1731_v16 = vor.u32 %v2319_v9, %v1728_v10  ;;  %v2175_v6 = vor.u32 %v2433_v55, %v2174_v52  ;;  %v2395_v9 = vld [vmem:[%s3725_s1 + $0x2ec] sm:$0xf]  ;;  %v2032_v10 = vld [vmem:[%s3725_s1 + $0x2f8] sm:$0xf0]  ;;  %v2163_v11 = vor.u32 %v2427_v61, %v2160_v62 }
  0x5f   :  { %1199 = vmatpush.bf16.msra.mxu0 %v2059_v8  ;;  %1256 = vmatpush.bf16.msra.mxu3 %v1807_v13  ;;  %v2239_v7 = vor.u32 %v2449_v0, %v2238_v63  ;;  %v1983_v8 = vor.u32 %v2385_v2, %v1982_v1  ;;  %v1966_v13 = vld [vmem:[%s3725_s1 + $0x268] sm:$0xf]  ;;  %v2363_v63 = vld [vmem:[%s3725_s1 + $0x1ec] sm:$0xf]  ;;  %v1904_v0 = vld [vmem:[%s3725_s1 + $0x1f8] sm:$0xf0]  ;;  %v2063_v1 = vor.u32 %v2405_v42, %v2062_v41 }
  0x60   :  { %v1907_v12 = vor.u32 %v2363_v63, %v1904_v0  ;;  %v2035_v21 = vor.u32 %v2395_v9, %v2032_v10  ;;  %v2415_v41 = vld [vmem:[%s3725_s1 + $0x38c] sm:$0xf]  ;;  %v2112_v42 = vld [vmem:[%s3725_s1 + $0x398] sm:$0xf0] }
  0x61   :  { %1219 = vmatpush.bf16.msra.mxu1 %v2171_v26  ;;  %v2377_v26 = vld [vmem:[%s3725_s1 + $0x254] sm:$0xf0]  ;;  %v2383_v52 = vld [vmem:[%s3725_s1 + $0x28c] sm:$0xf]  ;;  %v1984_v55 = vld [vmem:[%s3725_s1 + $0x298] sm:$0xf0]  ;;  %v2115_v61 = vor.u32 %v2415_v41, %v2112_v42 }
  0x62   :  { %1238 = vmatpush.bf16.msra.mxu2 %v1663_v14  ;;  %v2381_v14 = vld [vmem:[%s3725_s1 + $0x274] sm:$0xf0]  ;;  %v2411_v63 = vld [vmem:[%s3725_s1 + $0x36c] sm:$0xf]  ;;  %v2096_v0 = vld [vmem:[%s3725_s1 + $0x378] sm:$0xf0] }
  0x63   :  { %1200 = vmatpush.bf16.msra.mxu0 %v2043_v25  ;;  %1257 = vmatpush.bf16.msra.mxu3 %v1791_v29  ;;  %v1967_v20 = vor.u32 %v2381_v14, %v1966_v13  ;;  %v1950_v25 = vld [vmem:[%s3725_s1 + $0x248] sm:$0xf]  ;;  %v2459_v13 = vld [vmem:[%s3725_s1 + $0x4ec] sm:$0xf]  ;;  %v2288_v14 = vld [vmem:[%s3725_s1 + $0x4f8] sm:$0xf0] }
  0x64   :  { %1220 = vmatmul.bf16.vlgmr.msra.gmra.mxu1 %v2996_v58  ;;  %v2078_v29 = vld [vmem:[%s3725_s1 + $0x348] sm:$0xf]  ;;  %v2291_v22 = vor.u32 %v2459_v13, %v2288_v14  ;;  %v2407_v10 = vld [vmem:[%s3725_s1 + $0x34c] sm:$0xf]  ;;  %v1920_v41 = vld [vmem:[%s3725_s1 + $0x218] sm:$0xf0] }
  0x65   :  { %1288 = vmatpush.bf16.msrb.mxu1 %v2159_v31  ;;  %1239 = vmatmul.bf16.vlgmr.msra.gmra.mxu2 %v2726_v48  ;;  %v2207_v31 = vor.u32 %v2441_v24, %v2206_v23  ;;  %v2391_v23 = vld [vmem:[%s3725_s1 + $0x2cc] sm:$0xf] }
  0x66   :  { %1307 = vmatpush.bf16.msrb.mxu2 %v2287_v18  ;;  %1201 = vmatmul.bf16.vlgmr.msra.gmra.mxu0 %v2747_v57  ;;  %v2413_v18 = vld [vmem:[%s3725_s1 + $0x374] sm:$0xf0]  ;;  %v2343_v14 = vld [vmem:[%s3725_s1 + $0x14c] sm:$0xf] }
  0x67   :  { %1269 = vmatpush.bf16.msrb.mxu0 %v2031_v30  ;;  %1326 = vmatpush.bf16.msrb.mxu3 %v1779_v32  ;;  %v2095_v27 = vor.u32 %v2413_v18, %v2094_v17  ;;  %v2409_v30 = vld [vmem:[%s3725_s1 + $0x354] sm:$0xf0]  ;;  %v1951_v32 = vor.u32 %v2377_v26, %v1950_v25  ;;  %v2359_v17 = vld [vmem:[%s3725_s1 + $0x1cc] sm:$0xf]  ;;  %v1888_v18 = vld [vmem:[%s3725_s1 + $0x1d8] sm:$0xf0] }
  0x68   :  { %1258 = vmatmul.bf16.vlgmr.msra.gmra.mxu3 %v2737_v53  ;;  %v2079_v39 = vor.u32 %v2409_v30, %v2078_v29  ;;  %v1891_v25 = vor.u32 %v2359_v17, %v1888_v18  ;;  %v2016_v26 = vld [vmem:[%s3725_s1 + $0x2d8] sm:$0xf0]  ;;  %v2419_v29 = vld [vmem:[%s3725_s1 + $0x3ac] sm:$0xf] }
  0x69   :  { %1289 = vmatpush.bf16.msrb.mxu1 %v2143_v47  ;;  %v2128_v30 = vld [vmem:[%s3725_s1 + $0x3b8] sm:$0xf0]  ;;  %v2439_v18 = vld [vmem:[%s3725_s1 + $0x44c] sm:$0xf] }
  0x6a   :  { %1308 = vmatpush.bf16.msrb.mxu2 %v2271_v35  ;;  %v2190_v35 = vld [vmem:[%s3725_s1 + $0x428] sm:$0xf]  ;;  %v1952_v17 = vld [vmem:[%s3725_s1 + $0x258] sm:$0xf0]  ;;  %v2431_v42 = vld [vmem:[%s3725_s1 + $0x40c] sm:$0xf] }
  0x6b   :  { %1270 = vmatpush.bf16.msrb.mxu0 %v2015_v38  ;;  %1327 = vmatpush.bf16.msrb.mxu3 %v1763_v49  ;;  %v2373_v38 = vld [vmem:[%s3725_s1 + $0x234] sm:$0xf0]  ;;  %v2191_v45 = vor.u32 %v2437_v36, %v2190_v35  ;;  %v1680_v49 = vld [vmem:[%s3725_s1 + $0x38] sm:$0xf0]  ;;  %v2387_v35 = vld [vmem:[%s3725_s1 + $0x2ac] sm:$0xf] }
  0x6c   :  { %v1935_v47 = vor.u32 %v2373_v38, %v1934_v37  ;;  %v1683_v2 = vor.u32 %v2307_v43, %v1680_v49  ;;  %v2000_v36 = vld [vmem:[%s3725_s1 + $0x2b8] sm:$0xf0]  ;;  %v2451_v37 = vld [vmem:[%s3725_s1 + $0x4ac] sm:$0xf] }
  0x6d   :  { %1290 = vmatpush.bf16.msrb.mxu1 %v2127_v3  ;;  %v2046_v3 = vld [vmem:[%s3725_s1 + $0x308] sm:$0xf]  ;;  %v2256_v38 = vld [vmem:[%s3725_s1 + $0x4b8] sm:$0xf0]  ;;  %v2003_v43 = vor.u32 %v2387_v35, %v2000_v36 }
  0x6e   :  { %1309 = vmatpush.bf16.msrb.mxu2 %v2255_v59  ;;  %v1918_v59 = vld [vmem:[%s3725_s1 + $0x208] sm:$0xf]  ;;  %v1856_v49 = vld [vmem:[%s3725_s1 + $0x198] sm:$0xf0] }
  0x6f   :  { %1271 = vmatpush.bf16.msrb.mxu0 %v1999_v60  ;;  %1328 = vmatpush.bf16.msrb.mxu3 %v1747_v4  ;;  %v2369_v60 = vld [vmem:[%s3725_s1 + $0x214] sm:$0xf0]  ;;  %v2048_v35 = vld [vmem:[%s3725_s1 + $0x318] sm:$0xf0] }
  0x70   :  { %v2401_v4 = vld [vmem:[%s3725_s1 + $0x314] sm:$0xf0] }
  0x71   :  { %1291 = vmatpush.bf16.msrb.mxu1 %v2111_v15  ;;  %v2423_v15 = vld [vmem:[%s3725_s1 + $0x3cc] sm:$0xf] }
  0x72   :  { %1310 = vmatpush.bf16.msrb.mxu2 %v2239_v7  ;;  %v1919_v7 = vor.u32 %v2369_v60, %v1918_v59  ;;  %v2447_v59 = vld [vmem:[%s3725_s1 + $0x48c] sm:$0xf]  ;;  %v2240_v60 = vld [vmem:[%s3725_s1 + $0x498] sm:$0xf0] }
  0x73   :  { %1272 = vmatpush.bf16.msrb.mxu0 %v1983_v8  ;;  %1329 = vmatpush.bf16.msrb.mxu3 %v1731_v16  ;;  %v1664_v8 = vld [vmem:[%s3725_s1 + $0x18] sm:$0xf0] }
  0x74   :  { %1225 = vmatmul.bf16.gmra.mxu1 %v3104_v46  ;;  %v2144_v16 = vld [vmem:[%s3725_s1 + $0x3d8] sm:$0xf0] }
  0x75   :  { %1292 = vmatpush.bf16.msrb.mxu1 %v2095_v27  ;;  %1244 = vmatmul.bf16.gmra.mxu2 %v2858_v44  ;;  %v2147_v24 = vor.u32 %v2423_v15, %v2144_v16  ;;  %v2455_v27 = vld [vmem:[%s3725_s1 + $0x4cc] sm:$0xf]  ;;  %v1824_v15 = vld [vmem:[%s3725_s1 + $0x158] sm:$0xf0] }
  0x76   :  { %1311 = vmatpush.bf16.msrb.mxu2 %v2223_v19  ;;  %1206 = vmatmul.bf16.gmra.mxu0 %v2879_v56  ;;  %v2047_v19 = vor.u32 %v2401_v4, %v2046_v3  ;;  %v1840_v3 = vld [vmem:[%s3725_s1 + $0x178] sm:$0xf0]  ;;  %v2379_v4 = vld [vmem:[%s3725_s1 + $0x26c] sm:$0xf] }
  0x77   :  { %1273 = vmatpush.bf16.msrb.mxu0 %v1967_v20  ;;  %1330 = vmatpush.bf16.msrb.mxu3 %v1715_v28  ;;  %v1667_v20 = vor.u32 %v2303_v5, %v1664_v8  ;;  %v2272_v28 = vld [vmem:[%s3725_s1 + $0x4d8] sm:$0xf0]  ;;  %v2099_v8 = vor.u32 %v2411_v63, %v2096_v0  ;;  %v2375_v16 = vld [vmem:[%s3725_s1 + $0x24c] sm:$0xf] }
  0x78   :  { %1263 = vmatmul.bf16.gmra.mxu3 %v2869_v50  ;;  %v1968_v5 = vld [vmem:[%s3725_s1 + $0x278] sm:$0xf0] }
  0x79   :  { %1293 = vmatpush.bf16.msrb.mxu1 %v2079_v39  ;;  %v2131_v39 = vor.u32 %v2419_v29, %v2128_v30  ;;  %v1936_v29 = vld [vmem:[%s3725_s1 + $0x238] sm:$0xf0]  ;;  %v2435_v30 = vld [vmem:[%s3725_s1 + $0x42c] sm:$0xf] }
  0x7a   :  { %1312 = vmatpush.bf16.msrb.mxu2 %v2207_v31  ;;  %v2019_v31 = vor.u32 %v2391_v23, %v2016_v26  ;;  %v2064_v23 = vld [vmem:[%s3725_s1 + $0x338] sm:$0xf0]  ;;  %v2339_v26 = vld [vmem:[%s3725_s1 + $0x12c] sm:$0xf] }
  0x7b   :  { %1274 = vmatpush.bf16.msrb.mxu0 %v1951_v32  ;;  %1331 = vmatpush.bf16.msrb.mxu3 %v1699_v40  ;;  %v2275_v32 = vor.u32 %v2455_v27, %v2272_v28  ;;  %v1875_v40 = vor.u32 %v2355_v33, %v1872_v34  ;;  %v1808_v27 = vld [vmem:[%s3725_s1 + $0x138] sm:$0xf0]  ;;  %v2371_v28 = vld [vmem:[%s3725_s1 + $0x22c] sm:$0xf] }
  0x7c   :  { %v1811_v33 = vor.u32 %v2339_v26, %v1808_v27  ;;  %v2399_v34 = vld [vmem:[%s3725_s1 + $0x30c] sm:$0xf]  ;;  %v1939_v36 = vor.u32 %v2371_v28, %v1936_v29 }
  0x7d   :  { %1294 = vmatpush.bf16.msrb.mxu1 %v2063_v1  ;;  %v1987_v1 = vor.u32 %v2383_v52, %v1984_v55 }
  0x7e   :  { %1313 = vmatpush.bf16.msrb.mxu2 %v2191_v45  ;;  %v2259_v45 = vor.u32 %v2451_v37, %v2256_v38  ;;  %v2335_v38 = vld [vmem:[%s3725_s1 + $0x10c] sm:$0xf] }
  0x7f   :  { %1275 = vmatpush.bf16.msrb.mxu0 %v1935_v47  ;;  %1332 = vmatpush.bf16.msrb.mxu3 %v1683_v2  ;;  %v2351_v47 = vld [vmem:[%s3725_s1 + $0x18c] sm:$0xf]  ;;  %v2243_v2 = vor.u32 %v2447_v59, %v2240_v60 }
  0x80   :  { %v1859_v62 = vor.u32 %v2351_v47, %v1856_v49 }
  0x81   :  { %1295 = vmatpush.bf16.msrb.mxu1 %v2047_v19  ;;  %v2208_v19 = vld [vmem:[%s3725_s1 + $0x458] sm:$0xf0] }
  0x82   :  { %1314 = vmatpush.bf16.msrb.mxu2 %v2175_v6  ;;  %v2443_v6 = vld [vmem:[%s3725_s1 + $0x46c] sm:$0xf] }
  0x83   :  { %1276 = vmatpush.bf16.msrb.mxu0 %v1919_v7  ;;  %1333 = vmatpush.bf16.msrb.mxu3 %v1667_v20  ;;  %v2224_v7 = vld [vmem:[%s3725_s1 + $0x478] sm:$0xf0] }
  0x84   :  { %1296 = vmatmul.bf16.vlgmr.msrb.gmra.mxu1 %v2747_v57  ;;  %v2227_v13 = vor.u32 %v2443_v6, %v2224_v7 }
  0x85   :  { %1364 = vmatpush.bf16.msra.mxu1 %v2035_v21  ;;  %1315 = vmatmul.bf16.vlgmr.msrb.gmra.mxu2 %v2996_v58  ;;  %v1827_v21 = vor.u32 %v2343_v14, %v1824_v15 }
  0x86   :  { %1383 = vmatpush.bf16.msra.mxu2 %v2163_v11  ;;  %1277 = vmatmul.bf16.vlgmr.msrb.gmra.mxu0 %v2739_v54  ;;  %v2080_v11 = vld [vmem:[%s3725_s1 + $0x358] sm:$0xf0] }
  0x87   :  { %1345 = vmatpush.bf16.msra.mxu0 %v1907_v12  ;;  %1402 = vmatpush.bf16.msra.mxu3 %v2291_v22  ;;  %v1971_v12 = vor.u32 %v2379_v4, %v1968_v5  ;;  %v2083_v20 = vor.u32 %v2407_v10, %v2080_v11  ;;  %v2403_v22 = vld [vmem:[%s3725_s1 + $0x32c] sm:$0xf] }
  0x88   :  { %1334 = vmatmul.bf16.vlgmr.msrb.gmra.mxu3 %v2726_v48  ;;  %v2347_v48 = vld [vmem:[%s3725_s1 + $0x16c] sm:$0xf] }
  0x89   :  { %1365 = vmatpush.bf16.msra.mxu1 %v2019_v31  ;;  %v1843_v9 = vor.u32 %v2347_v48, %v1840_v3  ;;  %v2192_v31 = vld [vmem:[%s3725_s1 + $0x438] sm:$0xf0] }
  0x8a   :  { %1384 = vmatpush.bf16.msra.mxu2 %v2147_v24  ;;  %v1955_v24 = vor.u32 %v2375_v16, %v1952_v17  ;;  %v2195_v37 = vor.u32 %v2435_v30, %v2192_v31 }
  0x8b   :  { %1346 = vmatpush.bf16.msra.mxu0 %v1891_v25  ;;  %1403 = vmatpush.bf16.msra.mxu3 %v2275_v32  ;;  %v2211_v25 = vor.u32 %v2439_v18, %v2208_v19  ;;  %v2067_v32 = vor.u32 %v2403_v22, %v2064_v23 }
  0x8d   :  { %1366 = vmatpush.bf16.msra.mxu1 %v2003_v43  ;;  %v2176_v43 = vld [vmem:[%s3725_s1 + $0x418] sm:$0xf0] }
  0x8e   :  { %1385 = vmatpush.bf16.msra.mxu2 %v2131_v39  ;;  %v1792_v39 = vld [vmem:[%s3725_s1 + $0x118] sm:$0xf0]  ;;  %v2179_v52 = vor.u32 %v2431_v42, %v2176_v43 }
  0x8f   :  { %1347 = vmatpush.bf16.msra.mxu0 %v1875_v40  ;;  %1404 = vmatpush.bf16.msra.mxu3 %v2259_v45  ;;  %v2367_v40 = vld [vmem:[%s3725_s1 + $0x20c] sm:$0xf]  ;;  %v2051_v45 = vor.u32 %v2399_v34, %v2048_v35  ;;  %v1795_v47 = vor.u32 %v2335_v38, %v1792_v39 }
  0x90   :  { %v1923_v49 = vor.u32 %v2367_v40, %v1920_v41 }
  0x91   :  { %1367 = vmatpush.bf16.msra.mxu1 %v1987_v1 }
  0x92   :  { %1386 = vmatpush.bf16.msra.mxu2 %v2115_v61 }
  0x93   :  { %1348 = vmatpush.bf16.msra.mxu0 %v1859_v62  ;;  %1405 = vmatpush.bf16.msra.mxu3 %v2243_v2 }
  0x94   :  { %1301 = vmatmul.bf16.gmra.mxu1 %v2879_v56 }
  0x95   :  { %1368 = vmatpush.bf16.msra.mxu1 %v1971_v12  ;;  %1320 = vmatmul.bf16.gmra.mxu2 %v3104_v46 }
  0x96   :  { %1387 = vmatpush.bf16.msra.mxu2 %v2099_v8  ;;  %1282 = vmatmul.bf16.gmra.mxu0 %v2871_v51 }
  0x97   :  { %1349 = vmatpush.bf16.msra.mxu0 %v1843_v9  ;;  %1406 = vmatpush.bf16.msra.mxu3 %v2227_v13 }
  0x98   :  { %1339 = vmatmul.bf16.gmra.mxu3 %v2858_v44 }
  0x99   :  { %1369 = vmatpush.bf16.msra.mxu1 %v1955_v24 }
  0x9a   :  { %1388 = vmatpush.bf16.msra.mxu2 %v2083_v20 }
  0x9b   :  { %1350 = vmatpush.bf16.msra.mxu0 %v1827_v21  ;;  %1407 = vmatpush.bf16.msra.mxu3 %v2211_v25 }
  0x9d   :  { %1370 = vmatpush.bf16.msra.mxu1 %v1939_v36 }
  0x9e   :  { %1389 = vmatpush.bf16.msra.mxu2 %v2067_v32 }
  0x9f   :  { %1351 = vmatpush.bf16.msra.mxu0 %v1811_v33  ;;  %1408 = vmatpush.bf16.msra.mxu3 %v2195_v37 }
  0xa1   :  { %1371 = vmatpush.bf16.msra.mxu1 %v1923_v49  ;;  %v1050_v55 = vpop.f32.mrf.mxu0  ;;  %v1069_v59 = vpop.f32.mrf.mxu1 }
  0xa2   :  { %1390 = vmatpush.bf16.msra.mxu2 %v2051_v45  ;;  %v1070_v60 = vadd.f32 %v1069_v59, %v1050_v55 }
  0xa3   :  { %1352 = vmatpush.bf16.msra.mxu0 %v1795_v47  ;;  %1409 = vmatpush.bf16.msra.mxu3 %v2179_v52 }
  0xa4   :  { %1372 = vmatmul.bf16.vlgmr.msra.gmra.mxu1 %v2739_v54 }
  0xa5   :  { %1391 = vmatmul.bf16.vlgmr.msra.gmra.mxu2 %v2747_v57 }
  0xa6   :  { %1353 = vmatmul.bf16.vlgmr.msra.gmra.mxu0 %v2737_v53 }
  0xa8   :  { %1410 = vmatmul.bf16.vlgmr.msra.gmra.mxu3 %v2996_v58  ;;  %v1088_v44 = vpop.f32.mrf.mxu2 }
  0xa9   :  { %v1089_v61 = vadd.f32 %v1088_v44, %v1070_v60  ;;  %v1107_v62 = vpop.f32.mrf.mxu3  ;;  %v1052_v63 = vpop.f32.mrf.mxu0 }
  0xaa   :  { %v1071_v0 = vpop.f32.mrf.mxu1 }
  0xab   :  { %v1108_v1 = vadd.f32 %v1107_v62, %v1089_v61  ;;  %v1072_v2 = vadd.f32 %v1071_v0, %v1052_v63 }
  0xb0   :  { %v1090_v48 = vpop.f32.mrf.mxu2 }
  0xb1   :  { %v1091_v3 = vadd.f32 %v1090_v48, %v1072_v2  ;;  %v1109_v4 = vpop.f32.mrf.mxu3  ;;  %v1055_v5 = vpop.f32.mrf.mxu0 }
  0xb2   :  { %v1074_v6 = vpop.f32.mrf.mxu1 }
  0xb3   :  { %v1110_v7 = vadd.f32 %v1109_v4, %v1091_v3  ;;  %v1075_v53 = vadd.f32 %v1074_v6, %v1055_v5 }
  0xb4   :  { %1377 = vmatmul.bf16.gmra.mxu1 %v2871_v51 }
  0xb5   :  { %1396 = vmatmul.bf16.gmra.mxu2 %v2879_v56 }
  0xb6   :  { %1358 = vmatmul.bf16.gmra.mxu0 %v2869_v50 }
  0xb8   :  { %1415 = vmatmul.bf16.gmra.mxu3 %v3104_v46  ;;  %v1093_v54 = vpop.f32.mrf.mxu2 }
  0xb9   :  { %v1094_v57 = vadd.f32 %v1093_v54, %v1075_v53  ;;  %v1112_v58 = vpop.f32.mrf.mxu3  ;;  %v1057_v8 = vpop.f32.mrf.mxu0 }
  0xba   :  { %v1076_v9 = vpop.f32.mrf.mxu1 }
  0xbb   :  { %v1113_v10 = vadd.f32 %v1112_v58, %v1094_v57  ;;  %v1077_v11 = vadd.f32 %v1076_v9, %v1057_v8 }
  0xc0   :  { %v1095_v12 = vpop.f32.mrf.mxu2 }
  0xc1   :  { %v1096_v13 = vadd.f32 %v1095_v12, %v1077_v11  ;;  %v1114_v14 = vpop.f32.mrf.mxu3 }
  0xc2   :  { %v1145_v16 = vpop.f32.mrf.mxu1 }
  0xc3   :  { %v1126_v15 = vpop.f32.mrf.mxu0  ;;  %v1115_v17 = vadd.f32 %v1114_v14, %v1096_v13 }
  0xc4   :  { %v3569_v50 = vadd.f32 %v1126_v15, %v1108_v1 }
  0xc6   :  { %v1431_v22 = vmul.f32 %v3569_v50, %v3569_v50 }
  0xc8   :  { %v1164_v51 = vpop.f32.mrf.mxu2 }
  0xc9   :  { %v1165_v56 = vadd.f32 %v1164_v51, %v1145_v16 }
  0xca   :  { %v1147_v46 = vpop.f32.mrf.mxu1 }
  0xcb   :  { %v1183_v18 = vpop.f32.mrf.mxu3  ;;  %v1128_v19 = vpop.f32.mrf.mxu0 }
  0xcc   :  { %v3571_v20 = vadd.f32 %v1128_v19, %v1110_v7  ;;  %v1184_v21 = vadd.f32 %v1183_v18, %v1165_v56 }
  0xce   :  { %v1421_v23 = vadd.f32 %v3571_v20, %v3569_v50  ;;  %v1432_v24 = vmul.f32 %v3571_v20, %v3571_v20 }
  0xd0   :  { %v1435_v25 = vadd.f32 %v1432_v24, %v1431_v22  ;;  %v1166_v26 = vpop.f32.mrf.mxu2 }
  0xd1   :  { %v1167_v28 = vadd.f32 %v1166_v26, %v1147_v46 }
  0xd2   :  { %v1150_v30 = vpop.f32.mrf.mxu1 }
  0xd3   :  { %v1185_v27 = vpop.f32.mrf.mxu3  ;;  %v1131_v29 = vpop.f32.mrf.mxu0 }
  0xd4   :  { %v3579_v31 = vadd.f32 %v1131_v29, %v1113_v10  ;;  %v1186_v32 = vadd.f32 %v1185_v27, %v1167_v28 }
  0xd6   :  { %v1422_v33 = vadd.f32 %v1421_v23, %v3579_v31  ;;  %v1433_v34 = vmul.f32 %v3579_v31, %v3579_v31 }
  0xd8   :  { %v1436_v35 = vadd.f32 %v1435_v25, %v1433_v34  ;;  %v1169_v36 = vpop.f32.mrf.mxu2 }
  0xd9   :  { %v1170_v38 = vadd.f32 %v1169_v36, %v1150_v30 }
  0xda   :  { %v1152_v40 = vpop.f32.mrf.mxu1 }
  0xdb   :  { %v1188_v37 = vpop.f32.mrf.mxu3  ;;  %v1133_v39 = vpop.f32.mrf.mxu0 }
  0xdc   :  { %v3584_v41 = vadd.f32 %v1133_v39, %v1115_v17  ;;  %v1189_v42 = vadd.f32 %v1188_v37, %v1170_v38 }
  0xde   :  { %v1423_v43 = vadd.f32 %v1422_v33, %v3584_v41  ;;  %v1434_v45 = vmul.f32 %v3584_v41, %v3584_v41 }
  0xe0   :  { %v1437_v47 = vadd.f32 %v1436_v35, %v1434_v45  ;;  %v1171_v49 = vpop.f32.mrf.mxu2  ;;  %v1424_v12 = vrot.slane %v1423_v43, 4 }
  0xe1   :  { %v1172_v55 = vadd.f32 %v1171_v49, %v1152_v40 }
  0xe2   :  { %v1221_v60 = vpop.f32.mrf.mxu1  ;;  %v1438_v15 = vrot.slane %v1437_v47, 4  ;;  %v1425_v19 = vadd.f32 %v1424_v12, %v1423_v43 }
  0xe3   :  { %v1190_v52 = vpop.f32.mrf.mxu3  ;;  %v1202_v59 = vpop.f32.mrf.mxu0 }
  0xe4   :  { %v1203_v44 = vadd.f32 %v1202_v59, %v1184_v21  ;;  %v1191_v61 = vadd.f32 %v1190_v52, %v1172_v55  ;;  %v1439_v21 = vadd.f32 %v1438_v15, %v1437_v47  ;;  %v1426_v23 = vrot.slane %v1425_v19, 2 }
  0xe6   :  { %v3589_v62 = vadd.f32 %v1221_v60, %v1203_v44  ;;  %v1440_v26 = vrot.slane %v1439_v21, 2  ;;  %v1427_v34 = vadd.f32 %v1426_v23, %v1425_v19 }
  0xe8   :  { %v1240_v63 = vpop.f32.mrf.mxu2  ;;  %v1455_v5 = vmul.f32 %v3589_v62, %v3589_v62  ;;  %v1441_v37 = vadd.f32 %v1440_v26, %v1439_v21  ;;  %v1428_v40 = vrot.slane %v1427_v34, 1 }
  0xea   :  { %v1223_v48 = vpop.f32.mrf.mxu1  ;;  %v1442_v45 = vrot.slane %v1441_v37, 1  ;;  %v1429_v44 = vadd.f32 %v1428_v40, %v1427_v34 }
  0xeb   :  { %v1259_v0 = vpop.f32.mrf.mxu3  ;;  %v1204_v2 = vpop.f32.mrf.mxu0 }
  0xec   :  { %v3591_v1 = vadd.f32 %v1259_v0, %v1240_v63  ;;  %v1205_v3 = vadd.f32 %v1204_v2, %v1186_v32  ;;  %v1443_v0 = vadd.f32 %v1442_v45, %v1441_v37 }
  0xee   :  { %v3593_v4 = vadd.f32 %v1223_v48, %v1205_v3 }
  0xf0   :  { %v1445_v6 = vadd.f32 %v3593_v4, %v3589_v62  ;;  %v1456_v7 = vmul.f32 %v3593_v4, %v3593_v4  ;;  %v1242_v54 = vpop.f32.mrf.mxu2 }
  0xf2   :  { %v1459_v53 = vadd.f32 %v1456_v7, %v1455_v5  ;;  %v1226_v9 = vpop.f32.mrf.mxu1 }
  0xf3   :  { %v1261_v57 = vpop.f32.mrf.mxu3  ;;  %v1207_v8 = vpop.f32.mrf.mxu0 }
  0xf4   :  { %v1262_v58 = vadd.f32 %v1261_v57, %v1242_v54  ;;  %v1208_v10 = vadd.f32 %v1207_v8, %v1189_v42 }
  0xf6   :  { %v3601_v11 = vadd.f32 %v1226_v9, %v1208_v10 }
  0xf8   :  { %v1446_v13 = vadd.f32 %v1445_v6, %v3601_v11  ;;  %v1457_v14 = vmul.f32 %v3601_v11, %v3601_v11  ;;  %v1245_v17 = vpop.f32.mrf.mxu2 }
  0xfa   :  { %v1460_v16 = vadd.f32 %v1459_v53, %v1457_v14  ;;  %v1228_v56 = vpop.f32.mrf.mxu1 }
  0xfb   :  { %v1264_v51 = vpop.f32.mrf.mxu3  ;;  %v1209_v18 = vpop.f32.mrf.mxu0 }
  0xfc   :  { %v1210_v46 = vadd.f32 %v1209_v18, %v1191_v61  ;;  %v1265_v54 = vadd.f32 %v1264_v51, %v1245_v17 }
  0xfe   :  { %v3606_v22 = vadd.f32 %v1228_v56, %v1210_v46 }
 0x100   :  { %v1447_v24 = vadd.f32 %v1446_v13, %v3606_v22  ;;  %v1458_v25 = vmul.f32 %v3606_v22, %v3606_v22  ;;  %v1247_v29 = vpop.f32.mrf.mxu2 }
 0x102   :  { %v1448_v27 = vrot.slane %v1447_v24, 4  ;;  %v1461_v28 = vadd.f32 %v1460_v16, %v1458_v25  ;;  %v1297_v33 = vpop.f32.mrf.mxu1 }
 0x103   :  { %v1266_v30 = vpop.f32.mrf.mxu3  ;;  %v1278_v32 = vpop.f32.mrf.mxu0 }
 0x104   :  { %v1449_v35 = vadd.f32 %v1448_v27, %v1447_v24  ;;  %v1462_v36 = vrot.slane %v1461_v28, 4  ;;  %v1279_v6 = vadd.f32 %v1278_v32, %v3591_v1  ;;  %v1267_v56 = vadd.f32 %v1266_v30, %v1247_v29 }
 0x106   :  { %v1450_v38 = vrot.slane %v1449_v35, 2  ;;  %v1463_v39 = vadd.f32 %v1462_v36, %v1461_v28  ;;  %v1298_v10 = vadd.f32 %v1297_v33, %v1279_v6 }
 0x108   :  { %v1451_v42 = vadd.f32 %v1450_v38, %v1449_v35  ;;  %v1464_v43 = vrot.slane %v1463_v39, 2  ;;  %v1316_v52 = vpop.f32.mrf.mxu2 }
 0x109   :  { %v3616_v14 = vadd.f32 %v1316_v52, %v1298_v10 }
 0x10a   :  { %v1452_v47 = vrot.slane %v1451_v42, 1  ;;  %v1465_v49 = vadd.f32 %v1464_v43, %v1463_v39  ;;  %v1299_v60 = vpop.f32.mrf.mxu1 }
 0x10b   :  { %v3611_v55 = vpop.f32.mrf.mxu3  ;;  %v1280_v59 = vpop.f32.mrf.mxu0  ;;  %v1479_v1 = vmul.f32 %v3616_v14, %v3616_v14 }
 0x10c   :  { %v1453_v61 = vadd.f32 %v1452_v47, %v1451_v42  ;;  %v1466_v63 = vrot.slane %v1465_v49, 1  ;;  %v1281_v3 = vadd.f32 %v1280_v59, %v1262_v58 }
 0x10e   :  { %v1454_v2 = vadd.f32 %v1453_v61, %v1429_v44  ;;  %v1467_v48 = vadd.f32 %v1466_v63, %v1465_v49  ;;  %v1300_v57 = vadd.f32 %v1299_v60, %v1281_v3 }
 0x110   :  { %v1468_v5 = vadd.f32 %v1467_v48, %v1443_v0  ;;  %v1318_v7 = vpop.f32.mrf.mxu2 }
 0x111   :  { %v3614_v12 = vadd.f32 %v1318_v7, %v1300_v57 }
 0x112   :  { %v1302_v9 = vpop.f32.mrf.mxu1 }
 0x113   :  { %v1337_v53 = vpop.f32.mrf.mxu3  ;;  %v1283_v8 = vpop.f32.mrf.mxu0  ;;  %v1480_v15 = vmul.f32 %v3614_v12, %v3614_v12  ;;  %v1469_v17 = vadd.f32 %v3614_v12, %v3616_v14 }
 0x114   :  { %v1284_v13 = vadd.f32 %v1283_v8, %v1265_v54 }
 0x115   :  { %v1483_v21 = vadd.f32 %v1480_v15, %v1479_v1 }
 0x116   :  { %v1303_v16 = vadd.f32 %v1302_v9, %v1284_v13 }
 0x118   :  { %v1321_v58 = vpop.f32.mrf.mxu2 }
 0x119   :  { %v3624_v51 = vadd.f32 %v1321_v58, %v1303_v16 }
 0x11a   :  { %v1304_v46 = vpop.f32.mrf.mxu1 }
 0x11b   :  { %v1340_v18 = vpop.f32.mrf.mxu3  ;;  %v1285_v19 = vpop.f32.mrf.mxu0  ;;  %v1470_v23 = vadd.f32 %v1469_v17, %v3624_v51  ;;  %v1481_v24 = vmul.f32 %v3624_v51, %v3624_v51 }
 0x11c   :  { %v1286_v25 = vadd.f32 %v1285_v19, %v1267_v56 }
 0x11d   :  { %v1484_v26 = vadd.f32 %v1483_v21, %v1481_v24 }
 0x11e   :  { %v1305_v27 = vadd.f32 %v1304_v46, %v1286_v25 }
 0x120   :  { %v1323_v28 = vpop.f32.mrf.mxu2 }
 0x121   :  { %v3629_v30 = vadd.f32 %v1323_v28, %v1305_v27 }
 0x122   :  { %v1373_v33 = vpop.f32.mrf.mxu1 }
 0x123   :  { %v1342_v29 = vpop.f32.mrf.mxu3  ;;  %v1354_v32 = vpop.f32.mrf.mxu0  ;;  %v1471_v34 = vadd.f32 %v1470_v23, %v3629_v30  ;;  %v1482_v35 = vmul.f32 %v3629_v30, %v3629_v30 }
 0x124   :  { %v1355_v8 = vadd.f32 %v1354_v32, %v3611_v55 }
 0x125   :  { %v1472_v36 = vrot.slane %v1471_v34, 4  ;;  %v1485_v37 = vadd.f32 %v1484_v26, %v1482_v35 }
 0x126   :  { %v1374_v15 = vadd.f32 %v1373_v33, %v1355_v8 }
 0x127   :  { %v1473_v38 = vadd.f32 %v1472_v36, %v1471_v34  ;;  %v1486_v39 = vrot.slane %v1485_v37, 4 }
 0x128   :  { %v1392_v40 = vpop.f32.mrf.mxu2 }
 0x129   :  { %v1474_v43 = vrot.slane %v1473_v38, 2  ;;  %v1487_v45 = vadd.f32 %v1486_v39, %v1485_v37  ;;  %v1393_v17 = vadd.f32 %v1392_v40, %v1374_v15 }
 0x12a   :  { %v1375_v49 = vpop.f32.mrf.mxu1 }
 0x12b   :  { %v1411_v42 = vpop.f32.mrf.mxu3  ;;  %v1356_v47 = vpop.f32.mrf.mxu0  ;;  %v1475_v52 = vadd.f32 %v1474_v43, %v1473_v38  ;;  %v1488_v59 = vrot.slane %v1487_v45, 2 }
 0x12c   :  { %v1357_v7 = vadd.f32 %v1356_v47, %v1337_v53  ;;  %v3637_v23 = vadd.f32 %v1411_v42, %v1393_v17  ;;  %v1535_v17 = vld [vmem:[%s3728_s3] sm:$0x1] }
 0x12d   :  { %v1476_v60 = vrot.slane %v1475_v52, 1  ;;  %v1489_v44 = vadd.f32 %v1488_v59, %v1487_v45 }
 0x12e   :  { %v1376_v13 = vadd.f32 %v1375_v49, %v1357_v7  ;;  %v1503_v25 = vmul.f32 %v3637_v23, %v3637_v23 }
 0x12f   :  { %v1477_v61 = vadd.f32 %v1476_v60, %v1475_v52  ;;  %v1490_v63 = vrot.slane %v1489_v44, 1 }
 0x130   :  { %v1394_v0 = vpop.f32.mrf.mxu2 }
 0x131   :  { %v1478_v3 = vadd.f32 %v1477_v61, %v1454_v2  ;;  %v1491_v6 = vadd.f32 %v1490_v63, %v1489_v44  ;;  %v1395_v16 = vadd.f32 %v1394_v0, %v1376_v13 }
 0x132   :  { %v1378_v10 = vpop.f32.mrf.mxu1 }
 0x133   :  { %v1413_v48 = vpop.f32.mrf.mxu3  ;;  %v1359_v54 = vpop.f32.mrf.mxu0  ;;  %v1492_v57 = vadd.f32 %v1491_v6, %v1468_v5 }
 0x134   :  { %v1360_v9 = vadd.f32 %v1359_v54, %v1340_v18  ;;  %v3635_v21 = vadd.f32 %v1413_v48, %v1395_v16 }
 0x136   :  { %v1379_v58 = vadd.f32 %v1378_v10, %v1360_v9  ;;  %v1504_v55 = vmul.f32 %v3635_v21, %v3635_v21  ;;  %v1493_v26 = vadd.f32 %v3635_v21, %v3637_v23 }
 0x138   :  { %v1397_v56 = vpop.f32.mrf.mxu2  ;;  %v1507_v32 = vadd.f32 %v1504_v55, %v1503_v25 }
 0x139   :  { %v1398_v19 = vadd.f32 %v1397_v56, %v1379_v58  ;;  %v1522_v56 = vld [vmem:[%s3727_s2] sm:$0x1] }
 0x13a   :  { %v1380_v5 = vpop.f32.mrf.mxu1 }
 0x13b   :  { %v1416_v1 = vpop.f32.mrf.mxu3  ;;  %v1361_v46 = vpop.f32.mrf.mxu0 }
 0x13c   :  { %v1362_v2 = vadd.f32 %v1361_v46, %v1342_v29  ;;  %v3639_v53 = vadd.f32 %v1416_v1, %v1398_v19 }
 0x13e   :  { %v1381_v18 = vadd.f32 %v1380_v5, %v1362_v2  ;;  %v1505_v27 = vmul.f32 %v3639_v53, %v3639_v53  ;;  %v1494_v33 = vadd.f32 %v1493_v26, %v3639_v53 }
 0x140   :  { %v1399_v24 = vpop.f32.mrf.mxu2  ;;  %v1508_v35 = vadd.f32 %v1507_v32, %v1505_v27 }
 0x141   :  { %v1400_v28 = vadd.f32 %v1399_v24, %v1381_v18 }
 0x143   :  { %v1418_v29 = vpop.f32.mrf.mxu3 }
 0x144   :  { %v3650_v34 = vadd.f32 %v1418_v29, %v1400_v28 }
 0x146   :  { %v1495_v36 = vadd.f32 %v1494_v33, %v3650_v34  ;;  %v1506_v37 = vmul.f32 %v3650_v34, %v3650_v34 }
 0x148   :  { %v1496_v38 = vrot.slane %v1495_v36, 4  ;;  %v1509_v39 = vadd.f32 %v1508_v35, %v1506_v37 }
 0x14a   :  { %v1497_v40 = vadd.f32 %v1496_v38, %v1495_v36  ;;  %v1510_v42 = vrot.slane %v1509_v39, 4 }
 0x14c   :  { %v1498_v43 = vrot.slane %v1497_v40, 2  ;;  %v1511_v45 = vadd.f32 %v1510_v42, %v1509_v39 }
 0x14e   :  { %v1499_v47 = vadd.f32 %v1498_v43, %v1497_v40  ;;  %v1512_v49 = vrot.slane %v1511_v45, 2 }
 0x150   :  { %v1500_v52 = vrot.slane %v1499_v47, 1  ;;  %v1513_v59 = vadd.f32 %v1512_v49, %v1511_v45 }
 0x152   :  { %v1501_v60 = vadd.f32 %v1500_v52, %v1499_v47  ;;  %v1514_v44 = vrot.slane %v1513_v59, 1 }
 0x154   :  { %v1502_v61 = vadd.f32 %v1501_v60, %v1478_v3  ;;  %v1515_v63 = vadd.f32 %v1514_v44, %v1513_v59 }
 0x156   :  { %v1516_v0 = vadd.f32 %v1515_v63, %v1492_v57  ;;  %v1517_v48 = vmul.f32 0.0078125, %v1502_v61 }
 0x158   :  { %v1518_v6 = vmul.f32 0.0078125, %v1516_v0  ;;  %v1519_v7 = vmul.f32 %v1517_v48, %v1517_v48 }
 0x15a   :  { %v1520_v54 = vsub.f32 %v1518_v6, %v1519_v7 }
 0x15c   :  { %v1521_v8 = vmax.f32 %v1520_v54, 0.0 }
 0x15e   :  { %v1523_v9 = vadd.f32 1e-05, %v1521_v8 }
 0x160   :  { %2462 = vrsqrt.f32 %v1523_v9  ;;  %vm1530_vm1 = vweird.f32 %v1523_v9 }
 0x166   :  { %v2463_v10 = vpop.eup %2462 }
 0x167   :  { %v1525_v13 = vmul.f32 %v2463_v10, %v1523_v9  ;;  %vm1531_vm0 = vweird.f32 %v2463_v10 }
 0x168   :  { %vm1532_vm2 = vmor %vm1530_vm1, %vm1531_vm0 }
 0x169   :  { %v1526_v15 = vmul.f32 %v2463_v10, %v1525_v13 }
 0x16b   :  { %v1527_v16 = vmul.f32 0.5, %v1526_v15 }
 0x16d   :  { %v1528_v58 = vsub.f32 1.5, %v1527_v16 }
 0x16f   :  { %v1529_v3 = vmul.f32 %v2463_v10, %v1528_v58 }
 0x171   :  { %v1533_v57 = vsel %vm1532_vm2, %v2463_v10, %v1529_v3 }
 0x172   :  { %v1534_v1 = vmul.f32 %v1533_v57, %v1522_v56 }
 0x174   :  { %v1536_v19 = vmul.f32 %v1534_v1, %v1517_v48  ;;  %v1539_v46 = vperm.slane %v1534_v1, 0 }
 0x176   :  { %v1537_v2 = vsub.f32 %v1535_v17, %v1536_v19  ;;  %v1541_v5 = vmul.f32 %v1539_v46, %v3569_v50  ;;  %v1542_v55 = vmul.f32 %v1539_v46, %v3571_v20  ;;  %v1543_v18 = vmul.f32 %v1539_v46, %v3579_v31 }
 0x177   :  { %v1544_v24 = vmul.f32 %v1539_v46, %v3584_v41  ;;  %v1560_v25 = vmul.f32 %v1539_v46, %v3589_v62  ;;  %v1561_v26 = vmul.f32 %v1539_v46, %v3593_v4  ;;  %v1562_v27 = vmul.f32 %v1539_v46, %v3601_v11 }
 0x178   :  { %v1546_v28 = vperm.slane %v1537_v2, 0  ;;  %v1563_v29 = vmul.f32 %v1539_v46, %v3606_v22  ;;  %v1576_v32 = vmul.f32 %v1539_v46, %v3616_v14  ;;  %v1577_v33 = vmul.f32 %v1539_v46, %v3614_v12 }
 0x179   :  { %v1578_v50 = vmul.f32 %v1539_v46, %v3624_v51  ;;  %v1579_v20 = vmul.f32 %v1539_v46, %v3629_v30  ;;  %v1592_v22 = vmul.f32 %v1539_v46, %v3637_v23  ;;  %v1593_v51 = vmul.f32 %v1539_v46, %v3635_v21 }
 0x17a   :  { %v1548_v31 = vadd.f32 %v1546_v28, %v1541_v5  ;;  %v1549_v35 = vadd.f32 %v1546_v28, %v1542_v55  ;;  %v1550_v41 = vadd.f32 %v1546_v28, %v1543_v18  ;;  %v1551_v36 = vadd.f32 %v1546_v28, %v1544_v24 }
 0x17b   :  { %v1564_v62 = vadd.f32 %v1560_v25, %v1546_v28  ;;  %v1565_v37 = vadd.f32 %v1561_v26, %v1546_v28  ;;  %v1566_v4 = vadd.f32 %v1562_v27, %v1546_v28  ;;  %v1567_v38 = vadd.f32 %v1563_v29, %v1546_v28 }
 0x17c   :  { %v1552_v11 = vmax.f32 %v1548_v31, 0.0  ;;  %v1553_v39 = vmax.f32 %v1549_v35, 0.0  ;;  %v1554_v40 = vmax.f32 %v1550_v41, 0.0  ;;  %v1555_v14 = vmax.f32 %v1551_v36, 0.0 }
 0x17d   :  { %v1568_v42 = vmax.f32 %v1564_v62, 0.0  ;;  %v1569_v12 = vmax.f32 %v1565_v37, 0.0  ;;  %v1580_v30 = vadd.f32 %v1576_v32, %v1546_v28  ;;  %v1581_v43 = vadd.f32 %v1577_v33, %v1546_v28 }
 0x17e   :  { %1556 = vst [vmem:[%s3729_s4] sm:$0xff] %v1552_v11  ;;  %v1582_v45 = vadd.f32 %v1578_v50, %v1546_v28  ;;  %v1583_v47 = vadd.f32 %v1579_v20, %v1546_v28  ;;  %v1594_v49 = vmul.f32 %v1539_v46, %v3639_v53  ;;  %v1595_v23 = vmul.f32 %v1539_v46, %v3650_v34 }
 0x17f   :  { %1557 = vst [vmem:[%s3729_s4 + $0x20] sm:$0xff] %v1553_v39  ;;  %v1596_v52 = vadd.f32 %v1592_v22, %v1546_v28  ;;  %v1597_v59 = vadd.f32 %v1593_v51, %v1546_v28  ;;  %v1570_v21 = vmax.f32 %v1566_v4, 0.0  ;;  %v1571_v60 = vmax.f32 %v1567_v38, 0.0 }
 0x180   :  { %1558 = vst [vmem:[%s3729_s4 + $0x40] sm:$0xff] %v1554_v40  ;;  %v1598_v44 = vadd.f32 %v1594_v49, %v1546_v28  ;;  %v1599_v61 = vadd.f32 %v1595_v23, %v1546_v28  ;;  %v1584_v53 = vmax.f32 %v1580_v30, 0.0  ;;  %v1585_v34 = vmax.f32 %v1581_v43, 0.0 }
 0x181   :  { %1559 = vst [vmem:[%s3729_s4 + $0x60] sm:$0xff] %v1555_v14  ;;  %v1586_v63 = vmax.f32 %v1582_v45, 0.0  ;;  %v1587_v0 = vmax.f32 %v1583_v47, 0.0  ;;  %v1600_v48 = vmax.f32 %v1596_v52, 0.0  ;;  %v1601_v6 = vmax.f32 %v1597_v59, 0.0 }
 0x182   :  { %1572 = vst [vmem:[%s3729_s4 + $0x8] sm:$0xff] %v1568_v42  ;;  %v1602_v7 = vmax.f32 %v1598_v44, 0.0  ;;  %v1603_v54 = vmax.f32 %v1599_v61, 0.0 }
 0x183   :  { %1573 = vst [vmem:[%s3729_s4 + $0x28] sm:$0xff] %v1569_v12 }
 0x184   :  { %1574 = vst [vmem:[%s3729_s4 + $0x48] sm:$0xff] %v1570_v21 }
 0x185   :  { %1575 = vst [vmem:[%s3729_s4 + $0x68] sm:$0xff] %v1571_v60 }
 0x186   :  { %1588 = vst [vmem:[%s3729_s4 + $0x10] sm:$0xff] %v1584_v53 }
 0x187   :  { %1589 = vst [vmem:[%s3729_s4 + $0x30] sm:$0xff] %v1585_v34 }
 0x188   :  { %1590 = vst [vmem:[%s3729_s4 + $0x50] sm:$0xff] %v1586_v63 }
 0x189   :  { %1591 = vst [vmem:[%s3729_s4 + $0x70] sm:$0xff] %v1587_v0 }
 0x18a   :  { %1604 = vst [vmem:[%s3729_s4 + $0x18] sm:$0xff] %v1600_v48 }
 0x18b   :  { %1605 = vst [vmem:[%s3729_s4 + $0x38] sm:$0xff] %v1601_v6 }
 0x18c   :  { %1606 = vst [vmem:[%s3729_s4 + $0x58] sm:$0xff] %v1602_v7 }
 0x18d   :  { %1607 = vst [vmem:[%s3729_s4 + $0x78] sm:$0xff] %v1603_v54 }

// kernel: _lambda_.6
= control target key start
LH: loop header
LB: loop body
LE: loop exit
PB: predicated region body
PF: predicated region fallthrough
CT: control target
= control target key end

     0   :  { %s1374_s1 = inlined_call_operand.vmem [shape: bf16[384,128], index: 1, kind: input, shape index: {}]   ;;  %s1375_s0 = inlined_call_operand.vmem [shape: bf16[128,384], index: 0, kind: input, shape index: {}]   ;;  %s1376_s2 = inlined_call_operand.vmem [shape: f32[1,128], index: 2, kind: input, shape index: {}]   ;;  %s1377_s3 = inlined_call_operand.vmem [shape: f32[1,128], index: 3, kind: input, shape index: {}]   ;;  %s1378_s4 = inlined_call_operand.vmem [shape: f32[128,128], index: 4, kind: output, shape index: {}]  }
   0x1   :  { %v894_v0 = vld [vmem:[%s1374_s1 + $0x38] sm:$0xff]  ;;  %v893_v3 = vld [vmem:[%s1374_s1 + $0x30] sm:$0xff]  ;;  %v892_v6 = vld [vmem:[%s1374_s1 + $0x28] sm:$0xff] }
   0x2   :  { %v968_v1 = vld [vmem:[%s1374_s1 + $0x78] sm:$0xff]  ;;  %369 = vmatpush.bf16.msra.mxu0 %v894_v0  ;;  %911 = vmatpush.bf16.msra.mxu3 %v894_v0  ;;  %v983_v4 = vld [vmem:[%s1374_s1 + $0x70] sm:$0xff]  ;;  %v900_v7 = vld [vmem:[%s1374_s1 + $0x68] sm:$0xff] }
   0x3   :  { %v973_v2 = vld [vmem:[%s1374_s1 + $0xb8] sm:$0xff]  ;;  %418 = vmatpush.bf16.msra.mxu1 %v968_v1  ;;  %v988_v5 = vld [vmem:[%s1374_s1 + $0xb0] sm:$0xff]  ;;  %v1001_v8 = vld [vmem:[%s1374_s1 + $0xa8] sm:$0xff] }
   0x4   :  { %467 = vmatpush.bf16.msra.mxu2 %v973_v2  ;;  %v891_v9 = vld [vmem:[%s1374_s1 + $0x20] sm:$0xff]  ;;  %v890_v12 = vld [vmem:[%s1374_s1 + $0x18] sm:$0xff]  ;;  %v889_v15 = vld [vmem:[%s1374_s1 + $0x10] sm:$0xff] }
   0x5   :  { %v899_v10 = vld [vmem:[%s1374_s1 + $0x60] sm:$0xff]  ;;  %v898_v13 = vld [vmem:[%s1374_s1 + $0x58] sm:$0xff]  ;;  %v897_v16 = vld [vmem:[%s1374_s1 + $0x50] sm:$0xff] }
   0x6   :  { %370 = vmatpush.bf16.msra.mxu0 %v893_v3  ;;  %912 = vmatpush.bf16.msra.mxu3 %v893_v3  ;;  %v1013_v11 = vld [vmem:[%s1374_s1 + $0xa0] sm:$0xff]  ;;  %v1025_v14 = vld [vmem:[%s1374_s1 + $0x98] sm:$0xff]  ;;  %v1037_v17 = vld [vmem:[%s1374_s1 + $0x90] sm:$0xff] }
   0x7   :  { %419 = vmatpush.bf16.msra.mxu1 %v983_v4  ;;  %v888_v18 = vld [vmem:[%s1374_s1 + $0x8] sm:$0xff]  ;;  %v887_v21 = vld [vmem:[%s1374_s1] sm:$0xff]  ;;  %v745_v26 = vld [vmem:[%s1375_s0 + $0x90] sm:$0xf] }
   0x8   :  { %468 = vmatpush.bf16.msra.mxu2 %v988_v5  ;;  %v896_v19 = vld [vmem:[%s1374_s1 + $0x48] sm:$0xff]  ;;  %v895_v22 = vld [vmem:[%s1374_s1 + $0x40] sm:$0xff]  ;;  %v882_v27 = vld [vmem:[%s1375_s0 + $0x98] sm:$0xf0] }
   0x9   :  { %v1049_v20 = vld [vmem:[%s1374_s1 + $0x88] sm:$0xff]  ;;  %v1060_v23 = vld [vmem:[%s1374_s1 + $0x80] sm:$0xff]  ;;  %v675_v29 = vld [vmem:[%s1375_s0 + $0xc] sm:$0xf0]  ;;  %v746_v33 = vor.u32 %v882_v27, %v745_v26 }
   0xa   :  { %371 = vmatpush.bf16.msra.mxu0 %v892_v6  ;;  %913 = vmatpush.bf16.msra.mxu3 %v892_v6  ;;  %v673_v24 = vld [vmem:[%s1375_s0] sm:$0xf]  ;;  %v864_v25 = vld [vmem:[%s1375_s0 + $0x8] sm:$0xf0]  ;;  %v863_v28 = vld [vmem:[%s1375_s0 + $0x4] sm:$0xf] }
   0xb   :  { %420 = vmatpush.bf16.msra.mxu1 %v900_v7  ;;  %v681_v30 = vld [vmem:[%s1375_s0 + $0x8] sm:$0xf]  ;;  %v865_v31 = vld [vmem:[%s1375_s0 + $0x10] sm:$0xf0]  ;;  %v674_v32 = vor.u32 %v864_v25, %v673_v24  ;;  %v678_v34 = vor.u32 %v863_v28, %v675_v29  ;;  %v685_v36 = vld [vmem:[%s1375_s0 + $0x18] sm:$0xf] }
   0xc   :  { %469 = vmatpush.bf16.msra.mxu2 %v1001_v8  ;;  %v682_v35 = vor.u32 %v865_v31, %v681_v30  ;;  %v867_v37 = vld [vmem:[%s1375_s0 + $0x20] sm:$0xf0]  ;;  %v757_v38 = vld [vmem:[%s1375_s0 + $0xa8] sm:$0xf]  ;;  %v885_v39 = vld [vmem:[%s1375_s0 + $0xb0] sm:$0xf0] }
   0xd   :  { %v866_v40 = vld [vmem:[%s1375_s0 + $0x1c] sm:$0xf]  ;;  %v687_v41 = vld [vmem:[%s1375_s0 + $0x24] sm:$0xf0]  ;;  %v693_v42 = vld [vmem:[%s1375_s0 + $0x20] sm:$0xf]  ;;  %v686_v44 = vor.u32 %v867_v37, %v685_v36  ;;  %v758_v45 = vor.u32 %v885_v39, %v757_v38 }
   0xe   :  { %372 = vmatpush.bf16.msra.mxu0 %v891_v9  ;;  %914 = vmatpush.bf16.msra.mxu3 %v891_v9  ;;  %v868_v43 = vld [vmem:[%s1375_s0 + $0x28] sm:$0xf0]  ;;  %v690_v46 = vor.u32 %v866_v40, %v687_v41  ;;  %v697_v48 = vld [vmem:[%s1375_s0 + $0x30] sm:$0xf]  ;;  %v870_v49 = vld [vmem:[%s1375_s0 + $0x38] sm:$0xf0] }
   0xf   :  { %421 = vmatpush.bf16.msra.mxu1 %v899_v10  ;;  %v694_v47 = vor.u32 %v868_v43, %v693_v42  ;;  %v869_v50 = vld [vmem:[%s1375_s0 + $0x34] sm:$0xf]  ;;  %v747_v52 = vld [vmem:[%s1375_s0 + $0x9c] sm:$0xf0]  ;;  %v705_v54 = vld [vmem:[%s1375_s0 + $0x38] sm:$0xf]  ;;  %v698_v56 = vor.u32 %v870_v49, %v697_v48 }
  0x10   :  { %470 = vmatpush.bf16.msra.mxu2 %v1013_v11  ;;  %v881_v51 = vld [vmem:[%s1375_s0 + $0x94] sm:$0xf]  ;;  %v699_v53 = vld [vmem:[%s1375_s0 + $0x3c] sm:$0xf0]  ;;  %v871_v55 = vld [vmem:[%s1375_s0 + $0x40] sm:$0xf0] }
  0x11   :  { %v750_v57 = vor.u32 %v881_v51, %v747_v52  ;;  %v702_v58 = vor.u32 %v869_v50, %v699_v53  ;;  %v706_v59 = vor.u32 %v871_v55, %v705_v54  ;;  %v709_v60 = vld [vmem:[%s1375_s0 + $0x48] sm:$0xf]  ;;  %v873_v61 = vld [vmem:[%s1375_s0 + $0x50] sm:$0xf0]  ;;  %v872_v62 = vld [vmem:[%s1375_s0 + $0x4c] sm:$0xf] }
  0x12   :  { %373 = vmatpush.bf16.msra.mxu0 %v890_v12  ;;  %915 = vmatpush.bf16.msra.mxu3 %v890_v12  ;;  %v884_v63 = vld [vmem:[%s1375_s0 + $0xac] sm:$0xf]  ;;  %v759_v0 = vld [vmem:[%s1375_s0 + $0xb4] sm:$0xf0]  ;;  %v874_v3 = vld [vmem:[%s1375_s0 + $0x58] sm:$0xf0] }
  0x13   :  { %422 = vmatpush.bf16.msra.mxu1 %v898_v13  ;;  %v876_v9 = vld [vmem:[%s1375_s0 + $0x68] sm:$0xf0]  ;;  %v883_v12 = vld [vmem:[%s1375_s0 + $0xa0] sm:$0xf0]  ;;  %v886_v24 = vld [vmem:[%s1375_s0 + $0xb8] sm:$0xf0] }
  0x14   :  { %471 = vmatpush.bf16.msra.mxu2 %v1025_v14  ;;  %v735_v25 = vld [vmem:[%s1375_s0 + $0x84] sm:$0xf0]  ;;  %v741_v26 = vld [vmem:[%s1375_s0 + $0x80] sm:$0xf]  ;;  %v880_v27 = vld [vmem:[%s1375_s0 + $0x88] sm:$0xf0] }
  0x15   :  { %v742_v31 = vor.u32 %v880_v27, %v741_v26 }
  0x16   :  { %374 = vmatpush.bf16.msra.mxu0 %v889_v15  ;;  %916 = vmatpush.bf16.msra.mxu3 %v889_v15  ;;  %v877_v15 = vld [vmem:[%s1375_s0 + $0x70] sm:$0xf0] }
  0x17   :  { %423 = vmatpush.bf16.msra.mxu1 %v897_v16 }
  0x18   :  { %472 = vmatpush.bf16.msra.mxu2 %v1037_v17 }
  0x1a   :  { %375 = vmatpush.bf16.msra.mxu0 %v888_v18  ;;  %917 = vmatpush.bf16.msra.mxu3 %v888_v18 }
  0x1b   :  { %424 = vmatpush.bf16.msra.mxu1 %v896_v19 }
  0x1c   :  { %473 = vmatpush.bf16.msra.mxu2 %v1049_v20 }
  0x1e   :  { %376 = vmatpush.bf16.msra.mxu0 %v887_v21  ;;  %918 = vmatpush.bf16.msra.mxu3 %v887_v21  ;;  %v879_v21 = vld [vmem:[%s1375_s0 + $0x80] sm:$0xf0] }
  0x1f   :  { %425 = vmatpush.bf16.msra.mxu1 %v895_v22 }
  0x20   :  { %474 = vmatpush.bf16.msra.mxu2 %v1060_v23 }
  0x21   :  { %377 = vmatmul.bf16.vlgmr.msra.gmra.mxu0 %v674_v32  ;;  %407 = vmatmul.bf16.vlgmr.msra.gmra.mxu3 %v746_v33 }
  0x22   :  { %919 = vmatpush.bf16.msrb.mxu3 %v968_v1  ;;  %426 = vmatmul.bf16.vlgmr.msra.gmra.mxu1 %v678_v34  ;;  %v711_v1 = vld [vmem:[%s1375_s0 + $0x54] sm:$0xf0] }
  0x23   :  { %475 = vmatmul.bf16.vlgmr.msra.gmra.mxu2 %v682_v35  ;;  %v714_v6 = vor.u32 %v872_v62, %v711_v1 }
  0x26   :  { %920 = vmatpush.bf16.msrb.mxu3 %v983_v4  ;;  %v710_v4 = vor.u32 %v873_v61, %v709_v60 }
  0x2a   :  { %921 = vmatpush.bf16.msrb.mxu3 %v900_v7 }
  0x2e   :  { %922 = vmatpush.bf16.msrb.mxu3 %v899_v10  ;;  %v875_v10 = vld [vmem:[%s1375_s0 + $0x64] sm:$0xf] }
  0x31   :  { %382 = vmatmul.bf16.gmra.mxu0 %v686_v44  ;;  %412 = vmatmul.bf16.gmra.mxu3 %v758_v45 }
  0x32   :  { %923 = vmatpush.bf16.msrb.mxu3 %v898_v13  ;;  %431 = vmatmul.bf16.gmra.mxu1 %v690_v46  ;;  %v723_v13 = vld [vmem:[%s1375_s0 + $0x6c] sm:$0xf0] }
  0x33   :  { %480 = vmatmul.bf16.gmra.mxu2 %v694_v47  ;;  %v726_v18 = vor.u32 %v875_v10, %v723_v13 }
  0x36   :  { %924 = vmatpush.bf16.msrb.mxu3 %v897_v16 }
  0x3a   :  { %925 = vmatpush.bf16.msrb.mxu3 %v896_v19 }
  0x3e   :  { %926 = vmatpush.bf16.msrb.mxu3 %v895_v22  ;;  %v878_v22 = vld [vmem:[%s1375_s0 + $0x7c] sm:$0xf] }
  0x3f   :  { %v738_v30 = vor.u32 %v878_v22, %v735_v25 }
  0x41   :  { %387 = vmatmul.bf16.gmra.mxu0 %v698_v56  ;;  %456 = vmatmul.bf16.vlgmr.msrb.gmra.mxu3 %v750_v57 }
  0x42   :  { %927 = vmatpush.bf16.msra.mxu3 %v973_v2  ;;  %436 = vmatmul.bf16.gmra.mxu1 %v702_v58  ;;  %v717_v2 = vld [vmem:[%s1375_s0 + $0x50] sm:$0xf] }
  0x43   :  { %485 = vmatmul.bf16.gmra.mxu2 %v706_v59  ;;  %v718_v7 = vor.u32 %v874_v3, %v717_v2 }
  0x46   :  { %928 = vmatpush.bf16.msra.mxu3 %v988_v5  ;;  %v762_v5 = vor.u32 %v884_v63, %v759_v0 }
  0x4a   :  { %929 = vmatpush.bf16.msra.mxu3 %v1001_v8  ;;  %v721_v8 = vld [vmem:[%s1375_s0 + $0x60] sm:$0xf] }
  0x4b   :  { %v722_v16 = vor.u32 %v876_v9, %v721_v8 }
  0x4e   :  { %930 = vmatpush.bf16.msra.mxu3 %v1013_v11  ;;  %v753_v11 = vld [vmem:[%s1375_s0 + $0x98] sm:$0xf] }
  0x51   :  { %392 = vmatmul.bf16.gmra.mxu0 %v710_v4  ;;  %461 = vmatmul.bf16.gmra.mxu3 %v762_v5 }
  0x52   :  { %931 = vmatpush.bf16.msra.mxu3 %v1025_v14  ;;  %441 = vmatmul.bf16.gmra.mxu1 %v714_v6  ;;  %v729_v14 = vld [vmem:[%s1375_s0 + $0x68] sm:$0xf] }
  0x53   :  { %490 = vmatmul.bf16.gmra.mxu2 %v718_v7  ;;  %v730_v19 = vor.u32 %v877_v15, %v729_v14 }
  0x56   :  { %932 = vmatpush.bf16.msra.mxu3 %v1037_v17  ;;  %v754_v17 = vor.u32 %v883_v12, %v753_v11 }
  0x5a   :  { %933 = vmatpush.bf16.msra.mxu3 %v1049_v20  ;;  %v733_v20 = vld [vmem:[%s1375_s0 + $0x78] sm:$0xf] }
  0x5b   :  { %v734_v28 = vor.u32 %v879_v21, %v733_v20 }
  0x5e   :  { %934 = vmatpush.bf16.msra.mxu3 %v1060_v23  ;;  %v765_v23 = vld [vmem:[%s1375_s0 + $0xb0] sm:$0xf] }
  0x5f   :  { %v766_v29 = vor.u32 %v886_v24, %v765_v23 }
  0x61   :  { %397 = vmatmul.bf16.gmra.mxu0 %v722_v16  ;;  %505 = vmatmul.bf16.vlgmr.msra.gmra.mxu3 %v754_v17 }
  0x62   :  { %446 = vmatmul.bf16.gmra.mxu1 %v726_v18 }
  0x63   :  { %495 = vmatmul.bf16.gmra.mxu2 %v730_v19 }
  0x71   :  { %402 = vmatmul.bf16.gmra.mxu0 %v734_v28  ;;  %510 = vmatmul.bf16.gmra.mxu3 %v766_v29 }
  0x72   :  { %451 = vmatmul.bf16.gmra.mxu1 %v738_v30 }
  0x73   :  { %500 = vmatmul.bf16.gmra.mxu2 %v742_v31 }
  0x9e   :  { %v378_v32 = vpop.f32.mrf.mxu0 }
  0x9f   :  { %v427_v33 = vpop.f32.mrf.mxu1 }
  0xa0   :  { %v428_v34 = vadd.f32 %v427_v33, %v378_v32 }
  0xa4   :  { %v1218_v35 = vpop.f32.mrf.mxu3 }
  0xa6   :  { %v476_v36 = vpop.f32.mrf.mxu2  ;;  %v380_v38 = vpop.f32.mrf.mxu0 }
  0xa7   :  { %v1220_v37 = vadd.f32 %v476_v36, %v428_v34  ;;  %v429_v39 = vpop.f32.mrf.mxu1 }
  0xa8   :  { %v430_v4 = vadd.f32 %v429_v39, %v380_v38 }
  0xa9   :  { %v538_v16 = vmul.f32 %v1220_v37, %v1220_v37 }
  0xac   :  { %v1222_v40 = vpop.f32.mrf.mxu3 }
  0xae   :  { %v478_v41 = vpop.f32.mrf.mxu2  ;;  %v383_v42 = vpop.f32.mrf.mxu0 }
  0xaf   :  { %v432_v43 = vpop.f32.mrf.mxu1  ;;  %v1236_v7 = vadd.f32 %v478_v41, %v430_v4 }
  0xb0   :  { %v433_v5 = vadd.f32 %v432_v43, %v383_v42 }
  0xb1   :  { %v539_v14 = vmul.f32 %v1236_v7, %v1236_v7  ;;  %v516_v17 = vadd.f32 %v1236_v7, %v1220_v37 }
  0xb3   :  { %v554_v22 = vadd.f32 %v539_v14, %v538_v16 }
  0xb4   :  { %v1224_v44 = vpop.f32.mrf.mxu3 }
  0xb6   :  { %v481_v45 = vpop.f32.mrf.mxu2  ;;  %v385_v46 = vpop.f32.mrf.mxu0 }
  0xb7   :  { %v434_v47 = vpop.f32.mrf.mxu1  ;;  %v1238_v10 = vadd.f32 %v481_v45, %v433_v5 }
  0xb8   :  { %v435_v11 = vadd.f32 %v434_v47, %v385_v46 }
  0xb9   :  { %v540_v18 = vmul.f32 %v1238_v10, %v1238_v10  ;;  %v517_v23 = vadd.f32 %v516_v17, %v1238_v10 }
  0xbb   :  { %v555_v28 = vadd.f32 %v554_v22, %v540_v18 }
  0xbc   :  { %v1226_v48 = vpop.f32.mrf.mxu3 }
  0xbe   :  { %v483_v49 = vpop.f32.mrf.mxu2  ;;  %v388_v50 = vpop.f32.mrf.mxu0 }
  0xbf   :  { %v437_v51 = vpop.f32.mrf.mxu1  ;;  %v1242_v15 = vadd.f32 %v483_v49, %v435_v11 }
  0xc0   :  { %v438_v12 = vadd.f32 %v437_v51, %v388_v50 }
  0xc1   :  { %v541_v24 = vmul.f32 %v1242_v15, %v1242_v15  ;;  %v518_v29 = vadd.f32 %v517_v23, %v1242_v15 }
  0xc3   :  { %v556_v38 = vadd.f32 %v555_v28, %v541_v24 }
  0xc4   :  { %v1228_v52 = vpop.f32.mrf.mxu3 }
  0xc6   :  { %v486_v53 = vpop.f32.mrf.mxu2  ;;  %v390_v54 = vpop.f32.mrf.mxu0 }
  0xc7   :  { %v439_v55 = vpop.f32.mrf.mxu1  ;;  %v1250_v19 = vadd.f32 %v486_v53, %v438_v12 }
  0xc8   :  { %v440_v20 = vadd.f32 %v439_v55, %v390_v54 }
  0xc9   :  { %v542_v30 = vmul.f32 %v1250_v19, %v1250_v19  ;;  %v519_v39 = vadd.f32 %v518_v29, %v1250_v19 }
  0xcb   :  { %v557_v43 = vadd.f32 %v556_v38, %v542_v30 }
  0xcc   :  { %v1230_v56 = vpop.f32.mrf.mxu3 }
  0xcd   :  { %v460_v14 = vadd.f32 %v1230_v56, %v1222_v40 }
  0xce   :  { %v488_v57 = vpop.f32.mrf.mxu2  ;;  %v393_v58 = vpop.f32.mrf.mxu0 }
  0xcf   :  { %v442_v59 = vpop.f32.mrf.mxu1  ;;  %v1255_v27 = vadd.f32 %v488_v57, %v440_v20 }
  0xd0   :  { %v443_v21 = vadd.f32 %v442_v59, %v393_v58 }
  0xd1   :  { %v543_v41 = vmul.f32 %v1255_v27, %v1255_v27  ;;  %v520_v45 = vadd.f32 %v519_v39, %v1255_v27 }
  0xd3   :  { %v558_v53 = vadd.f32 %v557_v43, %v543_v41 }
  0xd4   :  { %v1232_v60 = vpop.f32.mrf.mxu3 }
  0xd6   :  { %v491_v61 = vpop.f32.mrf.mxu2  ;;  %v395_v62 = vpop.f32.mrf.mxu0 }
  0xd7   :  { %v444_v63 = vpop.f32.mrf.mxu1  ;;  %v1260_v33 = vadd.f32 %v491_v61, %v443_v21 }
  0xd8   :  { %v445_v34 = vadd.f32 %v444_v63, %v395_v62 }
  0xd9   :  { %v544_v46 = vmul.f32 %v1260_v33, %v1260_v33  ;;  %v521_v54 = vadd.f32 %v520_v45, %v1260_v33 }
  0xdb   :  { %v559_v59 = vadd.f32 %v558_v53, %v544_v46 }
  0xdc   :  { %v1234_v0 = vpop.f32.mrf.mxu3 }
  0xde   :  { %v493_v1 = vpop.f32.mrf.mxu2  ;;  %v398_v2 = vpop.f32.mrf.mxu0 }
  0xdf   :  { %v447_v3 = vpop.f32.mrf.mxu1  ;;  %v1265_v42 = vadd.f32 %v493_v1, %v445_v34 }
  0xe0   :  { %v448_v36 = vadd.f32 %v447_v3, %v398_v2 }
  0xe1   :  { %v545_v55 = vmul.f32 %v1265_v42, %v1265_v42  ;;  %v522_v61 = vadd.f32 %v521_v54, %v1265_v42 }
  0xe3   :  { %v560_v3 = vadd.f32 %v559_v59, %v545_v55 }
  0xe4   :  { %v506_v6 = vpop.f32.mrf.mxu3 }
  0xe6   :  { %v496_v8 = vpop.f32.mrf.mxu2  ;;  %v400_v9 = vpop.f32.mrf.mxu0 }
  0xe7   :  { %v449_v13 = vpop.f32.mrf.mxu1  ;;  %v1270_v47 = vadd.f32 %v496_v8, %v448_v36  ;;  %v458_v8 = vadd.f32 %v1228_v52, %v1218_v35  ;;  %v463_v35 = vadd.f32 %v1232_v60, %v1224_v44 }
  0xe8   :  { %v450_v49 = vadd.f32 %v449_v13, %v400_v9 }
  0xe9   :  { %v546_v62 = vmul.f32 %v1270_v47, %v1270_v47  ;;  %v523_v4 = vadd.f32 %v522_v61, %v1270_v47  ;;  %v1292_v17 = vadd.f32 %v506_v6, %v458_v8 }
  0xeb   :  { %v561_v9 = vadd.f32 %v560_v3, %v546_v62  ;;  %v550_v40 = vmul.f32 %v1292_v17, %v1292_v17 }
  0xec   :  { %v508_v26 = vpop.f32.mrf.mxu3 }
  0xed   :  { %v1297_v52 = vadd.f32 %v508_v26, %v460_v14 }
  0xee   :  { %v498_v25 = vpop.f32.mrf.mxu2  ;;  %v403_v31 = vpop.f32.mrf.mxu0 }
  0xef   :  { %v452_v32 = vpop.f32.mrf.mxu1  ;;  %v1275_v57 = vadd.f32 %v498_v25, %v450_v49  ;;  %v465_v25 = vadd.f32 %v1234_v0, %v1226_v48  ;;  %v551_v30 = vmul.f32 %v1297_v52, %v1297_v52 }
  0xf0   :  { %v453_v50 = vadd.f32 %v452_v32, %v403_v31 }
  0xf1   :  { %v547_v5 = vmul.f32 %v1275_v57, %v1275_v57  ;;  %v524_v11 = vadd.f32 %v523_v4, %v1275_v57 }
  0xf3   :  { %v562_v18 = vadd.f32 %v561_v9, %v547_v5 }
  0xf4   :  { %v511_v58 = vpop.f32.mrf.mxu3 }
  0xf5   :  { %v512_v56 = vadd.f32 %v511_v58, %v463_v35 }
  0xf6   :  { %v501_v51 = vpop.f32.mrf.mxu2  ;;  %v405_v1 = vpop.f32.mrf.mxu0 }
  0xf7   :  { %v1280_v63 = vadd.f32 %v501_v51, %v453_v50  ;;  %v454_v2 = vpop.f32.mrf.mxu1  ;;  %v552_v31 = vmul.f32 %v512_v56, %v512_v56 }
  0xf8   :  { %v455_v13 = vadd.f32 %v454_v2, %v405_v1 }
  0xf9   :  { %v548_v12 = vmul.f32 %v1280_v63, %v1280_v63  ;;  %v525_v20 = vadd.f32 %v524_v11, %v1280_v63 }
  0xfb   :  { %v563_v22 = vadd.f32 %v562_v18, %v548_v12  ;;  %v581_v12 = vld [vmem:[%s1376_s2] sm:$0x1] }
  0xfc   :  { %v513_v28 = vpop.f32.mrf.mxu3  ;;  %v594_v18 = vld [vmem:[%s1377_s3] sm:$0x1] }
  0xfd   :  { %v514_v60 = vadd.f32 %v513_v28, %v465_v25 }
  0xfe   :  { %v503_v16 = vpop.f32.mrf.mxu2 }
  0xff   :  { %v504_v21 = vadd.f32 %v503_v16, %v455_v13  ;;  %v553_v48 = vmul.f32 %v514_v60, %v514_v60 }
 0x101   :  { %v526_v23 = vadd.f32 %v525_v20, %v504_v21  ;;  %v549_v24 = vmul.f32 %v504_v21, %v504_v21 }
 0x103   :  { %v527_v6 = vadd.f32 %v526_v23, %v1292_v17  ;;  %v564_v29 = vadd.f32 %v563_v22, %v549_v24 }
 0x105   :  { %v565_v44 = vadd.f32 %v564_v29, %v550_v40  ;;  %v528_v26 = vadd.f32 %v527_v6, %v1297_v52 }
 0x107   :  { %v529_v32 = vadd.f32 %v528_v26, %v512_v56  ;;  %v566_v34 = vadd.f32 %v565_v44, %v551_v30 }
 0x109   :  { %v530_v36 = vadd.f32 %v529_v32, %v514_v60  ;;  %v567_v0 = vadd.f32 %v566_v34, %v552_v31 }
 0x10b   :  { %v531_v38 = vrot.slane %v530_v36, 4  ;;  %v568_v39 = vadd.f32 %v567_v0, %v553_v48 }
 0x10d   :  { %v532_v41 = vadd.f32 %v531_v38, %v530_v36  ;;  %v569_v43 = vrot.slane %v568_v39, 4 }
 0x10f   :  { %v533_v45 = vrot.slane %v532_v41, 2  ;;  %v570_v46 = vadd.f32 %v569_v43, %v568_v39 }
 0x111   :  { %v534_v49 = vadd.f32 %v533_v45, %v532_v41  ;;  %v571_v50 = vrot.slane %v570_v46, 2 }
 0x113   :  { %v535_v51 = vrot.slane %v534_v49, 1  ;;  %v572_v53 = vadd.f32 %v571_v50, %v570_v46 }
 0x115   :  { %v536_v54 = vadd.f32 %v535_v51, %v534_v49  ;;  %v573_v55 = vrot.slane %v572_v53, 1 }
 0x117   :  { %v574_v58 = vadd.f32 %v573_v55, %v572_v53  ;;  %v576_v59 = vmul.f32 0.0078125, %v536_v54 }
 0x119   :  { %v577_v61 = vmul.f32 0.0078125, %v574_v58  ;;  %v578_v62 = vmul.f32 %v576_v59, %v576_v59 }
 0x11b   :  { %v579_v1 = vsub.f32 %v577_v61, %v578_v62 }
 0x11d   :  { %v580_v2 = vmax.f32 %v579_v1, 0.0 }
 0x11f   :  { %v582_v3 = vadd.f32 1e-05, %v580_v2 }
 0x121   :  { %935 = vrsqrt.f32 %v582_v3  ;;  %vm589_vm1 = vweird.f32 %v582_v3 }
 0x127   :  { %v936_v4 = vpop.eup %935 }
 0x128   :  { %v584_v5 = vmul.f32 %v936_v4, %v582_v3  ;;  %vm590_vm0 = vweird.f32 %v936_v4 }
 0x129   :  { %vm591_vm2 = vmor %vm589_vm1, %vm590_vm0 }
 0x12a   :  { %v585_v8 = vmul.f32 %v936_v4, %v584_v5 }
 0x12c   :  { %v586_v9 = vmul.f32 0.5, %v585_v8 }
 0x12e   :  { %v587_v11 = vsub.f32 1.5, %v586_v9 }
 0x130   :  { %v588_v13 = vmul.f32 %v936_v4, %v587_v11 }
 0x132   :  { %v592_v14 = vsel %vm591_vm2, %v936_v4, %v588_v13 }
 0x133   :  { %v593_v16 = vmul.f32 %v592_v14, %v581_v12 }
 0x135   :  { %v595_v20 = vmul.f32 %v593_v16, %v576_v59  ;;  %v598_v35 = vperm.slane %v593_v16, 0 }
 0x137   :  { %v596_v22 = vsub.f32 %v594_v18, %v595_v20  ;;  %v610_v23 = vmul.f32 %v598_v35, %v1280_v63  ;;  %v600_v24 = vmul.f32 %v598_v35, %v1220_v37  ;;  %v611_v25 = vmul.f32 %v598_v35, %v504_v21 }
 0x138   :  { %v614_v28 = vmul.f32 %v598_v35, %v512_v56  ;;  %v601_v40 = vmul.f32 %v598_v35, %v1236_v7  ;;  %v602_v6 = vmul.f32 %v598_v35, %v1238_v10  ;;  %v615_v29 = vmul.f32 %v598_v35, %v514_v60 }
 0x139   :  { %v617_v30 = vperm.slane %v596_v22, 0  ;;  %v603_v44 = vmul.f32 %v598_v35, %v1242_v15  ;;  %v604_v26 = vmul.f32 %v598_v35, %v1250_v19  ;;  %v605_v36 = vmul.f32 %v598_v35, %v1255_v27 }
 0x13a   :  { %v606_v63 = vmul.f32 %v598_v35, %v1260_v33  ;;  %v607_v21 = vmul.f32 %v598_v35, %v1265_v42  ;;  %v608_v10 = vmul.f32 %v598_v35, %v1270_v47  ;;  %v609_v43 = vmul.f32 %v598_v35, %v1275_v57 }
 0x13b   :  { %v619_v31 = vadd.f32 %v617_v30, %v600_v24  ;;  %v620_v32 = vadd.f32 %v617_v30, %v601_v40  ;;  %v621_v34 = vadd.f32 %v617_v30, %v602_v6  ;;  %v622_v37 = vadd.f32 %v617_v30, %v603_v44 }
 0x13c   :  { %v623_v56 = vadd.f32 %v617_v30, %v604_v26  ;;  %v629_v7 = vadd.f32 %v617_v30, %v610_v23  ;;  %v630_v48 = vadd.f32 %v617_v30, %v611_v25  ;;  %v624_v60 = vadd.f32 %v617_v30, %v605_v36 }
 0x13d   :  { %v633_v0 = vadd.f32 %v617_v30, %v614_v28  ;;  %v634_v15 = vadd.f32 %v617_v30, %v615_v29  ;;  %v625_v38 = vadd.f32 %v617_v30, %v606_v63  ;;  %v635_v19 = vmax.f32 %v619_v31, 0.0 }
 0x13e   :  { %v636_v39 = vmax.f32 %v620_v32, 0.0  ;;  %v637_v41 = vmax.f32 %v621_v34, 0.0  ;;  %v626_v27 = vadd.f32 %v617_v30, %v607_v21  ;;  %v638_v45 = vmax.f32 %v622_v37, 0.0 }
 0x13f   :  { %v627_v33 = vadd.f32 %v617_v30, %v608_v10  ;;  %v639_v46 = vmax.f32 %v623_v56, 0.0  ;;  %651 = vst [vmem:[%s1378_s4] sm:$0xff] %v635_v19  ;;  %v628_v42 = vadd.f32 %v617_v30, %v609_v43  ;;  %v640_v49 = vmax.f32 %v624_v60, 0.0 }
 0x140   :  { %652 = vst [vmem:[%s1378_s4 + $0x8] sm:$0xff] %v636_v39  ;;  %v612_v47 = vmul.f32 %v598_v35, %v1292_v17  ;;  %v641_v50 = vmax.f32 %v625_v38, 0.0  ;;  %v613_v57 = vmul.f32 %v598_v35, %v1297_v52  ;;  %v642_v51 = vmax.f32 %v626_v27, 0.0 }
 0x141   :  { %653 = vst [vmem:[%s1378_s4 + $0x10] sm:$0xff] %v637_v41  ;;  %v643_v54 = vmax.f32 %v627_v33, 0.0  ;;  %v644_v17 = vmax.f32 %v628_v42, 0.0  ;;  %v645_v58 = vmax.f32 %v629_v7, 0.0  ;;  %v646_v52 = vmax.f32 %v630_v48, 0.0 }
 0x142   :  { %654 = vst [vmem:[%s1378_s4 + $0x18] sm:$0xff] %v638_v45  ;;  %v631_v53 = vadd.f32 %v617_v30, %v612_v47  ;;  %v632_v55 = vadd.f32 %v617_v30, %v613_v57  ;;  %v649_v62 = vmax.f32 %v633_v0, 0.0  ;;  %v650_v1 = vmax.f32 %v634_v15, 0.0 }
 0x143   :  { %655 = vst [vmem:[%s1378_s4 + $0x20] sm:$0xff] %v639_v46 }
 0x144   :  { %656 = vst [vmem:[%s1378_s4 + $0x28] sm:$0xff] %v640_v49  ;;  %v647_v59 = vmax.f32 %v631_v53, 0.0  ;;  %v648_v61 = vmax.f32 %v632_v55, 0.0 }
 0x145   :  { %657 = vst [vmem:[%s1378_s4 + $0x30] sm:$0xff] %v641_v50 }
 0x146   :  { %658 = vst [vmem:[%s1378_s4 + $0x38] sm:$0xff] %v642_v51 }
 0x147   :  { %659 = vst [vmem:[%s1378_s4 + $0x40] sm:$0xff] %v643_v54 }
 0x148   :  { %660 = vst [vmem:[%s1378_s4 + $0x48] sm:$0xff] %v644_v17 }
 0x149   :  { %661 = vst [vmem:[%s1378_s4 + $0x50] sm:$0xff] %v645_v58 }
 0x14a   :  { %662 = vst [vmem:[%s1378_s4 + $0x58] sm:$0xff] %v646_v52 }
 0x14b   :  { %663 = vst [vmem:[%s1378_s4 + $0x60] sm:$0xff] %v647_v59 }
 0x14c   :  { %664 = vst [vmem:[%s1378_s4 + $0x68] sm:$0xff] %v648_v61 }
 0x14d   :  { %665 = vst [vmem:[%s1378_s4 + $0x70] sm:$0xff] %v649_v62 }
 0x14e   :  { %666 = vst [vmem:[%s1378_s4 + $0x78] sm:$0xff] %v650_v1 }

// kernel: _lambda_.7
= control target key start
LH: loop header
LB: loop body
LE: loop exit
PB: predicated region body
PF: predicated region fallthrough
CT: control target
= control target key end

     0   :  { %s3234_s1 = inlined_call_operand.vmem [shape: bf16[384,512], index: 1, kind: input, shape index: {}]   ;;  %s3235_s0 = inlined_call_operand.vmem [shape: bf16[128,384], index: 0, kind: input, shape index: {}]   ;;  %s3236_s2 = inlined_call_operand.vmem [shape: f32[128,512], index: 2, kind: output, shape index: {}]  }
   0x1   :  { %v1677_v0 = vld [vmem:[%s3234_s1 + $0xe0] sm:$0xf]  ;;  %v2001_v1 = vld [vmem:[%s3234_s1 + $0xec] sm:$0xf0]  ;;  %v1999_v9 = vld [vmem:[%s3234_s1 + $0xe4] sm:$0xf] }
   0x2   :  { %v1805_v2 = vld [vmem:[%s3234_s1 + $0x1e0] sm:$0xf]  ;;  %v1678_v3 = vor.u32 %v2001_v1, %v1677_v0  ;;  %v2033_v4 = vld [vmem:[%s3234_s1 + $0x1ec] sm:$0xf0]  ;;  %v1679_v10 = vld [vmem:[%s3234_s1 + $0xf0] sm:$0xf0] }
   0x3   :  { %v1933_v5 = vld [vmem:[%s3234_s1 + $0x2e0] sm:$0xf]  ;;  %v2065_v6 = vld [vmem:[%s3234_s1 + $0x2ec] sm:$0xf0]  ;;  %v1806_v7 = vor.u32 %v2033_v4, %v1805_v2  ;;  %v1682_v12 = vor.u32 %v1999_v9, %v1679_v10  ;;  %v1995_v20 = vld [vmem:[%s3234_s1 + $0xc4] sm:$0xf] }
   0x4   :  { %v1934_v8 = vor.u32 %v2065_v6, %v1933_v5  ;;  %v1661_v11 = vld [vmem:[%s3234_s1 + $0xc0] sm:$0xf]  ;;  %747 = vmatpush.bf16.msra.mxu0 %v1678_v3  ;;  %v1997_v13 = vld [vmem:[%s3234_s1 + $0xcc] sm:$0xf0]  ;;  %v1663_v22 = vld [vmem:[%s3234_s1 + $0xd0] sm:$0xf0] }
   0x5   :  { %v1789_v14 = vld [vmem:[%s3234_s1 + $0x1c0] sm:$0xf]  ;;  %v2029_v15 = vld [vmem:[%s3234_s1 + $0x1cc] sm:$0xf0]  ;;  %796 = vmatpush.bf16.msra.mxu1 %v1806_v7  ;;  %v1662_v16 = vor.u32 %v1997_v13, %v1661_v11  ;;  %894 = vmatpush.bf16.msra.mxu3 %v1682_v12  ;;  %v1666_v25 = vor.u32 %v1995_v20, %v1663_v22  ;;  %v1991_v31 = vld [vmem:[%s3234_s1 + $0xa4] sm:$0xf] }
   0x6   :  { %845 = vmatpush.bf16.msra.mxu2 %v1934_v8  ;;  %v1790_v17 = vor.u32 %v2029_v15, %v1789_v14  ;;  %v1917_v18 = vld [vmem:[%s3234_s1 + $0x2c0] sm:$0xf]  ;;  %v2061_v19 = vld [vmem:[%s3234_s1 + $0x2cc] sm:$0xf0]  ;;  %v1647_v32 = vld [vmem:[%s3234_s1 + $0xb0] sm:$0xf0] }
   0x7   :  { %v1918_v21 = vor.u32 %v2061_v19, %v1917_v18  ;;  %v1645_v23 = vld [vmem:[%s3234_s1 + $0xa0] sm:$0xf]  ;;  %v1993_v24 = vld [vmem:[%s3234_s1 + $0xac] sm:$0xf0]  ;;  %v1650_v38 = vor.u32 %v1991_v31, %v1647_v32  ;;  %v1987_v42 = vld [vmem:[%s3234_s1 + $0x84] sm:$0xf] }
   0x8   :  { %v1773_v26 = vld [vmem:[%s3234_s1 + $0x1a0] sm:$0xf]  ;;  %v2025_v27 = vld [vmem:[%s3234_s1 + $0x1ac] sm:$0xf0]  ;;  %748 = vmatpush.bf16.msra.mxu0 %v1662_v16  ;;  %v1646_v29 = vor.u32 %v1993_v24, %v1645_v23  ;;  %v1631_v43 = vld [vmem:[%s3234_s1 + $0x90] sm:$0xf0] }
   0x9   :  { %v1901_v28 = vld [vmem:[%s3234_s1 + $0x2a0] sm:$0xf]  ;;  %v2057_v30 = vld [vmem:[%s3234_s1 + $0x2ac] sm:$0xf0]  ;;  %797 = vmatpush.bf16.msra.mxu1 %v1790_v17  ;;  %v1774_v33 = vor.u32 %v2025_v27, %v1773_v26  ;;  %895 = vmatpush.bf16.msra.mxu3 %v1666_v25  ;;  %v1634_v50 = vor.u32 %v1987_v42, %v1631_v43  ;;  %v1983_v54 = vld [vmem:[%s3234_s1 + $0x64] sm:$0xf] }
   0xa   :  { %846 = vmatpush.bf16.msra.mxu2 %v1918_v21  ;;  %v1902_v34 = vor.u32 %v2057_v30, %v1901_v28  ;;  %v1629_v35 = vld [vmem:[%s3234_s1 + $0x80] sm:$0xf]  ;;  %v1989_v36 = vld [vmem:[%s3234_s1 + $0x8c] sm:$0xf0]  ;;  %v1615_v55 = vld [vmem:[%s3234_s1 + $0x70] sm:$0xf0] }
   0xb   :  { %v1757_v37 = vld [vmem:[%s3234_s1 + $0x180] sm:$0xf]  ;;  %v2021_v39 = vld [vmem:[%s3234_s1 + $0x18c] sm:$0xf0]  ;;  %v1630_v44 = vor.u32 %v1989_v36, %v1629_v35  ;;  %v1618_v62 = vor.u32 %v1983_v54, %v1615_v55  ;;  %v1979_v2 = vld [vmem:[%s3234_s1 + $0x44] sm:$0xf] }
   0xc   :  { %v1885_v40 = vld [vmem:[%s3234_s1 + $0x280] sm:$0xf]  ;;  %v2053_v41 = vld [vmem:[%s3234_s1 + $0x28c] sm:$0xf0]  ;;  %749 = vmatpush.bf16.msra.mxu0 %v1646_v29  ;;  %v1758_v45 = vor.u32 %v2021_v39, %v1757_v37  ;;  %v1599_v3 = vld [vmem:[%s3234_s1 + $0x50] sm:$0xf0] }
   0xd   :  { %798 = vmatpush.bf16.msra.mxu1 %v1774_v33  ;;  %v1886_v46 = vor.u32 %v2053_v41, %v1885_v40  ;;  %v1613_v47 = vld [vmem:[%s3234_s1 + $0x60] sm:$0xf]  ;;  %v1985_v48 = vld [vmem:[%s3234_s1 + $0x6c] sm:$0xf0]  ;;  %896 = vmatpush.bf16.msra.mxu3 %v1650_v38  ;;  %v1602_v10 = vor.u32 %v1979_v2, %v1599_v3  ;;  %v1975_v14 = vld [vmem:[%s3234_s1 + $0x24] sm:$0xf] }
   0xe   :  { %847 = vmatpush.bf16.msra.mxu2 %v1902_v34  ;;  %v1741_v49 = vld [vmem:[%s3234_s1 + $0x160] sm:$0xf]  ;;  %v2017_v51 = vld [vmem:[%s3234_s1 + $0x16c] sm:$0xf0]  ;;  %v1614_v56 = vor.u32 %v1985_v48, %v1613_v47  ;;  %v1583_v15 = vld [vmem:[%s3234_s1 + $0x30] sm:$0xf0] }
   0xf   :  { %v1869_v52 = vld [vmem:[%s3234_s1 + $0x260] sm:$0xf]  ;;  %v2049_v53 = vld [vmem:[%s3234_s1 + $0x26c] sm:$0xf0]  ;;  %v1742_v57 = vor.u32 %v2017_v51, %v1741_v49  ;;  %v1586_v25 = vor.u32 %v1975_v14, %v1583_v15  ;;  %v1971_v26 = vld [vmem:[%s3234_s1 + $0x4] sm:$0xf] }
  0x10   :  { %750 = vmatpush.bf16.msra.mxu0 %v1630_v44  ;;  %v1870_v58 = vor.u32 %v2049_v53, %v1869_v52  ;;  %v1597_v59 = vld [vmem:[%s3234_s1 + $0x40] sm:$0xf]  ;;  %v1981_v60 = vld [vmem:[%s3234_s1 + $0x4c] sm:$0xf0]  ;;  %v1567_v27 = vld [vmem:[%s3234_s1 + $0x10] sm:$0xf0] }
  0x11   :  { %799 = vmatpush.bf16.msra.mxu1 %v1758_v45  ;;  %v1725_v61 = vld [vmem:[%s3234_s1 + $0x140] sm:$0xf]  ;;  %897 = vmatpush.bf16.msra.mxu3 %v1634_v50  ;;  %v2013_v63 = vld [vmem:[%s3234_s1 + $0x14c] sm:$0xf0]  ;;  %v1598_v4 = vor.u32 %v1981_v60, %v1597_v59  ;;  %v1948_v29 = vld [vmem:[%s3235_s0 + $0x8] sm:$0xf0]  ;;  %v1570_v41 = vor.u32 %v1971_v26, %v1567_v27 }
  0x12   :  { %848 = vmatpush.bf16.msra.mxu2 %v1886_v46  ;;  %v1853_v0 = vld [vmem:[%s3234_s1 + $0x240] sm:$0xf]  ;;  %v2045_v1 = vld [vmem:[%s3234_s1 + $0x24c] sm:$0xf0]  ;;  %v1726_v5 = vor.u32 %v2013_v63, %v1725_v61  ;;  %v1685_v30 = vld [vmem:[%s3234_s1 + $0xe8] sm:$0xf] }
  0x13   :  { %v1854_v6 = vor.u32 %v2045_v1, %v1853_v0  ;;  %v1581_v7 = vld [vmem:[%s3234_s1 + $0x20] sm:$0xf]  ;;  %v1977_v8 = vld [vmem:[%s3234_s1 + $0x2c] sm:$0xf0]  ;;  %v2002_v31 = vld [vmem:[%s3234_s1 + $0xf4] sm:$0xf0] }
  0x14   :  { %751 = vmatpush.bf16.msra.mxu0 %v1614_v56  ;;  %v1709_v9 = vld [vmem:[%s3234_s1 + $0x120] sm:$0xf]  ;;  %v2009_v11 = vld [vmem:[%s3234_s1 + $0x12c] sm:$0xf0]  ;;  %v1582_v16 = vor.u32 %v1977_v8, %v1581_v7  ;;  %v1947_v33 = vld [vmem:[%s3235_s0 + $0x4] sm:$0xf]  ;;  %v1686_v42 = vor.u32 %v2002_v31, %v1685_v30 }
  0x15   :  { %800 = vmatpush.bf16.msra.mxu1 %v1742_v57  ;;  %898 = vmatpush.bf16.msra.mxu3 %v1618_v62  ;;  %v1837_v12 = vld [vmem:[%s3234_s1 + $0x220] sm:$0xf]  ;;  %v2041_v13 = vld [vmem:[%s3234_s1 + $0x22c] sm:$0xf0]  ;;  %v1710_v20 = vor.u32 %v2009_v11, %v1709_v9  ;;  %v1813_v34 = vld [vmem:[%s3234_s1 + $0x1e8] sm:$0xf] }
  0x16   :  { %849 = vmatpush.bf16.msra.mxu2 %v1870_v58  ;;  %v1565_v17 = vld [vmem:[%s3234_s1] sm:$0xf]  ;;  %v1973_v18 = vld [vmem:[%s3234_s1 + $0xc] sm:$0xf0]  ;;  %v1838_v21 = vor.u32 %v2041_v13, %v1837_v12  ;;  %v2034_v35 = vld [vmem:[%s3234_s1 + $0x1f4] sm:$0xf0] }
  0x17   :  { %v1693_v19 = vld [vmem:[%s3234_s1 + $0x100] sm:$0xf]  ;;  %v2005_v22 = vld [vmem:[%s3234_s1 + $0x10c] sm:$0xf0]  ;;  %v1566_v32 = vor.u32 %v1973_v18, %v1565_v17  ;;  %v1477_v39 = vld [vmem:[%s3235_s0 + $0x8] sm:$0xf]  ;;  %v1814_v47 = vor.u32 %v2034_v35, %v1813_v34 }
  0x18   :  { %752 = vmatpush.bf16.msra.mxu0 %v1598_v4  ;;  %v1821_v23 = vld [vmem:[%s3234_s1 + $0x200] sm:$0xf]  ;;  %v2037_v24 = vld [vmem:[%s3234_s1 + $0x20c] sm:$0xf0]  ;;  %v1694_v36 = vor.u32 %v2005_v22, %v1693_v19  ;;  %v1949_v40 = vld [vmem:[%s3235_s0 + $0x10] sm:$0xf0] }
  0x19   :  { %801 = vmatpush.bf16.msra.mxu1 %v1726_v5  ;;  %899 = vmatpush.bf16.msra.mxu3 %v1602_v10  ;;  %v1469_v28 = vld [vmem:[%s3235_s0] sm:$0xf]  ;;  %v1822_v37 = vor.u32 %v2037_v24, %v1821_v23  ;;  %v1471_v38 = vld [vmem:[%s3235_s0 + $0xc] sm:$0xf0]  ;;  %v2063_v43 = vld [vmem:[%s3234_s1 + $0x2e4] sm:$0xf]  ;;  %v2326_v52 = vor.u32 %v1949_v40, %v1477_v39 }
  0x1a   :  { %850 = vmatpush.bf16.msra.mxu2 %v1854_v6  ;;  %v1935_v44 = vld [vmem:[%s3234_s1 + $0x2f0] sm:$0xf0]  ;;  %v2031_v45 = vld [vmem:[%s3234_s1 + $0x1e4] sm:$0xf]  ;;  %v2313_v46 = vor.u32 %v1948_v29, %v1469_v28  ;;  %v1669_v49 = vld [vmem:[%s3234_s1 + $0xc8] sm:$0xf]  ;;  %v2324_v51 = vor.u32 %v1947_v33, %v1471_v38 }
  0x1b   :  { %v1807_v48 = vld [vmem:[%s3234_s1 + $0x1f0] sm:$0xf0]  ;;  %v1998_v50 = vld [vmem:[%s3234_s1 + $0xd4] sm:$0xf0]  ;;  %v1797_v53 = vld [vmem:[%s3234_s1 + $0x1c8] sm:$0xf]  ;;  %v1938_v55 = vor.u32 %v2063_v43, %v1935_v44 }
  0x1c   :  { %753 = vmatpush.bf16.msra.mxu0 %v1582_v16  ;;  %v2030_v54 = vld [vmem:[%s3234_s1 + $0x1d4] sm:$0xf0]  ;;  %v1810_v56 = vor.u32 %v2031_v45, %v1807_v48  ;;  %v1670_v57 = vor.u32 %v1998_v50, %v1669_v49  ;;  %v2059_v58 = vld [vmem:[%s3234_s1 + $0x2c4] sm:$0xf]  ;;  %v1919_v59 = vld [vmem:[%s3234_s1 + $0x2d0] sm:$0xf0] }
  0x1d   :  { %802 = vmatpush.bf16.msra.mxu1 %v1710_v20  ;;  %900 = vmatpush.bf16.msra.mxu3 %v1586_v25  ;;  %v1798_v60 = vor.u32 %v2030_v54, %v1797_v53  ;;  %v2027_v61 = vld [vmem:[%s3234_s1 + $0x1c4] sm:$0xf]  ;;  %v1791_v62 = vld [vmem:[%s3234_s1 + $0x1d0] sm:$0xf0]  ;;  %v1922_v63 = vor.u32 %v2059_v58, %v1919_v59  ;;  %v1653_v0 = vld [vmem:[%s3234_s1 + $0xa8] sm:$0xf] }
  0x1e   :  { %851 = vmatpush.bf16.msra.mxu2 %v1838_v21  ;;  %v1994_v1 = vld [vmem:[%s3234_s1 + $0xb4] sm:$0xf0]  ;;  %v1781_v2 = vld [vmem:[%s3234_s1 + $0x1a8] sm:$0xf]  ;;  %v1794_v3 = vor.u32 %v2027_v61, %v1791_v62  ;;  %v2055_v6 = vld [vmem:[%s3234_s1 + $0x2a4] sm:$0xf] }
  0x1f   :  { %v1654_v4 = vor.u32 %v1994_v1, %v1653_v0  ;;  %v2026_v5 = vld [vmem:[%s3234_s1 + $0x1b4] sm:$0xf0]  ;;  %v1903_v7 = vld [vmem:[%s3234_s1 + $0x2b0] sm:$0xf0]  ;;  %v2023_v9 = vld [vmem:[%s3234_s1 + $0x1a4] sm:$0xf] }
  0x20   :  { %754 = vmatpush.bf16.msra.mxu0 %v1566_v32  ;;  %v1782_v8 = vor.u32 %v2026_v5, %v1781_v2  ;;  %v1775_v10 = vld [vmem:[%s3234_s1 + $0x1b0] sm:$0xf0]  ;;  %v1906_v11 = vor.u32 %v2055_v6, %v1903_v7  ;;  %v1481_v13 = vld [vmem:[%s3235_s0 + $0x18] sm:$0xf]  ;;  %v1951_v14 = vld [vmem:[%s3235_s0 + $0x20] sm:$0xf0] }
  0x21   :  { %803 = vmatpush.bf16.msra.mxu1 %v1694_v36  ;;  %901 = vmatpush.bf16.msra.mxu3 %v1570_v41  ;;  %v1778_v12 = vor.u32 %v2023_v9, %v1775_v10  ;;  %v1950_v15 = vld [vmem:[%s3235_s0 + $0x1c] sm:$0xf]  ;;  %v1483_v16 = vld [vmem:[%s3235_s0 + $0x24] sm:$0xf0]  ;;  %v1489_v17 = vld [vmem:[%s3235_s0 + $0x20] sm:$0xf]  ;;  %v2392_v19 = vor.u32 %v1951_v14, %v1481_v13 }
  0x22   :  { %852 = vmatpush.bf16.msra.mxu2 %v1822_v37  ;;  %v1952_v18 = vld [vmem:[%s3235_s0 + $0x28] sm:$0xf0]  ;;  %v2394_v20 = vor.u32 %v1950_v15, %v1483_v16  ;;  %v1637_v22 = vld [vmem:[%s3234_s1 + $0x88] sm:$0xf]  ;;  %v1990_v23 = vld [vmem:[%s3234_s1 + $0x94] sm:$0xf0] }
  0x23   :  { %755 = vmatmul.bf16.vlgmr.msra.gmra.mxu0 %v2313_v46  ;;  %v2396_v21 = vor.u32 %v1952_v18, %v1489_v17  ;;  %v1765_v24 = vld [vmem:[%s3234_s1 + $0x188] sm:$0xf]  ;;  %v1638_v25 = vor.u32 %v1990_v23, %v1637_v22  ;;  %v2022_v26 = vld [vmem:[%s3234_s1 + $0x194] sm:$0xf0]  ;;  %v2051_v27 = vld [vmem:[%s3234_s1 + $0x284] sm:$0xf] }
  0x24   :  { %804 = vmatmul.bf16.vlgmr.msra.gmra.mxu1 %v2324_v51  ;;  %902 = vmatmul.bf16.vlgmr.msra.gmra.mxu3 %v2313_v46  ;;  %v1887_v28 = vld [vmem:[%s3234_s1 + $0x290] sm:$0xf0]  ;;  %v1766_v29 = vor.u32 %v2022_v26, %v1765_v24  ;;  %v2019_v31 = vld [vmem:[%s3234_s1 + $0x184] sm:$0xf]  ;;  %v1493_v34 = vld [vmem:[%s3235_s0 + $0x30] sm:$0xf] }
  0x25   :  { %1090 = vmatpush.bf16.msrb.mxu3 %v1814_v47  ;;  %853 = vmatmul.bf16.vlgmr.msra.gmra.mxu2 %v2326_v52  ;;  %v1890_v30 = vor.u32 %v2051_v27, %v1887_v28  ;;  %v1759_v32 = vld [vmem:[%s3234_s1 + $0x190] sm:$0xf0]  ;;  %v1954_v35 = vld [vmem:[%s3235_s0 + $0x38] sm:$0xf0]  ;;  %v1495_v37 = vld [vmem:[%s3235_s0 + $0x3c] sm:$0xf0] }
  0x26   :  { %1041 = vmatpush.bf16.msrb.mxu2 %v1686_v42  ;;  %992 = vmatpush.bf16.msrb.mxu1 %v1938_v55  ;;  %v1762_v33 = vor.u32 %v2019_v31, %v1759_v32  ;;  %v1953_v36 = vld [vmem:[%s3235_s0 + $0x34] sm:$0xf]  ;;  %v1501_v38 = vld [vmem:[%s3235_s0 + $0x38] sm:$0xf]  ;;  %v1955_v39 = vld [vmem:[%s3235_s0 + $0x40] sm:$0xf0]  ;;  %v2444_v40 = vor.u32 %v1954_v35, %v1493_v34 }
  0x27   :  { %943 = vmatpush.bf16.msrb.mxu0 %v1810_v56  ;;  %v2446_v41 = vor.u32 %v1953_v36, %v1495_v37  ;;  %v2448_v42 = vor.u32 %v1955_v39, %v1501_v38  ;;  %v1621_v43 = vld [vmem:[%s3234_s1 + $0x68] sm:$0xf]  ;;  %v1986_v44 = vld [vmem:[%s3234_s1 + $0x74] sm:$0xf0]  ;;  %v2047_v49 = vld [vmem:[%s3234_s1 + $0x264] sm:$0xf] }
  0x28   :  { %v1749_v45 = vld [vmem:[%s3234_s1 + $0x168] sm:$0xf]  ;;  %v1622_v47 = vor.u32 %v1986_v44, %v1621_v43  ;;  %v2018_v48 = vld [vmem:[%s3234_s1 + $0x174] sm:$0xf0]  ;;  %v1871_v50 = vld [vmem:[%s3234_s1 + $0x270] sm:$0xf0] }
  0x29   :  { %1091 = vmatpush.bf16.msrb.mxu3 %v1798_v60  ;;  %v1750_v53 = vor.u32 %v2018_v48, %v1749_v45  ;;  %v1874_v54 = vor.u32 %v2047_v49, %v1871_v50  ;;  %v2015_v55 = vld [vmem:[%s3234_s1 + $0x164] sm:$0xf]  ;;  %v1743_v56 = vld [vmem:[%s3234_s1 + $0x170] sm:$0xf0]  ;;  %v1505_v58 = vld [vmem:[%s3235_s0 + $0x48] sm:$0xf] }
  0x2a   :  { %1042 = vmatpush.bf16.msrb.mxu2 %v1670_v57  ;;  %993 = vmatpush.bf16.msrb.mxu1 %v1922_v63  ;;  %v1746_v57 = vor.u32 %v2015_v55, %v1743_v56  ;;  %v1957_v59 = vld [vmem:[%s3235_s0 + $0x50] sm:$0xf0]  ;;  %v1956_v60 = vld [vmem:[%s3235_s0 + $0x4c] sm:$0xf]  ;;  %v1507_v61 = vld [vmem:[%s3235_s0 + $0x54] sm:$0xf0] }
  0x2b   :  { %944 = vmatpush.bf16.msrb.mxu0 %v1794_v3  ;;  %v1513_v62 = vld [vmem:[%s3235_s0 + $0x50] sm:$0xf]  ;;  %v1958_v63 = vld [vmem:[%s3235_s0 + $0x58] sm:$0xf0]  ;;  %v2496_v0 = vor.u32 %v1957_v59, %v1505_v58  ;;  %v2498_v1 = vor.u32 %v1956_v60, %v1507_v61  ;;  %v1605_v3 = vld [vmem:[%s3234_s1 + $0x48] sm:$0xf] }
  0x2c   :  { %v2500_v2 = vor.u32 %v1958_v63, %v1513_v62  ;;  %v1733_v5 = vld [vmem:[%s3234_s1 + $0x148] sm:$0xf]  ;;  %v2014_v7 = vld [vmem:[%s3234_s1 + $0x154] sm:$0xf0]  ;;  %v1855_v9 = vld [vmem:[%s3234_s1 + $0x250] sm:$0xf0] }
  0x2d   :  { %1092 = vmatpush.bf16.msrb.mxu3 %v1782_v8  ;;  %v2043_v8 = vld [vmem:[%s3234_s1 + $0x244] sm:$0xf]  ;;  %v1734_v10 = vor.u32 %v2014_v7, %v1733_v5  ;;  %v1727_v13 = vld [vmem:[%s3234_s1 + $0x150] sm:$0xf0]  ;;  %v1517_v15 = vld [vmem:[%s3235_s0 + $0x60] sm:$0xf] }
  0x2e   :  { %1043 = vmatpush.bf16.msrb.mxu2 %v1654_v4  ;;  %994 = vmatpush.bf16.msrb.mxu1 %v1906_v11  ;;  %v1982_v4 = vld [vmem:[%s3234_s1 + $0x54] sm:$0xf0]  ;;  %v1858_v11 = vor.u32 %v2043_v8, %v1855_v9  ;;  %v1960_v16 = vld [vmem:[%s3235_s0 + $0x68] sm:$0xf0]  ;;  %v1959_v17 = vld [vmem:[%s3235_s0 + $0x64] sm:$0xf] }
  0x2f   :  { %945 = vmatpush.bf16.msrb.mxu0 %v1778_v12  ;;  %v1606_v6 = vor.u32 %v1982_v4, %v1605_v3  ;;  %v2011_v12 = vld [vmem:[%s3234_s1 + $0x144] sm:$0xf]  ;;  %v1519_v18 = vld [vmem:[%s3235_s0 + $0x6c] sm:$0xf0]  ;;  %v1525_v22 = vld [vmem:[%s3235_s0 + $0x68] sm:$0xf]  ;;  %v2548_v24 = vor.u32 %v1960_v16, %v1517_v15 }
  0x30   :  { %v1730_v14 = vor.u32 %v2011_v12, %v1727_v13  ;;  %v1961_v23 = vld [vmem:[%s3235_s0 + $0x70] sm:$0xf0]  ;;  %v1589_v27 = vld [vmem:[%s3234_s1 + $0x28] sm:$0xf]  ;;  %v1978_v28 = vld [vmem:[%s3234_s1 + $0x34] sm:$0xf0] }
  0x31   :  { %1093 = vmatpush.bf16.msrb.mxu3 %v1766_v29  ;;  %v2552_v26 = vor.u32 %v1961_v23, %v1525_v22  ;;  %v1717_v29 = vld [vmem:[%s3234_s1 + $0x128] sm:$0xf]  ;;  %v2010_v31 = vld [vmem:[%s3234_s1 + $0x134] sm:$0xf0]  ;;  %v2039_v32 = vld [vmem:[%s3234_s1 + $0x224] sm:$0xf] }
  0x32   :  { %1044 = vmatpush.bf16.msrb.mxu2 %v1638_v25  ;;  %995 = vmatpush.bf16.msrb.mxu1 %v1890_v30  ;;  %v2550_v25 = vor.u32 %v1959_v17, %v1519_v18  ;;  %v1590_v30 = vor.u32 %v1978_v28, %v1589_v27  ;;  %v1718_v34 = vor.u32 %v2010_v31, %v1717_v29  ;;  %v2007_v36 = vld [vmem:[%s3234_s1 + $0x124] sm:$0xf]  ;;  %v1711_v37 = vld [vmem:[%s3234_s1 + $0x130] sm:$0xf0]  ;;  %v1529_v39 = vld [vmem:[%s3235_s0 + $0x78] sm:$0xf] }
  0x33   :  { %760 = vmatmul.bf16.gmra.mxu0 %v2392_v19  ;;  %v1714_v38 = vor.u32 %v2007_v36, %v1711_v37  ;;  %v1963_v43 = vld [vmem:[%s3235_s0 + $0x80] sm:$0xf0]  ;;  %v1962_v44 = vld [vmem:[%s3235_s0 + $0x7c] sm:$0xf]  ;;  %v1531_v45 = vld [vmem:[%s3235_s0 + $0x84] sm:$0xf0] }
  0x34   :  { %809 = vmatmul.bf16.gmra.mxu1 %v2394_v20  ;;  %907 = vmatmul.bf16.gmra.mxu3 %v2392_v19  ;;  %v1964_v48 = vld [vmem:[%s3235_s0 + $0x88] sm:$0xf0]  ;;  %v2600_v49 = vor.u32 %v1963_v43, %v1529_v39  ;;  %v2602_v50 = vor.u32 %v1962_v44, %v1531_v45  ;;  %v1974_v55 = vld [vmem:[%s3234_s1 + $0x14] sm:$0xf0]  ;;  %v1701_v56 = vld [vmem:[%s3234_s1 + $0x108] sm:$0xf] }
  0x35   :  { %858 = vmatmul.bf16.gmra.mxu2 %v2396_v21  ;;  %946 = vmatpush.bf16.msrb.mxu0 %v1762_v33  ;;  %v1839_v33 = vld [vmem:[%s3234_s1 + $0x230] sm:$0xf0]  ;;  %v2006_v58 = vld [vmem:[%s3234_s1 + $0x114] sm:$0xf0]  ;;  %v2035_v59 = vld [vmem:[%s3234_s1 + $0x204] sm:$0xf] }
  0x36   :  { %1045 = vmatpush.bf16.msrb.mxu2 %v1622_v47  ;;  %1094 = vmatpush.bf16.msrb.mxu3 %v1750_v53  ;;  %v1842_v35 = vor.u32 %v2039_v32, %v1839_v33  ;;  %v1537_v47 = vld [vmem:[%s3235_s0 + $0x80] sm:$0xf]  ;;  %v1823_v60 = vld [vmem:[%s3234_s1 + $0x210] sm:$0xf0]  ;;  %v1702_v61 = vor.u32 %v2006_v58, %v1701_v56  ;;  %v2003_v63 = vld [vmem:[%s3234_s1 + $0x104] sm:$0xf] }
  0x37   :  { %996 = vmatpush.bf16.msrb.mxu1 %v1874_v54  ;;  %v2604_v53 = vor.u32 %v1964_v48, %v1537_v47  ;;  %v1573_v54 = vld [vmem:[%s3234_s1 + $0x8] sm:$0xf]  ;;  %v1826_v62 = vor.u32 %v2035_v59, %v1823_v60  ;;  %v1695_v3 = vld [vmem:[%s3234_s1 + $0x110] sm:$0xf0]  ;;  %v1541_v5 = vld [vmem:[%s3235_s0 + $0x90] sm:$0xf] }
  0x38   :  { %v1698_v4 = vor.u32 %v2003_v63, %v1695_v3  ;;  %v1965_v7 = vld [vmem:[%s3235_s0 + $0x94] sm:$0xf]  ;;  %v1543_v8 = vld [vmem:[%s3235_s0 + $0x9c] sm:$0xf0]  ;;  %v1549_v9 = vld [vmem:[%s3235_s0 + $0x98] sm:$0xf] }
  0x39   :  { %947 = vmatpush.bf16.msrb.mxu0 %v1746_v57  ;;  %v1574_v57 = vor.u32 %v1974_v55, %v1573_v54  ;;  %v2654_v12 = vor.u32 %v1965_v7, %v1543_v8  ;;  %v1815_v15 = vld [vmem:[%s3234_s1 + $0x1f8] sm:$0xf0]  ;;  %v2064_v16 = vld [vmem:[%s3234_s1 + $0x2ec] sm:$0xf]  ;;  %v1553_v23 = vld [vmem:[%s3235_s0 + $0xa8] sm:$0xf] }
  0x3a   :  { %1046 = vmatpush.bf16.msrb.mxu2 %v1606_v6  ;;  %1095 = vmatpush.bf16.msrb.mxu3 %v1734_v10  ;;  %v1966_v6 = vld [vmem:[%s3235_s0 + $0x98] sm:$0xf0]  ;;  %v1967_v10 = vld [vmem:[%s3235_s0 + $0xa0] sm:$0xf0]  ;;  %v1969_v27 = vld [vmem:[%s3235_s0 + $0xb0] sm:$0xf0] }
  0x3b   :  { %997 = vmatpush.bf16.msrb.mxu1 %v1858_v11  ;;  %v2652_v11 = vor.u32 %v1966_v6, %v1541_v5  ;;  %v2656_v13 = vor.u32 %v1967_v10, %v1549_v9  ;;  %v1943_v18 = vld [vmem:[%s3234_s1 + $0x2f8] sm:$0xf0]  ;;  %v1968_v28 = vld [vmem:[%s3235_s0 + $0xac] sm:$0xf]  ;;  %v1555_v29 = vld [vmem:[%s3235_s0 + $0xb4] sm:$0xf0] }
  0x3c   :  { %v1946_v22 = vor.u32 %v2064_v16, %v1943_v18  ;;  %v1687_v31 = vld [vmem:[%s3234_s1 + $0xf8] sm:$0xf0]  ;;  %v1941_v32 = vld [vmem:[%s3234_s1 + $0x2e8] sm:$0xf]  ;;  %v1561_v33 = vld [vmem:[%s3235_s0 + $0xb0] sm:$0xf]  ;;  %v2706_v39 = vor.u32 %v1968_v28, %v1555_v29 }
  0x3d   :  { %948 = vmatpush.bf16.msrb.mxu0 %v1730_v14  ;;  %v2032_v14 = vld [vmem:[%s3234_s1 + $0x1ec] sm:$0xf]  ;;  %v2066_v36 = vld [vmem:[%s3234_s1 + $0x2f4] sm:$0xf0]  ;;  %v1799_v45 = vld [vmem:[%s3234_s1 + $0x1d8] sm:$0xf0] }
  0x3e   :  { %1047 = vmatpush.bf16.msrb.mxu2 %v1590_v30  ;;  %1096 = vmatpush.bf16.msrb.mxu3 %v1718_v34  ;;  %v1818_v17 = vor.u32 %v2032_v14, %v1815_v15  ;;  %v2000_v30 = vld [vmem:[%s3234_s1 + $0xec] sm:$0xf]  ;;  %v1970_v34 = vld [vmem:[%s3235_s0 + $0xb8] sm:$0xf0]  ;;  %v1942_v37 = vor.u32 %v2066_v36, %v1941_v32  ;;  %v1925_v58 = vld [vmem:[%s3234_s1 + $0x2c8] sm:$0xf] }
  0x3f   :  { %998 = vmatpush.bf16.msrb.mxu1 %v1842_v35  ;;  %v1690_v35 = vor.u32 %v2000_v30, %v1687_v31  ;;  %v2708_v43 = vor.u32 %v1970_v34, %v1561_v33  ;;  %v2028_v44 = vld [vmem:[%s3234_s1 + $0x1cc] sm:$0xf]  ;;  %v1927_v54 = vld [vmem:[%s3234_s1 + $0x2d8] sm:$0xf0]  ;;  %v2062_v60 = vld [vmem:[%s3234_s1 + $0x2d4] sm:$0xf0] }
  0x40   :  { %v2060_v47 = vld [vmem:[%s3234_s1 + $0x2cc] sm:$0xf]  ;;  %v1802_v48 = vor.u32 %v2028_v44, %v1799_v45  ;;  %v1783_v5 = vld [vmem:[%s3234_s1 + $0x1b8] sm:$0xf0]  ;;  %v2058_v29 = vld [vmem:[%s3234_s1 + $0x2b4] sm:$0xf0] }
  0x41   :  { %949 = vmatpush.bf16.msrb.mxu0 %v1714_v38  ;;  %v2704_v38 = vor.u32 %v1969_v27, %v1553_v23  ;;  %v1930_v55 = vor.u32 %v2060_v47, %v1927_v54  ;;  %v1996_v56 = vld [vmem:[%s3234_s1 + $0xcc] sm:$0xf]  ;;  %v1911_v8 = vld [vmem:[%s3234_s1 + $0x2b8] sm:$0xf0]  ;;  %v1909_v27 = vld [vmem:[%s3234_s1 + $0x2a8] sm:$0xf] }
  0x42   :  { %1048 = vmatpush.bf16.msrb.mxu2 %v1574_v57  ;;  %1097 = vmatpush.bf16.msrb.mxu3 %v1702_v61  ;;  %v1671_v57 = vld [vmem:[%s3234_s1 + $0xd8] sm:$0xf0]  ;;  %v1926_v61 = vor.u32 %v2062_v60, %v1925_v58  ;;  %v2056_v6 = vld [vmem:[%s3234_s1 + $0x2ac] sm:$0xf]  ;;  %v1910_v31 = vor.u32 %v2058_v29, %v1909_v27 }
  0x43   :  { %765 = vmatmul.bf16.gmra.mxu0 %v2444_v40  ;;  %999 = vmatpush.bf16.msrb.mxu1 %v1826_v62  ;;  %v1674_v59 = vor.u32 %v1996_v56, %v1671_v57  ;;  %v1914_v10 = vor.u32 %v2056_v6, %v1911_v8  ;;  %v1655_v23 = vld [vmem:[%s3234_s1 + $0xb8] sm:$0xf0]  ;;  %v2020_v45 = vld [vmem:[%s3234_s1 + $0x18c] sm:$0xf]  ;;  %v2054_v6 = vld [vmem:[%s3234_s1 + $0x294] sm:$0xf0] }
  0x44   :  { %814 = vmatmul.bf16.gmra.mxu1 %v2446_v41  ;;  %912 = vmatmul.bf16.gmra.mxu3 %v2444_v40  ;;  %v1767_v47 = vld [vmem:[%s3234_s1 + $0x198] sm:$0xf0] }
  0x45   :  { %863 = vmatmul.bf16.gmra.mxu2 %v2448_v42  ;;  %950 = vmatpush.bf16.msrb.mxu0 %v1698_v4  ;;  %v2024_v4 = vld [vmem:[%s3234_s1 + $0x1ac] sm:$0xf]  ;;  %v1770_v54 = vor.u32 %v2020_v45, %v1767_v47  ;;  %v1751_v27 = vld [vmem:[%s3234_s1 + $0x178] sm:$0xf0] }
  0x46   :  { %1237 = vmatpush.bf16.msra.mxu2 %v1818_v17  ;;  %1286 = vmatpush.bf16.msra.mxu3 %v1946_v22  ;;  %v1786_v7 = vor.u32 %v2024_v4, %v1783_v5  ;;  %v1992_v22 = vld [vmem:[%s3234_s1 + $0xac] sm:$0xf]  ;;  %v1893_v5 = vld [vmem:[%s3234_s1 + $0x288] sm:$0xf]  ;;  %v1623_v47 = vld [vmem:[%s3234_s1 + $0x78] sm:$0xf0] }
  0x47   :  { %1188 = vmatpush.bf16.msra.mxu1 %v1690_v35  ;;  %v1658_v28 = vor.u32 %v1992_v22, %v1655_v23  ;;  %v1894_v8 = vor.u32 %v2054_v6, %v1893_v5  ;;  %v2016_v23 = vld [vmem:[%s3234_s1 + $0x16c] sm:$0xf]  ;;  %v1735_v6 = vld [vmem:[%s3234_s1 + $0x158] sm:$0xf0] }
  0x48   :  { %v1754_v29 = vor.u32 %v2016_v23, %v1751_v27  ;;  %v1984_v45 = vld [vmem:[%s3234_s1 + $0x6c] sm:$0xf] }
  0x49   :  { %1139 = vmatpush.bf16.msra.mxu0 %v1942_v37  ;;  %v2012_v5 = vld [vmem:[%s3234_s1 + $0x14c] sm:$0xf] }
  0x4a   :  { %1238 = vmatpush.bf16.msra.mxu2 %v1802_v48  ;;  %1287 = vmatpush.bf16.msra.mxu3 %v1930_v55  ;;  %v2052_v48 = vld [vmem:[%s3234_s1 + $0x28c] sm:$0xf]  ;;  %v1895_v55 = vld [vmem:[%s3234_s1 + $0x298] sm:$0xf0] }
  0x4b   :  { %1189 = vmatpush.bf16.msra.mxu1 %v1674_v59  ;;  %v1898_v57 = vor.u32 %v2052_v48, %v1895_v55  ;;  %v1626_v48 = vor.u32 %v1984_v45, %v1623_v47  ;;  %v2050_v55 = vld [vmem:[%s3234_s1 + $0x274] sm:$0xf0] }
  0x4d   :  { %1140 = vmatpush.bf16.msra.mxu0 %v1926_v61 }
  0x4e   :  { %1239 = vmatpush.bf16.msra.mxu2 %v1786_v7  ;;  %1288 = vmatpush.bf16.msra.mxu3 %v1914_v10 }
  0x4f   :  { %1190 = vmatpush.bf16.msra.mxu1 %v1658_v28  ;;  %v2048_v28 = vld [vmem:[%s3234_s1 + $0x26c] sm:$0xf] }
  0x51   :  { %1141 = vmatpush.bf16.msra.mxu0 %v1910_v31 }
  0x52   :  { %1240 = vmatpush.bf16.msra.mxu2 %v1770_v54  ;;  %1289 = vmatpush.bf16.msra.mxu3 %v1898_v57  ;;  %v1877_v54 = vld [vmem:[%s3234_s1 + $0x268] sm:$0xf] }
  0x53   :  { %770 = vmatmul.bf16.gmra.mxu0 %v2496_v0  ;;  %v1878_v57 = vor.u32 %v2050_v55, %v1877_v54 }
  0x54   :  { %819 = vmatmul.bf16.gmra.mxu1 %v2498_v1  ;;  %917 = vmatmul.bf16.gmra.mxu3 %v2496_v0 }
  0x55   :  { %868 = vmatmul.bf16.gmra.mxu2 %v2500_v2  ;;  %1142 = vmatpush.bf16.msra.mxu0 %v1894_v8  ;;  %v1738_v8 = vor.u32 %v2012_v5, %v1735_v6 }
  0x56   :  { %1241 = vmatpush.bf16.msra.mxu2 %v1754_v29  ;;  %v1607_v29 = vld [vmem:[%s3234_s1 + $0x58] sm:$0xf0] }
  0x59   :  { %1143 = vmatpush.bf16.msra.mxu0 %v1878_v57  ;;  %v1719_v57 = vld [vmem:[%s3234_s1 + $0x138] sm:$0xf0] }
  0x5a   :  { %1242 = vmatpush.bf16.msra.mxu2 %v1738_v8 }
  0x63   :  { %775 = vmatmul.bf16.gmra.mxu0 %v2548_v24 }
  0x64   :  { %824 = vmatmul.bf16.gmra.mxu1 %v2550_v25  ;;  %922 = vmatmul.bf16.gmra.mxu3 %v2548_v24 }
  0x65   :  { %873 = vmatmul.bf16.gmra.mxu2 %v2552_v26 }
  0x73   :  { %780 = vmatmul.bf16.gmra.mxu0 %v2600_v49 }
  0x74   :  { %829 = vmatmul.bf16.gmra.mxu1 %v2602_v50  ;;  %927 = vmatmul.bf16.gmra.mxu3 %v2600_v49 }
  0x75   :  { %878 = vmatmul.bf16.gmra.mxu2 %v2604_v53 }
  0x83   :  { %785 = vmatmul.bf16.gmra.mxu0 %v2652_v11 }
  0x84   :  { %834 = vmatmul.bf16.gmra.mxu1 %v2654_v12  ;;  %932 = vmatmul.bf16.gmra.mxu3 %v2652_v11 }
  0x85   :  { %883 = vmatmul.bf16.gmra.mxu2 %v2656_v13 }
  0x93   :  { %790 = vmatmul.bf16.gmra.mxu0 %v2704_v38 }
  0x94   :  { %839 = vmatmul.bf16.gmra.mxu1 %v2706_v39  ;;  %937 = vmatmul.bf16.gmra.mxu3 %v2704_v38 }
  0x95   :  { %888 = vmatmul.bf16.gmra.mxu2 %v2708_v43 }
  0xa0   :  { %v756_v62 = vpop.f32.mrf.mxu0 }
  0xa1   :  { %v805_v63 = vpop.f32.mrf.mxu1 }
  0xa2   :  { %v806_v3 = vadd.f32 %v805_v63, %v756_v62  ;;  %v1988_v63 = vld [vmem:[%s3234_s1 + $0x8c] sm:$0xf] }
  0xa3   :  { %951 = vmatmul.bf16.vlgmr.msrb.gmra.mxu0 %v2324_v51 }
  0xa4   :  { %1000 = vmatmul.bf16.vlgmr.msrb.gmra.mxu1 %v2326_v52  ;;  %1098 = vmatmul.bf16.vlgmr.msrb.gmra.mxu3 %v2324_v51 }
  0xa5   :  { %1049 = vmatmul.bf16.vlgmr.msrb.gmra.mxu2 %v2313_v46 }
  0xa7   :  { %v2754_v15 = vpop.f32.mrf.mxu3 }
  0xa8   :  { %v854_v9 = vpop.f32.mrf.mxu2  ;;  %v758_v16 = vpop.f32.mrf.mxu0 }
  0xa9   :  { %v855_v14 = vadd.f32 %v854_v9, %v806_v3  ;;  %v807_v17 = vpop.f32.mrf.mxu1  ;;  %v1639_v3 = vld [vmem:[%s3234_s1 + $0x98] sm:$0xf0] }
  0xaa   :  { %v808_v30 = vadd.f32 %v807_v17, %v758_v16  ;;  %v1642_v4 = vor.u32 %v1988_v63, %v1639_v3 }
  0xab   :  { %v1335_v18 = vmax.f32 %v855_v14, 0.0 }
  0xac   :  { %1191 = vmatpush.bf16.msra.mxu1 %v1642_v4 }
  0xad   :  { %1399 = vst [vmem:[%s3236_s2] sm:$0xff] %v1335_v18 }
  0xaf   :  { %v2771_v34 = vpop.f32.mrf.mxu3 }
  0xb0   :  { %v856_v32 = vpop.f32.mrf.mxu2  ;;  %v761_v35 = vpop.f32.mrf.mxu0  ;;  %1192 = vmatpush.bf16.msra.mxu1 %v1626_v48 }
  0xb1   :  { %v857_v33 = vadd.f32 %v856_v32, %v808_v30  ;;  %v810_v36 = vpop.f32.mrf.mxu1  ;;  %v1879_v30 = vld [vmem:[%s3234_s1 + $0x278] sm:$0xf0] }
  0xb2   :  { %v811_v44 = vadd.f32 %v810_v36, %v761_v35  ;;  %v1882_v32 = vor.u32 %v2048_v28, %v1879_v30  ;;  %v1980_v28 = vld [vmem:[%s3234_s1 + $0x4c] sm:$0xf] }
  0xb3   :  { %v1339_v37 = vmax.f32 %v857_v33, 0.0  ;;  %956 = vmatmul.bf16.gmra.mxu0 %v2394_v20  ;;  %v1610_v30 = vor.u32 %v1980_v28, %v1607_v29 }
  0xb4   :  { %1005 = vmatmul.bf16.gmra.mxu1 %v2396_v21  ;;  %1103 = vmatmul.bf16.gmra.mxu3 %v2394_v20 }
  0xb5   :  { %1403 = vst [vmem:[%s3236_s2 + $0x20] sm:$0xff] %v1339_v37  ;;  %1054 = vmatmul.bf16.gmra.mxu2 %v2392_v19  ;;  %1290 = vmatpush.bf16.msra.mxu3 %v1882_v32  ;;  %v2046_v32 = vld [vmem:[%s3234_s1 + $0x254] sm:$0xf0] }
  0xb6   :  { %1193 = vmatpush.bf16.msra.mxu1 %v1610_v30 }
  0xb7   :  { %v2792_v59 = vpop.f32.mrf.mxu3 }
  0xb8   :  { %v859_v56 = vpop.f32.mrf.mxu2  ;;  %v763_v60 = vpop.f32.mrf.mxu0 }
  0xb9   :  { %v860_v58 = vadd.f32 %v859_v56, %v811_v44  ;;  %v812_v61 = vpop.f32.mrf.mxu1 }
  0xba   :  { %v813_v7 = vadd.f32 %v812_v61, %v763_v60 }
  0xbb   :  { %v1343_v62 = vmax.f32 %v860_v58, 0.0 }
  0xbd   :  { %1407 = vst [vmem:[%s3236_s2 + $0x40] sm:$0xff] %v1343_v62 }
  0xbf   :  { %v2809_v14 = vpop.f32.mrf.mxu3 }
  0xc0   :  { %v861_v9 = vpop.f32.mrf.mxu2  ;;  %v766_v16 = vpop.f32.mrf.mxu0 }
  0xc1   :  { %v862_v10 = vadd.f32 %v861_v9, %v813_v7  ;;  %v815_v17 = vpop.f32.mrf.mxu1  ;;  %v2044_v7 = vld [vmem:[%s3234_s1 + $0x24c] sm:$0xf]  ;;  %v1863_v9 = vld [vmem:[%s3234_s1 + $0x258] sm:$0xf0] }
  0xc2   :  { %v816_v22 = vadd.f32 %v815_v17, %v766_v16  ;;  %v1866_v16 = vor.u32 %v2044_v7, %v1863_v9  ;;  %v1976_v9 = vld [vmem:[%s3234_s1 + $0x2c] sm:$0xf] }
  0xc3   :  { %v1347_v18 = vmax.f32 %v862_v10, 0.0  ;;  %961 = vmatmul.bf16.gmra.mxu0 %v2446_v41 }
  0xc4   :  { %1010 = vmatmul.bf16.gmra.mxu1 %v2448_v42  ;;  %1108 = vmatmul.bf16.gmra.mxu3 %v2446_v41 }
  0xc5   :  { %1411 = vst [vmem:[%s3236_s2 + $0x60] sm:$0xff] %v1347_v18  ;;  %1059 = vmatmul.bf16.gmra.mxu2 %v2444_v40  ;;  %1291 = vmatpush.bf16.msra.mxu3 %v1866_v16 }
  0xc7   :  { %v2830_v35 = vpop.f32.mrf.mxu3 }
  0xc8   :  { %v864_v31 = vpop.f32.mrf.mxu2  ;;  %v768_v36 = vpop.f32.mrf.mxu0 }
  0xc9   :  { %v865_v33 = vadd.f32 %v864_v31, %v816_v22  ;;  %v817_v37 = vpop.f32.mrf.mxu1  ;;  %v1861_v31 = vld [vmem:[%s3234_s1 + $0x248] sm:$0xf] }
  0xca   :  { %v818_v56 = vadd.f32 %v817_v37, %v768_v36  ;;  %v1862_v36 = vor.u32 %v2046_v32, %v1861_v31 }
  0xcb   :  { %v1351_v44 = vmax.f32 %v865_v33, 0.0 }
  0xcc   :  { %1144 = vmatpush.bf16.msra.mxu0 %v1862_v36 }
  0xcd   :  { %1415 = vst [vmem:[%s3236_s2 + $0x80] sm:$0xff] %v1351_v44 }
  0xcf   :  { %v2847_v61 = vpop.f32.mrf.mxu3 }
  0xd0   :  { %v866_v58 = vpop.f32.mrf.mxu2  ;;  %v771_v62 = vpop.f32.mrf.mxu0 }
  0xd1   :  { %v867_v60 = vadd.f32 %v866_v58, %v818_v56  ;;  %v820_v63 = vpop.f32.mrf.mxu1  ;;  %v2008_v56 = vld [vmem:[%s3234_s1 + $0x12c] sm:$0xf] }
  0xd2   :  { %v821_v4 = vadd.f32 %v820_v63, %v771_v62  ;;  %v2040_v58 = vld [vmem:[%s3234_s1 + $0x22c] sm:$0xf]  ;;  %v1847_v62 = vld [vmem:[%s3234_s1 + $0x238] sm:$0xf0] }
  0xd3   :  { %v1355_v3 = vmax.f32 %v867_v60, 0.0  ;;  %966 = vmatmul.bf16.gmra.mxu0 %v2498_v1  ;;  %v1722_v60 = vor.u32 %v2008_v56, %v1719_v57 }
  0xd4   :  { %1015 = vmatmul.bf16.gmra.mxu1 %v2500_v2  ;;  %1113 = vmatmul.bf16.gmra.mxu3 %v2498_v1 }
  0xd5   :  { %1419 = vst [vmem:[%s3236_s2 + $0xa0] sm:$0xff] %v1355_v3  ;;  %1064 = vmatmul.bf16.gmra.mxu2 %v2496_v0  ;;  %v1850_v3 = vor.u32 %v2040_v58, %v1847_v62 }
  0xd6   :  { %1243 = vmatpush.bf16.msra.mxu2 %v1722_v60 }
  0xd7   :  { %v2868_v18 = vpop.f32.mrf.mxu3  ;;  %1292 = vmatpush.bf16.msra.mxu3 %v1850_v3  ;;  %v1972_v3 = vld [vmem:[%s3234_s1 + $0xc] sm:$0xf] }
  0xd8   :  { %v869_v10 = vpop.f32.mrf.mxu2  ;;  %v773_v22 = vpop.f32.mrf.mxu0 }
  0xd9   :  { %v870_v17 = vadd.f32 %v869_v10, %v821_v4  ;;  %v822_v23 = vpop.f32.mrf.mxu1  ;;  %v1591_v10 = vld [vmem:[%s3234_s1 + $0x38] sm:$0xf0] }
  0xda   :  { %v823_v33 = vadd.f32 %v822_v23, %v773_v22  ;;  %v1594_v16 = vor.u32 %v1976_v9, %v1591_v10  ;;  %v2042_v22 = vld [vmem:[%s3234_s1 + $0x234] sm:$0xf0] }
  0xdb   :  { %v1359_v27 = vmax.f32 %v870_v17, 0.0  ;;  %v1845_v17 = vld [vmem:[%s3234_s1 + $0x228] sm:$0xf] }
  0xdc   :  { %1194 = vmatpush.bf16.msra.mxu1 %v1594_v16 }
  0xdd   :  { %1423 = vst [vmem:[%s3236_s2 + $0xc0] sm:$0xff] %v1359_v27  ;;  %v1846_v27 = vor.u32 %v2042_v22, %v1845_v17 }
  0xdf   :  { %v2885_v45 = vpop.f32.mrf.mxu3  ;;  %1145 = vmatpush.bf16.msra.mxu0 %v1846_v27 }
  0xe0   :  { %v871_v37 = vpop.f32.mrf.mxu2  ;;  %v776_v47 = vpop.f32.mrf.mxu0 }
  0xe1   :  { %v872_v44 = vadd.f32 %v871_v37, %v823_v33  ;;  %v825_v48 = vpop.f32.mrf.mxu1  ;;  %v2004_v37 = vld [vmem:[%s3234_s1 + $0x10c] sm:$0xf] }
  0xe2   :  { %v826_v55 = vadd.f32 %v825_v48, %v776_v47  ;;  %v2036_v47 = vld [vmem:[%s3234_s1 + $0x20c] sm:$0xf] }
  0xe3   :  { %v1363_v54 = vmax.f32 %v872_v44, 0.0  ;;  %971 = vmatmul.bf16.gmra.mxu0 %v2550_v25  ;;  %v1703_v44 = vld [vmem:[%s3234_s1 + $0x118] sm:$0xf0] }
  0xe4   :  { %1020 = vmatmul.bf16.gmra.mxu1 %v2552_v26  ;;  %1118 = vmatmul.bf16.gmra.mxu3 %v2550_v25  ;;  %v1706_v48 = vor.u32 %v2004_v37, %v1703_v44 }
  0xe5   :  { %1427 = vst [vmem:[%s3236_s2 + $0xe0] sm:$0xff] %v1363_v54  ;;  %1069 = vmatmul.bf16.gmra.mxu2 %v2548_v24  ;;  %v1831_v54 = vld [vmem:[%s3234_s1 + $0x218] sm:$0xf0] }
  0xe6   :  { %v1834_v56 = vor.u32 %v2036_v47, %v1831_v54  ;;  %1244 = vmatpush.bf16.msra.mxu2 %v1706_v48 }
  0xe7   :  { %v2906_v5 = vpop.f32.mrf.mxu3 }
  0xe8   :  { %v874_v63 = vpop.f32.mrf.mxu2  ;;  %v778_v6 = vpop.f32.mrf.mxu0  ;;  %1293 = vmatpush.bf16.msra.mxu3 %v1834_v56 }
  0xe9   :  { %v875_v4 = vadd.f32 %v874_v63, %v826_v55  ;;  %v827_v7 = vpop.f32.mrf.mxu1 }
  0xea   :  { %v828_v23 = vadd.f32 %v827_v7, %v778_v6  ;;  %v1829_v7 = vld [vmem:[%s3234_s1 + $0x208] sm:$0xf] }
  0xeb   :  { %v1367_v8 = vmax.f32 %v875_v4, 0.0  ;;  %v1575_v4 = vld [vmem:[%s3234_s1 + $0x18] sm:$0xf0] }
  0xec   :  { %v1578_v6 = vor.u32 %v1972_v3, %v1575_v4 }
  0xed   :  { %1431 = vst [vmem:[%s3236_s2 + $0x100] sm:$0xff] %v1367_v8  ;;  %v2038_v8 = vld [vmem:[%s3234_s1 + $0x214] sm:$0xf0] }
  0xee   :  { %v1830_v10 = vor.u32 %v2038_v8, %v1829_v7  ;;  %1195 = vmatpush.bf16.msra.mxu1 %v1578_v6 }
  0xef   :  { %v2923_v30 = vpop.f32.mrf.mxu3 }
  0xf0   :  { %v876_v28 = vpop.f32.mrf.mxu2  ;;  %v781_v31 = vpop.f32.mrf.mxu0  ;;  %1146 = vmatpush.bf16.msra.mxu0 %v1830_v10 }
  0xf1   :  { %v877_v29 = vadd.f32 %v876_v28, %v828_v23  ;;  %v830_v32 = vpop.f32.mrf.mxu1 }
  0xf2   :  { %v831_v36 = vadd.f32 %v830_v32, %v781_v31 }
  0xf3   :  { %v1371_v33 = vmax.f32 %v877_v29, 0.0  ;;  %976 = vmatmul.bf16.gmra.mxu0 %v2602_v50 }
  0xf4   :  { %1025 = vmatmul.bf16.gmra.mxu1 %v2604_v53  ;;  %1123 = vmatmul.bf16.gmra.mxu3 %v2602_v50 }
  0xf5   :  { %1435 = vst [vmem:[%s3236_s2 + $0x120] sm:$0xff] %v1371_v33  ;;  %1074 = vmatmul.bf16.gmra.mxu2 %v2600_v49 }
  0xf7   :  { %v2944_v58 = vpop.f32.mrf.mxu3 }
  0xf8   :  { %v879_v55 = vpop.f32.mrf.mxu2  ;;  %v783_v60 = vpop.f32.mrf.mxu0 }
  0xf9   :  { %v880_v57 = vadd.f32 %v879_v55, %v831_v36  ;;  %v832_v62 = vpop.f32.mrf.mxu1 }
  0xfa   :  { %v833_v9 = vadd.f32 %v832_v62, %v783_v60 }
  0xfb   :  { %v1375_v63 = vmax.f32 %v880_v57, 0.0 }
  0xfd   :  { %1439 = vst [vmem:[%s3236_s2 + $0x140] sm:$0xff] %v1375_v63 }
  0xff   :  { %v2961_v22 = vpop.f32.mrf.mxu3 }
 0x100   :  { %v881_v16 = vpop.f32.mrf.mxu2  ;;  %v786_v23 = vpop.f32.mrf.mxu0 }
 0x101   :  { %v882_v17 = vadd.f32 %v881_v16, %v833_v9  ;;  %v835_v27 = vpop.f32.mrf.mxu1 }
 0x102   :  { %v836_v29 = vadd.f32 %v835_v27, %v786_v23 }
 0x103   :  { %v1379_v28 = vmax.f32 %v882_v17, 0.0  ;;  %981 = vmatmul.bf16.gmra.mxu0 %v2654_v12 }
 0x104   :  { %1030 = vmatmul.bf16.gmra.mxu1 %v2656_v13  ;;  %1128 = vmatmul.bf16.gmra.mxu3 %v2654_v12 }
 0x105   :  { %1443 = vst [vmem:[%s3236_s2 + $0x160] sm:$0xff] %v1379_v28  ;;  %1079 = vmatmul.bf16.gmra.mxu2 %v2652_v11 }
 0x107   :  { %v2970_v33 = vpop.f32.mrf.mxu3 }
 0x108   :  { %v884_v31 = vpop.f32.mrf.mxu2  ;;  %v788_v36 = vpop.f32.mrf.mxu0 }
 0x109   :  { %v885_v32 = vadd.f32 %v884_v31, %v836_v29  ;;  %v837_v37 = vpop.f32.mrf.mxu1 }
 0x10a   :  { %v838_v47 = vadd.f32 %v837_v37, %v788_v36 }
 0x10b   :  { %v1383_v44 = vmax.f32 %v885_v32, 0.0 }
 0x10d   :  { %1447 = vst [vmem:[%s3236_s2 + $0x180] sm:$0xff] %v1383_v44 }
 0x10f   :  { %v2975_v55 = vpop.f32.mrf.mxu3 }
 0x110   :  { %v886_v48 = vpop.f32.mrf.mxu2  ;;  %v791_v56 = vpop.f32.mrf.mxu0 }
 0x111   :  { %v887_v54 = vadd.f32 %v886_v48, %v838_v47  ;;  %v840_v57 = vpop.f32.mrf.mxu1 }
 0x112   :  { %v841_v62 = vadd.f32 %v840_v57, %v791_v56 }
 0x113   :  { %v1387_v60 = vmax.f32 %v887_v54, 0.0  ;;  %986 = vmatmul.bf16.gmra.mxu0 %v2706_v39 }
 0x114   :  { %1035 = vmatmul.bf16.gmra.mxu1 %v2708_v43  ;;  %1133 = vmatmul.bf16.gmra.mxu3 %v2706_v39 }
 0x115   :  { %1451 = vst [vmem:[%s3236_s2 + $0x1a0] sm:$0xff] %v1387_v60  ;;  %1084 = vmatmul.bf16.gmra.mxu2 %v2704_v38 }
 0x117   :  { %v2984_v4 = vpop.f32.mrf.mxu3 }
 0x118   :  { %v889_v63 = vpop.f32.mrf.mxu2  ;;  %v793_v6 = vpop.f32.mrf.mxu0 }
 0x119   :  { %v890_v3 = vadd.f32 %v889_v63, %v841_v62  ;;  %v842_v7 = vpop.f32.mrf.mxu1 }
 0x11a   :  { %v843_v9 = vadd.f32 %v842_v7, %v793_v6 }
 0x11b   :  { %v1391_v8 = vmax.f32 %v890_v3, 0.0 }
 0x11d   :  { %1455 = vst [vmem:[%s3236_s2 + $0x1c0] sm:$0xff] %v1391_v8 }
 0x11f   :  { %v2989_v17 = vpop.f32.mrf.mxu3 }
 0x120   :  { %v891_v10 = vpop.f32.mrf.mxu2  ;;  %v952_v23 = vpop.f32.mrf.mxu0 }
 0x121   :  { %v892_v16 = vadd.f32 %v891_v10, %v843_v9  ;;  %v953_v27 = vadd.f32 %v952_v23, %v2754_v15  ;;  %v1001_v28 = vpop.f32.mrf.mxu1 }
 0x123   :  { %v1395_v29 = vmax.f32 %v892_v16, 0.0  ;;  %v1002_v31 = vadd.f32 %v1001_v28, %v953_v27  ;;  %1147 = vmatmul.bf16.vlgmr.msra.gmra.mxu0 %v2326_v52 }
 0x124   :  { %1196 = vmatmul.bf16.vlgmr.msra.gmra.mxu1 %v2313_v46  ;;  %1294 = vmatmul.bf16.vlgmr.msra.gmra.mxu3 %v2326_v52 }
 0x125   :  { %1459 = vst [vmem:[%s3236_s2 + $0x1e0] sm:$0xff] %v1395_v29  ;;  %1245 = vmatmul.bf16.vlgmr.msra.gmra.mxu2 %v2324_v51  ;;  %v1336_v32 = vmax.f32 %v1002_v31, 0.0 }
 0x127   :  { %1400 = vst [vmem:[%s3236_s2 + $0x8] sm:$0xff] %v1336_v32  ;;  %v1099_v36 = vpop.f32.mrf.mxu3 }
 0x128   :  { %v1050_v15 = vpop.f32.mrf.mxu2  ;;  %v954_v37 = vpop.f32.mrf.mxu0 }
 0x129   :  { %v3002_v44 = vadd.f32 %v1099_v36, %v1050_v15  ;;  %v955_v47 = vadd.f32 %v954_v37, %v2771_v34  ;;  %v1003_v48 = vpop.f32.mrf.mxu1 }
 0x12b   :  { %v1004_v54 = vadd.f32 %v1003_v48, %v955_v47 }
 0x12d   :  { %v1340_v56 = vmax.f32 %v1004_v54, 0.0 }
 0x12f   :  { %1404 = vst [vmem:[%s3236_s2 + $0x28] sm:$0xff] %v1340_v56  ;;  %v1101_v51 = vpop.f32.mrf.mxu3 }
 0x130   :  { %v1052_v46 = vpop.f32.mrf.mxu2  ;;  %v957_v52 = vpop.f32.mrf.mxu0 }
 0x131   :  { %v3008_v57 = vadd.f32 %v1101_v51, %v1052_v46  ;;  %v958_v60 = vadd.f32 %v957_v52, %v2792_v59  ;;  %v1006_v62 = vpop.f32.mrf.mxu1 }
 0x133   :  { %v1007_v63 = vadd.f32 %v1006_v62, %v958_v60  ;;  %1152 = vmatmul.bf16.gmra.mxu0 %v2396_v21 }
 0x134   :  { %1201 = vmatmul.bf16.gmra.mxu1 %v2392_v19  ;;  %1299 = vmatmul.bf16.gmra.mxu3 %v2396_v21 }
 0x135   :  { %1250 = vmatmul.bf16.gmra.mxu2 %v2394_v20  ;;  %v1344_v34 = vmax.f32 %v1007_v63, 0.0 }
 0x137   :  { %1408 = vst [vmem:[%s3236_s2 + $0x48] sm:$0xff] %v1344_v34  ;;  %v1104_v6 = vpop.f32.mrf.mxu3 }
 0x138   :  { %v1055_v3 = vpop.f32.mrf.mxu2  ;;  %v959_v7 = vpop.f32.mrf.mxu0 }
 0x139   :  { %v3018_v8 = vadd.f32 %v1104_v6, %v1055_v3  ;;  %v960_v59 = vadd.f32 %v959_v7, %v2809_v14  ;;  %v1008_v9 = vpop.f32.mrf.mxu1 }
 0x13b   :  { %v1009_v10 = vadd.f32 %v1008_v9, %v960_v59 }
 0x13d   :  { %v1348_v16 = vmax.f32 %v1009_v10, 0.0 }
 0x13f   :  { %1412 = vst [vmem:[%s3236_s2 + $0x68] sm:$0xff] %v1348_v16  ;;  %v1106_v20 = vpop.f32.mrf.mxu3 }
 0x140   :  { %v1057_v19 = vpop.f32.mrf.mxu2  ;;  %v962_v21 = vpop.f32.mrf.mxu0 }
 0x141   :  { %v3024_v23 = vadd.f32 %v1106_v20, %v1057_v19  ;;  %v963_v27 = vadd.f32 %v962_v21, %v2830_v35  ;;  %v1011_v28 = vpop.f32.mrf.mxu1 }
 0x143   :  { %v1012_v29 = vadd.f32 %v1011_v28, %v963_v27  ;;  %1157 = vmatmul.bf16.gmra.mxu0 %v2448_v42 }
 0x144   :  { %1206 = vmatmul.bf16.gmra.mxu1 %v2444_v40  ;;  %1304 = vmatmul.bf16.gmra.mxu3 %v2448_v42 }
 0x145   :  { %1255 = vmatmul.bf16.gmra.mxu2 %v2446_v41  ;;  %v1352_v14 = vmax.f32 %v1012_v29, 0.0 }
 0x147   :  { %1416 = vst [vmem:[%s3236_s2 + $0x88] sm:$0xff] %v1352_v14  ;;  %v1109_v32 = vpop.f32.mrf.mxu3 }
 0x148   :  { %v1060_v31 = vpop.f32.mrf.mxu2  ;;  %v964_v15 = vpop.f32.mrf.mxu0 }
 0x149   :  { %v3034_v36 = vadd.f32 %v1109_v32, %v1060_v31  ;;  %v965_v35 = vadd.f32 %v964_v15, %v2847_v61  ;;  %v1013_v37 = vpop.f32.mrf.mxu1 }
 0x14b   :  { %v1014_v47 = vadd.f32 %v1013_v37, %v965_v35 }
 0x14d   :  { %v1356_v48 = vmax.f32 %v1014_v47, 0.0 }
 0x14f   :  { %1420 = vst [vmem:[%s3236_s2 + $0xa8] sm:$0xff] %v1356_v48  ;;  %v1111_v41 = vpop.f32.mrf.mxu3 }
 0x150   :  { %v1062_v40 = vpop.f32.mrf.mxu2  ;;  %v967_v42 = vpop.f32.mrf.mxu0 }
 0x151   :  { %v3040_v54 = vadd.f32 %v1111_v41, %v1062_v40  ;;  %v968_v56 = vadd.f32 %v967_v42, %v2868_v18  ;;  %v1016_v46 = vpop.f32.mrf.mxu1 }
 0x153   :  { %v1017_v51 = vadd.f32 %v1016_v46, %v968_v56  ;;  %1162 = vmatmul.bf16.gmra.mxu0 %v2500_v2 }
 0x154   :  { %1211 = vmatmul.bf16.gmra.mxu1 %v2496_v0  ;;  %1309 = vmatmul.bf16.gmra.mxu3 %v2500_v2 }
 0x155   :  { %1260 = vmatmul.bf16.gmra.mxu2 %v2498_v1  ;;  %v1360_v61 = vmax.f32 %v1017_v51, 0.0 }
 0x157   :  { %1424 = vst [vmem:[%s3236_s2 + $0xc8] sm:$0xff] %v1360_v61  ;;  %v1114_v60 = vpop.f32.mrf.mxu3 }
 0x158   :  { %v1065_v52 = vpop.f32.mrf.mxu2  ;;  %v969_v62 = vpop.f32.mrf.mxu0 }
 0x159   :  { %v3050_v63 = vadd.f32 %v1114_v60, %v1065_v52  ;;  %v970_v18 = vadd.f32 %v969_v62, %v2885_v45  ;;  %v1018_v34 = vpop.f32.mrf.mxu1 }
 0x15b   :  { %v1019_v3 = vadd.f32 %v1018_v34, %v970_v18 }
 0x15d   :  { %v1364_v6 = vmax.f32 %v1019_v3, 0.0 }
 0x15f   :  { %1428 = vst [vmem:[%s3236_s2 + $0xe8] sm:$0xff] %v1364_v6  ;;  %v1116_v1 = vpop.f32.mrf.mxu3 }
 0x160   :  { %v1067_v0 = vpop.f32.mrf.mxu2  ;;  %v972_v2 = vpop.f32.mrf.mxu0 }
 0x161   :  { %v3056_v7 = vadd.f32 %v1116_v1, %v1067_v0  ;;  %v973_v59 = vadd.f32 %v972_v2, %v2906_v5  ;;  %v1021_v9 = vpop.f32.mrf.mxu1 }
 0x163   :  { %v1022_v10 = vadd.f32 %v1021_v9, %v973_v59  ;;  %1167 = vmatmul.bf16.gmra.mxu0 %v2552_v26 }
 0x164   :  { %1216 = vmatmul.bf16.gmra.mxu1 %v2548_v24  ;;  %1314 = vmatmul.bf16.gmra.mxu3 %v2552_v26 }
 0x165   :  { %1265 = vmatmul.bf16.gmra.mxu2 %v2550_v25  ;;  %v1368_v45 = vmax.f32 %v1022_v10, 0.0 }
 0x167   :  { %1432 = vst [vmem:[%s3236_s2 + $0x108] sm:$0xff] %v1368_v45  ;;  %v1119_v19 = vpop.f32.mrf.mxu3 }
 0x168   :  { %v1070_v16 = vpop.f32.mrf.mxu2  ;;  %v974_v20 = vpop.f32.mrf.mxu0 }
 0x169   :  { %v3066_v21 = vadd.f32 %v1119_v19, %v1070_v16  ;;  %v975_v5 = vadd.f32 %v974_v20, %v2923_v30  ;;  %v1023_v27 = vpop.f32.mrf.mxu1 }
 0x16b   :  { %v1024_v28 = vadd.f32 %v1023_v27, %v975_v5 }
 0x16d   :  { %v1372_v29 = vmax.f32 %v1024_v28, 0.0 }
 0x16f   :  { %1436 = vst [vmem:[%s3236_s2 + $0x128] sm:$0xff] %v1372_v29  ;;  %v1121_v25 = vpop.f32.mrf.mxu3 }
 0x170   :  { %v1072_v24 = vpop.f32.mrf.mxu2  ;;  %v977_v26 = vpop.f32.mrf.mxu0 }
 0x171   :  { %v3072_v14 = vadd.f32 %v1121_v25, %v1072_v24  ;;  %v978_v31 = vadd.f32 %v977_v26, %v2944_v58  ;;  %v1026_v32 = vpop.f32.mrf.mxu1 }
 0x173   :  { %v1027_v15 = vadd.f32 %v1026_v32, %v978_v31  ;;  %1172 = vmatmul.bf16.gmra.mxu0 %v2604_v53 }
 0x174   :  { %1221 = vmatmul.bf16.gmra.mxu1 %v2600_v49  ;;  %1319 = vmatmul.bf16.gmra.mxu3 %v2604_v53 }
 0x175   :  { %1270 = vmatmul.bf16.gmra.mxu2 %v2602_v50  ;;  %v1376_v30 = vmax.f32 %v1027_v15, 0.0 }
 0x177   :  { %1440 = vst [vmem:[%s3236_s2 + $0x148] sm:$0xff] %v1376_v30  ;;  %v1124_v37 = vpop.f32.mrf.mxu3 }
 0x178   :  { %v1075_v35 = vpop.f32.mrf.mxu2  ;;  %v979_v47 = vpop.f32.mrf.mxu0 }
 0x179   :  { %v3082_v48 = vadd.f32 %v1124_v37, %v1075_v35  ;;  %v980_v58 = vadd.f32 %v979_v47, %v2961_v22  ;;  %v1028_v40 = vpop.f32.mrf.mxu1 }
 0x17b   :  { %v1029_v41 = vadd.f32 %v1028_v40, %v980_v58 }
 0x17d   :  { %v1380_v42 = vmax.f32 %v1029_v41, 0.0 }
 0x17f   :  { %1444 = vst [vmem:[%s3236_s2 + $0x168] sm:$0xff] %v1380_v42  ;;  %v1126_v50 = vpop.f32.mrf.mxu3 }
 0x180   :  { %v1077_v49 = vpop.f32.mrf.mxu2  ;;  %v982_v53 = vpop.f32.mrf.mxu0 }
 0x181   :  { %v3088_v56 = vadd.f32 %v1126_v50, %v1077_v49  ;;  %v983_v46 = vadd.f32 %v982_v53, %v2970_v33  ;;  %v1031_v51 = vpop.f32.mrf.mxu1 }
 0x183   :  { %v1032_v61 = vadd.f32 %v1031_v51, %v983_v46  ;;  %1177 = vmatmul.bf16.gmra.mxu0 %v2656_v13 }
 0x184   :  { %1226 = vmatmul.bf16.gmra.mxu1 %v2652_v11  ;;  %1324 = vmatmul.bf16.gmra.mxu3 %v2656_v13 }
 0x185   :  { %1275 = vmatmul.bf16.gmra.mxu2 %v2654_v12  ;;  %v1384_v22 = vmax.f32 %v1032_v61, 0.0 }
 0x187   :  { %1448 = vst [vmem:[%s3236_s2 + $0x188] sm:$0xff] %v1384_v22  ;;  %v1129_v60 = vpop.f32.mrf.mxu3 }
 0x188   :  { %v1080_v52 = vpop.f32.mrf.mxu2  ;;  %v984_v62 = vpop.f32.mrf.mxu0 }
 0x189   :  { %v3098_v18 = vadd.f32 %v1129_v60, %v1080_v52  ;;  %v985_v33 = vadd.f32 %v984_v62, %v2975_v55  ;;  %v1033_v34 = vpop.f32.mrf.mxu1 }
 0x18b   :  { %v1034_v3 = vadd.f32 %v1033_v34, %v985_v33 }
 0x18d   :  { %v1388_v6 = vmax.f32 %v1034_v3, 0.0 }
 0x18f   :  { %1452 = vst [vmem:[%s3236_s2 + $0x1a8] sm:$0xff] %v1388_v6  ;;  %v1131_v12 = vpop.f32.mrf.mxu3 }
 0x190   :  { %v1082_v11 = vpop.f32.mrf.mxu2  ;;  %v987_v13 = vpop.f32.mrf.mxu0 }
 0x191   :  { %v3104_v0 = vadd.f32 %v1131_v12, %v1082_v11  ;;  %v988_v1 = vadd.f32 %v987_v13, %v2984_v4  ;;  %v1036_v2 = vpop.f32.mrf.mxu1 }
 0x193   :  { %v1037_v59 = vadd.f32 %v1036_v2, %v988_v1  ;;  %1182 = vmatmul.bf16.gmra.mxu0 %v2708_v43 }
 0x194   :  { %1231 = vmatmul.bf16.gmra.mxu1 %v2704_v38  ;;  %1329 = vmatmul.bf16.gmra.mxu3 %v2708_v43 }
 0x195   :  { %1280 = vmatmul.bf16.gmra.mxu2 %v2706_v39  ;;  %v1392_v55 = vmax.f32 %v1037_v59, 0.0 }
 0x197   :  { %1456 = vst [vmem:[%s3236_s2 + $0x1c8] sm:$0xff] %v1392_v55  ;;  %v1134_v10 = vpop.f32.mrf.mxu3 }
 0x198   :  { %v1085_v9 = vpop.f32.mrf.mxu2  ;;  %v989_v45 = vpop.f32.mrf.mxu0 }
 0x199   :  { %v3114_v16 = vadd.f32 %v1134_v10, %v1085_v9  ;;  %v990_v4 = vadd.f32 %v989_v45, %v2989_v17  ;;  %v1038_v19 = vpop.f32.mrf.mxu1 }
 0x19b   :  { %v1039_v20 = vadd.f32 %v1038_v19, %v990_v4 }
 0x19d   :  { %v1396_v5 = vmax.f32 %v1039_v20, 0.0 }
 0x19f   :  { %1460 = vst [vmem:[%s3236_s2 + $0x1e8] sm:$0xff] %v1396_v5  ;;  %v1136_v39 = vpop.f32.mrf.mxu3 }
 0x1a0   :  { %v1087_v38 = vpop.f32.mrf.mxu2  ;;  %v1148_v43 = vpop.f32.mrf.mxu0 }
 0x1a1   :  { %v3120_v27 = vadd.f32 %v1136_v39, %v1087_v38  ;;  %v1149_v28 = vadd.f32 %v1148_v43, %v3002_v44  ;;  %v1197_v29 = vpop.f32.mrf.mxu1 }
 0x1a3   :  { %v1337_v24 = vmax.f32 %v1149_v28, 0.0 }
 0x1a5   :  { %1401 = vst [vmem:[%s3236_s2 + $0x10] sm:$0xff] %v1337_v24 }
 0x1a7   :  { %v1295_v26 = vpop.f32.mrf.mxu3 }
 0x1a8   :  { %v1246_v17 = vpop.f32.mrf.mxu2  ;;  %v1150_v31 = vpop.f32.mrf.mxu0 }
 0x1a9   :  { %v1247_v25 = vadd.f32 %v1246_v17, %v1197_v29  ;;  %v1151_v32 = vadd.f32 %v1150_v31, %v3008_v57  ;;  %v1199_v15 = vpop.f32.mrf.mxu1 }
 0x1ab   :  { %v1296_v30 = vadd.f32 %v1295_v26, %v1247_v25  ;;  %v1341_v35 = vmax.f32 %v1151_v32, 0.0 }
 0x1ad   :  { %v1338_v37 = vmax.f32 %v1296_v30, 0.0  ;;  %1405 = vst [vmem:[%s3236_s2 + $0x30] sm:$0xff] %v1341_v35 }
 0x1af   :  { %1402 = vst [vmem:[%s3236_s2 + $0x18] sm:$0xff] %v1338_v37  ;;  %v1297_v58 = vpop.f32.mrf.mxu3 }
 0x1b0   :  { %v1248_v44 = vpop.f32.mrf.mxu2  ;;  %v1153_v40 = vpop.f32.mrf.mxu0 }
 0x1b1   :  { %v1249_v47 = vadd.f32 %v1248_v44, %v1199_v15  ;;  %v1154_v41 = vadd.f32 %v1153_v40, %v3018_v8  ;;  %v1202_v42 = vpop.f32.mrf.mxu1 }
 0x1b3   :  { %v1298_v57 = vadd.f32 %v1297_v58, %v1249_v47  ;;  %v1345_v49 = vmax.f32 %v1154_v41, 0.0 }
 0x1b5   :  { %v1342_v50 = vmax.f32 %v1298_v57, 0.0  ;;  %1409 = vst [vmem:[%s3236_s2 + $0x50] sm:$0xff] %v1345_v49 }
 0x1b7   :  { %1406 = vst [vmem:[%s3236_s2 + $0x38] sm:$0xff] %v1342_v50  ;;  %v1300_v51 = vpop.f32.mrf.mxu3 }
 0x1b8   :  { %v1251_v53 = vpop.f32.mrf.mxu2  ;;  %v1155_v61 = vpop.f32.mrf.mxu0 }
 0x1b9   :  { %v1252_v46 = vadd.f32 %v1251_v53, %v1202_v42  ;;  %v1156_v22 = vadd.f32 %v1155_v61, %v3024_v23  ;;  %v1204_v52 = vpop.f32.mrf.mxu1 }
 0x1bb   :  { %v1301_v8 = vadd.f32 %v1300_v51, %v1252_v46  ;;  %v1349_v60 = vmax.f32 %v1156_v22, 0.0 }
 0x1bd   :  { %v1346_v62 = vmax.f32 %v1301_v8, 0.0  ;;  %1413 = vst [vmem:[%s3236_s2 + $0x70] sm:$0xff] %v1349_v60 }
 0x1bf   :  { %1410 = vst [vmem:[%s3236_s2 + $0x58] sm:$0xff] %v1346_v62  ;;  %v1302_v3 = vpop.f32.mrf.mxu3 }
 0x1c0   :  { %v1253_v33 = vpop.f32.mrf.mxu2  ;;  %v1158_v6 = vpop.f32.mrf.mxu0 }
 0x1c1   :  { %v1254_v34 = vadd.f32 %v1253_v33, %v1204_v52  ;;  %v1159_v11 = vadd.f32 %v1158_v6, %v3034_v36  ;;  %v1207_v12 = vpop.f32.mrf.mxu1 }
 0x1c3   :  { %v1303_v23 = vadd.f32 %v1302_v3, %v1254_v34  ;;  %v1353_v13 = vmax.f32 %v1159_v11, 0.0 }
 0x1c5   :  { %v1350_v1 = vmax.f32 %v1303_v23, 0.0  ;;  %1417 = vst [vmem:[%s3236_s2 + $0x90] sm:$0xff] %v1353_v13 }
 0x1c7   :  { %1414 = vst [vmem:[%s3236_s2 + $0x78] sm:$0xff] %v1350_v1  ;;  %v1305_v55 = vpop.f32.mrf.mxu3 }
 0x1c8   :  { %v1256_v2 = vpop.f32.mrf.mxu2  ;;  %v1160_v9 = vpop.f32.mrf.mxu0 }
 0x1c9   :  { %v1257_v59 = vadd.f32 %v1256_v2, %v1207_v12  ;;  %v1161_v10 = vadd.f32 %v1160_v9, %v3040_v54  ;;  %v1209_v45 = vpop.f32.mrf.mxu1 }
 0x1cb   :  { %v1306_v36 = vadd.f32 %v1305_v55, %v1257_v59  ;;  %v1357_v4 = vmax.f32 %v1161_v10, 0.0 }
 0x1cd   :  { %v1354_v19 = vmax.f32 %v1306_v36, 0.0  ;;  %1421 = vst [vmem:[%s3236_s2 + $0xb0] sm:$0xff] %v1357_v4 }
 0x1cf   :  { %1418 = vst [vmem:[%s3236_s2 + $0x98] sm:$0xff] %v1354_v19  ;;  %v1307_v38 = vpop.f32.mrf.mxu3 }
 0x1d0   :  { %v1258_v20 = vpop.f32.mrf.mxu2  ;;  %v1163_v39 = vpop.f32.mrf.mxu0 }
 0x1d1   :  { %v1259_v5 = vadd.f32 %v1258_v20, %v1209_v45  ;;  %v1164_v43 = vadd.f32 %v1163_v39, %v3050_v63  ;;  %v1212_v28 = vpop.f32.mrf.mxu1 }
 0x1d3   :  { %v1308_v54 = vadd.f32 %v1307_v38, %v1259_v5  ;;  %v1361_v29 = vmax.f32 %v1164_v43, 0.0 }
 0x1d5   :  { %v1358_v24 = vmax.f32 %v1308_v54, 0.0  ;;  %1425 = vst [vmem:[%s3236_s2 + $0xd0] sm:$0xff] %v1361_v29 }
 0x1d7   :  { %1422 = vst [vmem:[%s3236_s2 + $0xb8] sm:$0xff] %v1358_v24  ;;  %v1310_v26 = vpop.f32.mrf.mxu3 }
 0x1d8   :  { %v1261_v17 = vpop.f32.mrf.mxu2  ;;  %v1165_v31 = vpop.f32.mrf.mxu0 }
 0x1d9   :  { %v1262_v25 = vadd.f32 %v1261_v17, %v1212_v28  ;;  %v1166_v32 = vadd.f32 %v1165_v31, %v3056_v7  ;;  %v1214_v15 = vpop.f32.mrf.mxu1 }
 0x1db   :  { %v1311_v63 = vadd.f32 %v1310_v26, %v1262_v25  ;;  %v1365_v30 = vmax.f32 %v1166_v32, 0.0 }
 0x1dd   :  { %v1362_v35 = vmax.f32 %v1311_v63, 0.0  ;;  %1429 = vst [vmem:[%s3236_s2 + $0xf0] sm:$0xff] %v1365_v30 }
 0x1df   :  { %1426 = vst [vmem:[%s3236_s2 + $0xd8] sm:$0xff] %v1362_v35  ;;  %v1312_v47 = vpop.f32.mrf.mxu3 }
 0x1e0   :  { %v1263_v37 = vpop.f32.mrf.mxu2  ;;  %v1168_v58 = vpop.f32.mrf.mxu0 }
 0x1e1   :  { %v1264_v44 = vadd.f32 %v1263_v37, %v1214_v15  ;;  %v1169_v40 = vadd.f32 %v1168_v58, %v3066_v21  ;;  %v1217_v41 = vpop.f32.mrf.mxu1 }
 0x1e3   :  { %v1313_v7 = vadd.f32 %v1312_v47, %v1264_v44  ;;  %v1369_v42 = vmax.f32 %v1169_v40, 0.0 }
 0x1e5   :  { %v1366_v57 = vmax.f32 %v1313_v7, 0.0  ;;  %1433 = vst [vmem:[%s3236_s2 + $0x110] sm:$0xff] %v1369_v42 }
 0x1e7   :  { %1430 = vst [vmem:[%s3236_s2 + $0xf8] sm:$0xff] %v1366_v57  ;;  %v1315_v53 = vpop.f32.mrf.mxu3 }
 0x1e8   :  { %v1266_v49 = vpop.f32.mrf.mxu2  ;;  %v1170_v46 = vpop.f32.mrf.mxu0 }
 0x1e9   :  { %v1267_v50 = vadd.f32 %v1266_v49, %v1217_v41  ;;  %v1171_v51 = vadd.f32 %v1170_v46, %v3072_v14  ;;  %v1219_v61 = vpop.f32.mrf.mxu1 }
 0x1eb   :  { %v1316_v21 = vadd.f32 %v1315_v53, %v1267_v50  ;;  %v1373_v22 = vmax.f32 %v1171_v51, 0.0 }
 0x1ed   :  { %v1370_v52 = vmax.f32 %v1316_v21, 0.0  ;;  %1437 = vst [vmem:[%s3236_s2 + $0x130] sm:$0xff] %v1373_v22 }
 0x1ef   :  { %1434 = vst [vmem:[%s3236_s2 + $0x118] sm:$0xff] %v1370_v52  ;;  %v1317_v62 = vpop.f32.mrf.mxu3 }
 0x1f0   :  { %v1268_v8 = vpop.f32.mrf.mxu2  ;;  %v1173_v33 = vpop.f32.mrf.mxu0 }
 0x1f1   :  { %v1269_v60 = vadd.f32 %v1268_v8, %v1219_v61  ;;  %v1174_v34 = vadd.f32 %v1173_v33, %v3082_v48  ;;  %v1222_v3 = vpop.f32.mrf.mxu1 }
 0x1f3   :  { %v1318_v14 = vadd.f32 %v1317_v62, %v1269_v60  ;;  %v1377_v6 = vmax.f32 %v1174_v34, 0.0 }
 0x1f5   :  { %v1374_v11 = vmax.f32 %v1318_v14, 0.0  ;;  %1441 = vst [vmem:[%s3236_s2 + $0x150] sm:$0xff] %v1377_v6 }
 0x1f7   :  { %1438 = vst [vmem:[%s3236_s2 + $0x138] sm:$0xff] %v1374_v11  ;;  %v1320_v13 = vpop.f32.mrf.mxu3 }
 0x1f8   :  { %v1271_v12 = vpop.f32.mrf.mxu2  ;;  %v1175_v1 = vpop.f32.mrf.mxu0 }
 0x1f9   :  { %v1272_v23 = vadd.f32 %v1271_v12, %v1222_v3  ;;  %v1176_v2 = vadd.f32 %v1175_v1, %v3088_v56  ;;  %v1224_v59 = vpop.f32.mrf.mxu1 }
 0x1fb   :  { %v1321_v48 = vadd.f32 %v1320_v13, %v1272_v23  ;;  %v1381_v55 = vmax.f32 %v1176_v2, 0.0 }
 0x1fd   :  { %v1378_v9 = vmax.f32 %v1321_v48, 0.0  ;;  %1445 = vst [vmem:[%s3236_s2 + $0x170] sm:$0xff] %v1381_v55 }
 0x1ff   :  { %1442 = vst [vmem:[%s3236_s2 + $0x158] sm:$0xff] %v1378_v9  ;;  %v1322_v36 = vpop.f32.mrf.mxu3 }
 0x200   :  { %v1273_v10 = vpop.f32.mrf.mxu2  ;;  %v1178_v4 = vpop.f32.mrf.mxu0 }
 0x201   :  { %v1274_v45 = vadd.f32 %v1273_v10, %v1224_v59  ;;  %v1179_v19 = vadd.f32 %v1178_v4, %v3098_v18  ;;  %v1227_v20 = vpop.f32.mrf.mxu1 }
 0x203   :  { %v1323_v56 = vadd.f32 %v1322_v36, %v1274_v45  ;;  %v1385_v5 = vmax.f32 %v1179_v19, 0.0 }
 0x205   :  { %v1382_v38 = vmax.f32 %v1323_v56, 0.0  ;;  %1449 = vst [vmem:[%s3236_s2 + $0x190] sm:$0xff] %v1385_v5 }
 0x207   :  { %1446 = vst [vmem:[%s3236_s2 + $0x178] sm:$0xff] %v1382_v38  ;;  %v1325_v28 = vpop.f32.mrf.mxu3 }
 0x208   :  { %v1276_v39 = vpop.f32.mrf.mxu2  ;;  %v1180_v54 = vpop.f32.mrf.mxu0 }
 0x209   :  { %v1277_v43 = vadd.f32 %v1276_v39, %v1227_v20  ;;  %v1181_v29 = vadd.f32 %v1180_v54, %v3104_v0  ;;  %v1229_v17 = vpop.f32.mrf.mxu1 }
 0x20b   :  { %v1326_v24 = vadd.f32 %v1325_v28, %v1277_v43  ;;  %v1389_v18 = vmax.f32 %v1181_v29, 0.0 }
 0x20d   :  { %v1386_v25 = vmax.f32 %v1326_v24, 0.0  ;;  %1453 = vst [vmem:[%s3236_s2 + $0x1b0] sm:$0xff] %v1389_v18 }
 0x20f   :  { %1450 = vst [vmem:[%s3236_s2 + $0x198] sm:$0xff] %v1386_v25  ;;  %v1327_v32 = vpop.f32.mrf.mxu3 }
 0x210   :  { %v1278_v26 = vpop.f32.mrf.mxu2  ;;  %v1183_v15 = vpop.f32.mrf.mxu0 }
 0x211   :  { %v1279_v31 = vadd.f32 %v1278_v26, %v1229_v17  ;;  %v1184_v63 = vadd.f32 %v1183_v15, %v3114_v16  ;;  %v1232_v37 = vpop.f32.mrf.mxu1 }
 0x213   :  { %v1328_v30 = vadd.f32 %v1327_v32, %v1279_v31  ;;  %v1393_v0 = vmax.f32 %v1184_v63, 0.0 }
 0x215   :  { %v1390_v35 = vmax.f32 %v1328_v30, 0.0  ;;  %1457 = vst [vmem:[%s3236_s2 + $0x1d0] sm:$0xff] %v1393_v0 }
 0x217   :  { %1454 = vst [vmem:[%s3236_s2 + $0x1b8] sm:$0xff] %v1390_v35  ;;  %v1330_v58 = vpop.f32.mrf.mxu3 }
 0x218   :  { %v1281_v44 = vpop.f32.mrf.mxu2  ;;  %v1185_v40 = vpop.f32.mrf.mxu0 }
 0x219   :  { %v1282_v47 = vadd.f32 %v1281_v44, %v1232_v37  ;;  %v1186_v41 = vadd.f32 %v1185_v40, %v3120_v27  ;;  %v1234_v57 = vpop.f32.mrf.mxu1 }
 0x21b   :  { %v1331_v7 = vadd.f32 %v1330_v58, %v1282_v47  ;;  %v1397_v16 = vmax.f32 %v1186_v41, 0.0 }
 0x21d   :  { %v1394_v42 = vmax.f32 %v1331_v7, 0.0  ;;  %1461 = vst [vmem:[%s3236_s2 + $0x1f0] sm:$0xff] %v1397_v16 }
 0x21f   :  { %1458 = vst [vmem:[%s3236_s2 + $0x1d8] sm:$0xff] %v1394_v42  ;;  %v1332_v53 = vpop.f32.mrf.mxu3 }
 0x220   :  { %v1283_v49 = vpop.f32.mrf.mxu2 }
 0x221   :  { %v1284_v50 = vadd.f32 %v1283_v49, %v1234_v57 }
 0x223   :  { %v1333_v46 = vadd.f32 %v1332_v53, %v1284_v50 }
 0x225   :  { %v1398_v51 = vmax.f32 %v1333_v46, 0.0 }
 0x227   :  { %1462 = vst [vmem:[%s3236_s2 + $0x1f8] sm:$0xff] %v1398_v51 }

</bundles_post_ra>
